<compile_context>
chip_gen: v7x
topology: tpu7x:2x2x1
jax: 0.10.0
libtpu: 0.0.40
codegen_flags: <defaults>
</compile_context>

<pallas_src>
import functools

import jax
import jax.numpy as jnp
from jax import lax
from jax.experimental import pallas as pl
from jax.experimental.pallas import tpu as pltpu

BN_EPS = 1e-5   # PyTorch BatchNorm default eps
LANE = 128      # TPU lane width
LPAD = 16       # leading zero rows of the conv-input canvas (keeps the
                # interior store offset 16-row aligned for bf16 tiles)


# ----------------------------------------------------------------------------
# small helpers
# ----------------------------------------------------------------------------
def _pad_last(a, target):
    pad = target - a.shape[-1]
    if pad == 0:
        return a
    widths = [(0, 0)] * (a.ndim - 1) + [(0, pad)]
    return jnp.pad(a, widths)


def _elu(t):
    return jnp.where(t > 0, t, jnp.exp(t) - 1.0)


# ----------------------------------------------------------------------------
# Pallas kernels
# ----------------------------------------------------------------------------
def _down_conv_kernel(p_ref, w_ref, b_ref, y_ref, ssum_ref, ssq_ref, *, Wo, Wq):
    """Stride-2 k=2 conv as a matmul on space-to-depth patches + partial BN stats.

    p_ref: (1, Ho*Wq, 8*Cin) bf16 (canvas row order, wo>=Wo rows are zero)
    w_ref: (8*Cin, Cp) bf16   b_ref: (1, Cp) f32
    y_ref: (1, Ho*Wq, Cp) f32 (scratch columns masked to 0)
    ssum/ssq: (1, 1, Cp) f32 partial stats per plane
    """
    y = jnp.dot(p_ref[0], w_ref[...], preferred_element_type=jnp.float32)
    y = y + b_ref[...]
    col = lax.broadcasted_iota(jnp.int32, (y.shape[0], 1), 0) % Wq
    y = jnp.where(col < Wo, y, 0.0)
    y_ref[0] = y
    ssum_ref[0] = jnp.sum(y, axis=0, keepdims=True)
    ssq_ref[0] = jnp.sum(y * y, axis=0, keepdims=True)


def _conv5_kernel(x_ref, w_ref, b_ref, y_ref, ssum_ref, ssq_ref, *, Ho, Wo, Wq):
    """5x5x5 pad=2 conv.  Grid = (N, Do, kd); kd innermost ('arbitrary').

    x_ref: (1, CROWS, Cp) bf16  halo canvas plane at clamped depth d+kd-2;
           interior value act[h, w] lives at row LPAD + 2*Wq + h*Wq + w,
           all other rows / scratch columns are zero.
    w_ref: (5, 5, 5*Cp, Cp) bf16 VMEM-resident; [kd, kh, kw*Cp + cin, cout].
    y_ref: (1, Ho*Wq, Cp) f32 accumulator (revisited across kd).
    ssum/ssq: (1, 1, Cp) f32 partial BN stats (written at the last kd step).
    """
    d = pl.program_id(1)
    kd = pl.program_id(2)
    nD = pl.num_programs(1)
    HoWq = Ho * Wq
    HpWq = (Ho + 4) * Wq
    Cp = y_ref.shape[-1]

    @pl.when(kd == 0)
    def _init():
        y_ref[0] = jnp.zeros((HoWq, Cp), jnp.float32)

    src = d + kd - 2                      # true input depth of this tap
    in_bounds = jnp.logical_and(src >= 0, src < nD)

    @pl.when(in_bounds)
    def _accumulate():
        x = x_ref[0]                                        # (CROWS, Cp) bf16
        # kw-unfold once per step: x5[r, kw*Cp:(kw+1)*Cp] = x[r + LPAD-2 + kw]
        x5 = jnp.concatenate(
            [x[LPAD - 2 + kw: LPAD - 2 + kw + HpWq, :] for kw in range(5)],
            axis=-1)                                        # (HpWq, 5*Cp)
        part = None
        for kh in range(5):
            lhs = x5[kh * Wq: kh * Wq + HoWq, :]            # 8-aligned slice
            c = jnp.dot(lhs, w_ref[kd, kh],
                        preferred_element_type=jnp.float32)
            part = c if part is None else part + c
        y_ref[0] = y_ref[0] + part

    @pl.when(kd == 4)
    def _finalize():
        col = lax.broadcasted_iota(jnp.int32, (HoWq, 1), 0) % Wq
        y = jnp.where(col < Wo, y_ref[0] + b_ref[...], 0.0)
        y_ref[0] = y
        ssum_ref[0] = jnp.sum(y, axis=0, keepdims=True)
        ssq_ref[0] = jnp.sum(y * y, axis=0, keepdims=True)


def _down_bn_elu_kernel(y_ref, ss_ref, down_ref, cv_ref, *, Ho, Wo, Wq):
    """down = ELU(y*scale+shift) (f32 canvas) + bf16 halo-padded conv input."""
    t = _elu(y_ref[0] * ss_ref[0:1, :] + ss_ref[1:2, :])
    col = lax.broadcasted_iota(jnp.int32, (Ho * Wq, 1), 0) % Wq
    t = jnp.where(col < Wo, t, 0.0)
    down_ref[0] = t
    off = LPAD + 2 * Wq
    cv_ref[0] = jnp.zeros((cv_ref.shape[1], cv_ref.shape[2]), jnp.bfloat16)
    cv_ref[0, off: off + Ho * Wq, :] = t.astype(jnp.bfloat16)


def _mid_bn_elu_kernel(y_ref, ss_ref, cv_ref, *, Ho, Wo, Wq):
    """ELU(BN(y)) written straight into the next layer's bf16 halo canvas."""
    t = _elu(y_ref[0] * ss_ref[0:1, :] + ss_ref[1:2, :])
    col = lax.broadcasted_iota(jnp.int32, (Ho * Wq, 1), 0) % Wq
    t = jnp.where(col < Wo, t, 0.0)
    off = LPAD + 2 * Wq
    cv_ref[0] = jnp.zeros((cv_ref.shape[1], cv_ref.shape[2]), jnp.bfloat16)
    cv_ref[0, off: off + Ho * Wq, :] = t.astype(jnp.bfloat16)


def _last_bn_elu_res_kernel(y_ref, ss_ref, r_ref, o_ref):
    """out = ELU(ELU(y*scale+shift) + residual)  -- fused epilogue."""
    t = _elu(y_ref[0] * ss_ref[0:1, :] + ss_ref[1:2, :])
    o_ref[0] = _elu(t + r_ref[0])


def _add_elu_kernel(a_ref, b_ref, o_ref):
    o_ref[0] = _elu(a_ref[0] + b_ref[0])


# ----------------------------------------------------------------------------
# pallas_call wrappers
# ----------------------------------------------------------------------------
def _down_conv(p, w, b, Wo, Wq):
    P, RY, K = p.shape
    Cp = w.shape[1]
    kernel = functools.partial(_down_conv_kernel, Wo=Wo, Wq=Wq)
    return pl.pallas_call(
        kernel,
        grid=(P,),
        in_specs=[pl.BlockSpec((1, RY, K), lambda i: (i, 0, 0)),
                  pl.BlockSpec((K, Cp), lambda i: (0, 0)),
                  pl.BlockSpec((1, Cp), lambda i: (0, 0))],
        out_specs=[pl.BlockSpec((1, RY, Cp), lambda i: (i, 0, 0)),
                   pl.BlockSpec((1, 1, Cp), lambda i: (i, 0, 0)),
                   pl.BlockSpec((1, 1, Cp), lambda i: (i, 0, 0))],
        out_shape=[jax.ShapeDtypeStruct((P, RY, Cp), jnp.float32),
                   jax.ShapeDtypeStruct((P, 1, Cp), jnp.float32),
                   jax.ShapeDtypeStruct((P, 1, Cp), jnp.float32)],
        compiler_params=pltpu.CompilerParams(
            dimension_semantics=("parallel",)),
    )(p, w, b)


def _conv5_bn_stats(xc, w5, b, N, Do, Ho, Wo, Wq):
    P, CROWS, Cp = xc.shape
    RY = Ho * Wq
    kernel = functools.partial(_conv5_kernel, Ho=Ho, Wo=Wo, Wq=Wq)

    def x_map(n, d, kd):
        src = jnp.clip(d + kd - 2, 0, Do - 1)     # clamped; masked in-kernel
        return (n * Do + src, 0, 0)

    def y_map(n, d, kd):
        return (n * Do + d, 0, 0)

    # advisory cost: x re-read 5x (kd axis), weights fetched once (resident)
    flops = 2 * N * Do * 125 * RY * Cp * Cp
    bytes_accessed = int(P * 5 * CROWS * Cp * 2 + 125 * Cp * Cp * 2
                         + P * RY * Cp * 4 + P * 2 * Cp * 4)

    # VMEM budget from actual block sizes (double-buffered x/y, resident w,
    # in-kernel x5 + matmul temporaries), clamped to the smallest physical
    # VMEM across generations (v7x = 64 MiB).
    xb = CROWS * Cp * 2
    wb = 125 * Cp * Cp * 2
    yb = RY * Cp * 4
    x5b = (Ho + 4) * Wq * 5 * Cp * 2
    need = 2 * (xb + yb + 3 * Cp * 4) + 2 * wb + 2 * x5b + 4 * yb + (4 << 20)
    vmem_limit = int(min(max(need, 32 << 20), 64 << 20))

    return pl.pallas_call(
        kernel,
        grid=(N, Do, 5),
        in_specs=[pl.BlockSpec((1, CROWS, Cp), x_map),
                  pl.BlockSpec((5, 5, 5 * Cp, Cp), lambda n, d, kd: (0, 0, 0, 0)),
                  pl.BlockSpec((1, Cp), lambda n, d, kd: (0, 0))],
        out_specs=[pl.BlockSpec((1, RY, Cp), y_map),
                   pl.BlockSpec((1, 1, Cp), y_map),
                   pl.BlockSpec((1, 1, Cp), y_map)],
        out_shape=[jax.ShapeDtypeStruct((P, RY, Cp), jnp.float32),
                   jax.ShapeDtypeStruct((P, 1, Cp), jnp.float32),
                   jax.ShapeDtypeStruct((P, 1, Cp), jnp.float32)],
        compiler_params=pltpu.CompilerParams(
            dimension_semantics=("parallel", "parallel", "arbitrary"),
            vmem_limit_bytes=vmem_limit),
        cost_estimate=pl.CostEstimate(flops=flops, transcendentals=0,
                                      bytes_accessed=bytes_accessed),
    )(xc, w5, b)


def _down_bn_elu(y, ss, CROWS, Ho, Wo, Wq):
    P, RY, Cp = y.shape
    kernel = functools.partial(_down_bn_elu_kernel, Ho=Ho, Wo=Wo, Wq=Wq)
    return pl.pallas_call(
        kernel,
        grid=(P,),
        in_specs=[pl.BlockSpec((1, RY, Cp), lambda i: (i, 0, 0)),
                  pl.BlockSpec((2, Cp), lambda i: (0, 0))],
        out_specs=[pl.BlockSpec((1, RY, Cp), lambda i: (i, 0, 0)),
                   pl.BlockSpec((1, CROWS, Cp), lambda i: (i, 0, 0))],
        out_shape=[jax.ShapeDtypeStruct((P, RY, Cp), jnp.float32),
                   jax.ShapeDtypeStruct((P, CROWS, Cp), jnp.bfloat16)],
        compiler_params=pltpu.CompilerParams(
            dimension_semantics=("parallel",)),
    )(y, ss)


def _mid_bn_elu(y, ss, CROWS, Ho, Wo, Wq):
    P, RY, Cp = y.shape
    kernel = functools.partial(_mid_bn_elu_kernel, Ho=Ho, Wo=Wo, Wq=Wq)
    return pl.pallas_call(
        kernel,
        grid=(P,),
        in_specs=[pl.BlockSpec((1, RY, Cp), lambda i: (i, 0, 0)),
                  pl.BlockSpec((2, Cp), lambda i: (0, 0))],
        out_specs=pl.BlockSpec((1, CROWS, Cp), lambda i: (i, 0, 0)),
        out_shape=jax.ShapeDtypeStruct((P, CROWS, Cp), jnp.bfloat16),
        compiler_params=pltpu.CompilerParams(
            dimension_semantics=("parallel",)),
    )(y, ss)


def _last_bn_elu_res(y, ss, r):
    P, RY, Cp = y.shape
    spec = pl.BlockSpec((1, RY, Cp), lambda i: (i, 0, 0))
    return pl.pallas_call(
        _last_bn_elu_res_kernel,
        grid=(P,),
        in_specs=[spec, pl.BlockSpec((2, Cp), lambda i: (0, 0)), spec],
        out_specs=spec,
        out_shape=jax.ShapeDtypeStruct((P, RY, Cp), jnp.float32),
        compiler_params=pltpu.CompilerParams(
            dimension_semantics=("parallel",)),
    )(y, ss, r)


def _add_elu(a, b):
    P, RY, Cp = a.shape
    spec = pl.BlockSpec((1, RY, Cp), lambda i: (i, 0, 0))
    return pl.pallas_call(
        _add_elu_kernel,
        grid=(P,),
        in_specs=[spec, spec],
        out_specs=spec,
        out_shape=jax.ShapeDtypeStruct((P, RY, Cp), jnp.float32),
        compiler_params=pltpu.CompilerParams(
            dimension_semantics=("parallel",)),
    )(a, b)


def _bn_scale_shift(ssum, ssq, gamma, beta, count):
    """Reduce partial (sum, sum_sq) -> per-channel scale/shift (training BN)."""
    c = ssum.shape[-1]
    s = jnp.sum(ssum.reshape(-1, c), axis=0)
    q = jnp.sum(ssq.reshape(-1, c), axis=0)
    mean = s / count
    var = jnp.maximum(q / count - mean * mean, 0.0)     # biased, like torch
    inv = lax.rsqrt(var + BN_EPS)
    scale = gamma * inv
    shift = beta - mean * scale
    return jnp.stack([scale, shift], axis=0).astype(jnp.float32)  # (2, Cp)


# ----------------------------------------------------------------------------
# parameters + forward
# ----------------------------------------------------------------------------
def init_params(key, in_chans, n_convs):
    out_chans = 2 * in_chans
    keys = jax.random.split(key, 2 + 2 * n_convs)
    params = {
        'down_w': 0.1 * jax.random.normal(keys[0], (out_chans, in_chans, 2, 2, 2), jnp.float32),
        'down_b': 0.05 * jax.random.normal(keys[1], (out_chans,), jnp.float32),
        'bn1_g': jnp.ones((out_chans,), jnp.float32),
        'bn1_b': jnp.zeros((out_chans,), jnp.float32),
    }
    ops = []
    for i in range(n_convs):
        cw = 0.05 * jax.random.normal(keys[2 + 2 * i], (out_chans, out_chans, 5, 5, 5), jnp.float32)
        cb = 0.05 * jax.random.normal(keys[3 + 2 * i], (out_chans,), jnp.float32)
        ops.append((cw, cb,
                    jnp.ones((out_chans,), jnp.float32),
                    jnp.zeros((out_chans,), jnp.float32)))
    params['ops'] = tuple(ops)
    return params


@jax.jit
def down_transition_forward(x_ncdhw, params):
    N, Cin, D, H, W = x_ncdhw.shape
    Cout = 2 * Cin
    Do, Ho, Wo = D // 2, H // 2, W // 2
    Wq = ((Wo + 4 + 7) // 8) * 8          # canvas width (>= Wo+4, multiple of 8)
    Hp = Ho + 4
    RY = Ho * Wq                           # y-canvas rows per plane
    CROWS = Hp * Wq + LPAD + 8             # conv-input canvas rows per plane
    P = N * Do
    Mvalid = float(N * Do * Ho * Wo)
    # NOTE: channels are zero-padded to a lane-dense multiple of 128; for very
    # narrow layers (demo Cout=8) this wastes MXU/HBM, but deeper V-Net stages
    # (Cout >= 128) are already lane-dense.
    Cp = ((Cout + LANE - 1) // LANE) * LANE

    x = jnp.transpose(x_ncdhw, (0, 2, 3, 4, 1)).astype(jnp.float32)   # NDHWC

    # ---- down conv (k=2, s=2): space-to-depth patches in canvas row order ----
    p = x.reshape(N, Do, 2, Ho, 2, Wo, 2, Cin)
    p = jnp.transpose(p, (0, 1, 3, 5, 2, 4, 6, 7)).reshape(N, Do, Ho, Wo, 8 * Cin)
    p = jnp.pad(p, ((0, 0), (0, 0), (0, 0), (0, Wq - Wo), (0, 0)))
    p = p.reshape(P, RY, 8 * Cin).astype(jnp.bfloat16)

    wd = jnp.transpose(params['down_w'], (2, 3, 4, 1, 0)).reshape(8 * Cin, Cout)
    wd = _pad_last(wd, Cp).astype(jnp.bfloat16)
    bd = _pad_last(params['down_b'], Cp).reshape(1, Cp).astype(jnp.float32)

    yd, su, sq = _down_conv(p, wd, bd, Wo, Wq)
    ss = _bn_scale_shift(su, sq, _pad_last(params['bn1_g'], Cp),
                         _pad_last(params['bn1_b'], Cp), Mvalid)
    # down: (P, RY, Cp) f32 canvas (residual); xin: (P, CROWS, Cp) bf16 halo canvas
    down, xin = _down_bn_elu(yd, ss, CROWS, Ho, Wo, Wq)

    # ---- do1: passthrough (dropout=False) ----
    out = down
    n_convs = len(params['ops'])
    for i, (cw, cb, g, bt) in enumerate(params['ops']):
        # weights -> (kd, kh, kw*cin, cout), channel-padded, bf16, VMEM-resident
        wk = jnp.transpose(cw, (2, 3, 4, 1, 0))                       # (5,5,5,ci,co)
        wk = jnp.pad(wk, ((0, 0),) * 3 + ((0, Cp - Cout), (0, Cp - Cout)))
        wk = wk.reshape(5, 5, 5 * Cp, Cp).astype(jnp.bfloat16)
        bk = _pad_last(cb, Cp).reshape(1, Cp).astype(jnp.float32)

        yk, su, sq = _conv5_bn_stats(xin, wk, bk, N, Do, Ho, Wo, Wq)
        ssk = _bn_scale_shift(su, sq, _pad_last(g, Cp), _pad_last(bt, Cp), Mvalid)

        if i == n_convs - 1:
            out = _last_bn_elu_res(yk, ssk, down)      # fused BN+ELU+add+ELU, f32
        else:
            xin = _mid_bn_elu(yk, ssk, CROWS, Ho, Wo, Wq)   # next conv input, bf16

    if n_convs == 0:
        out = _add_elu(down, down)

    out = out.reshape(N, Do, Ho, Wq, Cp)[:, :, :, :Wo, :Cout]
    return jnp.transpose(out, (0, 4, 1, 2, 3))            # back to NCDHW


# ----------------------------------------------------------------------------
# Pure-JAX reference (mirrors the PyTorch module)
# ----------------------------------------------------------------------------
def _conv3d_ref(x, w, b, stride, pad):
    y = lax.conv_general_dilated(
        x, w, window_strides=(stride,) * 3, padding=[(pad, pad)] * 3,
        dimension_numbers=('NCDHW', 'OIDHW', 'NCDHW'),
        precision=lax.Precision.HIGHEST)
    return y + b[None, :, None, None, None]


def _bn_elu_ref(y, g, b):
    mean = y.mean(axis=(0, 2, 3, 4), keepdims=True)
    var = ((y - mean) ** 2).mean(axis=(0, 2, 3, 4), keepdims=True)
    yn = (y - mean) * lax.rsqrt(var + BN_EPS)
    yn = yn * g[None, :, None, None, None] + b[None, :, None, None, None]
    return jnp.where(yn > 0, yn, jnp.exp(yn) - 1.0)


def reference_forward(x, params):
    down = _bn_elu_ref(_conv3d_ref(x, params['down_w'], params['down_b'], 2, 0),
                       params['bn1_g'], params['bn1_b'])
    out = down
    for (cw, cb, g, bt) in params['ops']:
        out = _bn_elu_ref(_conv3d_ref(out, cw, cb, 1, 2), g, bt)
    s = out + down
    return jnp.where(s > 0, s, jnp.exp(s) - 1.0)


# ----------------------------------------------------------------------------
if __name__ == "__main__":
    key = jax.random.PRNGKey(0)
    k_x, k_p = jax.random.split(key)

    N, Cin, D, H, W = 2, 4, 8, 8, 8   # even spatial dims (stride-2 down-conv)
    n_convs = 2

    x = jax.random.normal(k_x, (N, Cin, D, H, W), jnp.float32)
    params = init_params(k_p, Cin, n_convs)

    out = jax.block_until_ready(down_transition_forward(x, params))
    ref = jax.block_until_ready(reference_forward(x, params))

    assert out.shape == (N, 2 * Cin, D // 2, H // 2, W // 2), out.shape
    assert bool(jnp.all(jnp.isfinite(out)))
    # bf16 MXU operands (f32 accumulation) vs f32-HIGHEST reference -> loose tol
    max_err = float(jnp.max(jnp.abs(out - ref)))
    assert max_err < 5e-2, max_err

    print("KERNEL_OK")
</pallas_src>

<mosaic_0001>
module attributes {stable_mosaic.version = 11 : i64} {
  func.func @_down_conv_kernel(%arg0: i32, %arg1: memref<1x32x32xbf16, #tpu.memory_space<vmem>>, %arg2: memref<32x128xbf16, #tpu.memory_space<vmem>>, %arg3: memref<1x128xf32, #tpu.memory_space<vmem>>, %arg4: memref<1x32x128xf32, #tpu.memory_space<vmem>>, %arg5: memref<1x1x128xf32, #tpu.memory_space<vmem>>, %arg6: memref<1x1x128xf32, #tpu.memory_space<vmem>>) attributes {dimension_semantics = [#tpu.dimension_semantics<parallel>], iteration_bounds = array<i64: 8>, scalar_prefetch = 0 : i64, scratch_operands = 0 : i64, tpu.core_type = #tpu.core_type<tc>, window_params = [{transform_indices = @transform_0, window_bounds = array<i64: 1, 32, 32>}, {pipeline_mode = #tpu.pipeline_mode<synchronous>, transform_indices = @transform_1, window_bounds = array<i64: 32, 128>}, {pipeline_mode = #tpu.pipeline_mode<synchronous>, transform_indices = @transform_2, window_bounds = array<i64: 1, 128>}, {transform_indices = @transform_3, window_bounds = array<i64: 1, 32, 128>}, {transform_indices = @transform_4, window_bounds = array<i64: 1, 1, 128>}, {transform_indices = @transform_5, window_bounds = array<i64: 1, 1, 128>}]} {
    %c0 = arith.constant 0 : index
    %c0_0 = arith.constant 0 : index
    %c0_1 = arith.constant 0 : index
    %0 = vector.load %arg1[%c0, %c0_0, %c0_1] : memref<1x32x32xbf16, #tpu.memory_space<vmem>>, vector<1x32x32xbf16>
    %1 = vector.shape_cast %0 : vector<1x32x32xbf16> to vector<32x32xbf16>
    %c0_2 = arith.constant 0 : index
    %c0_3 = arith.constant 0 : index
    %2 = vector.load %arg2[%c0_2, %c0_3] : memref<32x128xbf16, #tpu.memory_space<vmem>>, vector<32x128xbf16>
    %cst = arith.constant dense<0.000000e+00> : vector<32x128xf32>
    %3 = tpu.matmul %1, %2, %cst {dimension_numbers = #tpu.dot_dimension_numbers<[1], [0], [0], [1], [0, 0, 1, 1], [], []>} : vector<32x32xbf16>, vector<32x128xbf16>, vector<32x128xf32> -> vector<32x128xf32>
    %c0_4 = arith.constant 0 : index
    %c0_5 = arith.constant 0 : index
    %4 = vector.load %arg3[%c0_4, %c0_5] : memref<1x128xf32, #tpu.memory_space<vmem>>, vector<1x128xf32>
    %5 = vector.broadcast %4 : vector<1x128xf32> to vector<32x128xf32>
    %6 = arith.addf %3, %5 : vector<32x128xf32>
    %7 = tpu.iota {dimensions = array<i32: 0>} : vector<32x1xi32>
    %c8_i32 = arith.constant 8 : i32
    %c0_i32 = arith.constant 0 : i32
    %8 = arith.cmpi eq, %c8_i32, %c0_i32 : i32
    %c1_i32 = arith.constant 1 : i32
    %9 = arith.select %8, %c1_i32, %c8_i32 : i32
    %10 = vector.broadcast %9 : i32 to vector<32x1xi32>
    %11 = arith.remsi %7, %10 : vector<32x1xi32>
    %c0_i32_6 = arith.constant 0 : i32
    %12 = vector.broadcast %c0_i32_6 : i32 to vector<32x1xi32>
    %13 = arith.cmpi ne, %11, %12 : vector<32x1xi32>
    %c0_i32_7 = arith.constant 0 : i32
    %14 = vector.broadcast %c0_i32_7 : i32 to vector<32x1xi32>
    %15 = arith.cmpi slt, %11, %14 : vector<32x1xi32>
    %c0_i32_8 = arith.constant 0 : i32
    %16 = arith.cmpi slt, %9, %c0_i32_8 : i32
    %17 = vector.broadcast %16 : i1 to vector<32x1xi1>
    %18 = vector.broadcast %17 : vector<32x1xi1> to vector<32x1xi1>
    %19 = arith.xori %15, %18 : vector<32x1xi1>
    %20 = arith.andi %19, %13 : vector<32x1xi1>
    %21 = vector.broadcast %9 : i32 to vector<32x1xi32>
    %22 = arith.addi %11, %21 : vector<32x1xi32>
    %23 = arith.select %20, %22, %11 : vector<32x1xi1>, vector<32x1xi32>
    %c4_i32 = arith.constant 4 : i32
    %24 = vector.broadcast %c4_i32 : i32 to vector<32x1xi32>
    %25 = arith.cmpi slt, %23, %24 : vector<32x1xi32>
    %cst_9 = arith.constant 0.000000e+00 : f32
    %26 = vector.shape_cast %25 : vector<32x1xi1> to vector<32x1xi1>
    %27 = vector.broadcast %26 : vector<32x1xi1> to vector<32x128xi1>
    %28 = vector.broadcast %cst_9 : f32 to vector<32x128xf32>
    %29 = arith.select %27, %6, %28 : vector<32x128xi1>, vector<32x128xf32>
    %c0_10 = arith.constant 0 : index
    %c0_11 = arith.constant 0 : index
    %c0_12 = arith.constant 0 : index
    %30 = vector.load %arg4[%c0_10, %c0_11, %c0_12] : memref<1x32x128xf32, #tpu.memory_space<vmem>>, vector<1x32x128xf32>
    %31 = vector.shape_cast %30 : vector<1x32x128xf32> to vector<32x128xf32>
    %32 = vector.shape_cast %29 : vector<32x128xf32> to vector<1x32x128xf32>
    tpu.vector_store %arg4[%c0_10, %c0_11, %c0_12], %32 {strides = array<i32>} : memref<1x32x128xf32, #tpu.memory_space<vmem>>, vector<1x32x128xf32>,
    %cst_13 = arith.constant dense<0.000000e+00> : vector<128xf32>
    %33 = vector.multi_reduction <add>, %29, %cst_13 [0] : vector<32x128xf32> to vector<128xf32>
    %34 = vector.shape_cast %33 : vector<128xf32> to vector<1x128xf32>
    %c0_14 = arith.constant 0 : index
    %c0_15 = arith.constant 0 : index
    %c0_16 = arith.constant 0 : index
    %35 = vector.load %arg5[%c0_14, %c0_15, %c0_16] : memref<1x1x128xf32, #tpu.memory_space<vmem>>, vector<1x1x128xf32>
    %36 = vector.shape_cast %35 : vector<1x1x128xf32> to vector<1x128xf32>
    %37 = vector.shape_cast %34 : vector<1x128xf32> to vector<1x1x128xf32>
    tpu.vector_store %arg5[%c0_14, %c0_15, %c0_16], %37 {strides = array<i32>} : memref<1x1x128xf32, #tpu.memory_space<vmem>>, vector<1x1x128xf32>,
    %38 = arith.mulf %29, %29 : vector<32x128xf32>
    %cst_17 = arith.constant dense<0.000000e+00> : vector<128xf32>
    %39 = vector.multi_reduction <add>, %38, %cst_17 [0] : vector<32x128xf32> to vector<128xf32>
    %40 = vector.shape_cast %39 : vector<128xf32> to vector<1x128xf32>
    %c0_18 = arith.constant 0 : index
    %c0_19 = arith.constant 0 : index
    %c0_20 = arith.constant 0 : index
    %41 = vector.load %arg6[%c0_18, %c0_19, %c0_20] : memref<1x1x128xf32, #tpu.memory_space<vmem>>, vector<1x1x128xf32>
    %42 = vector.shape_cast %41 : vector<1x1x128xf32> to vector<1x128xf32>
    %43 = vector.shape_cast %40 : vector<1x128xf32> to vector<1x1x128xf32>
    tpu.vector_store %arg6[%c0_18, %c0_19, %c0_20], %43 {strides = array<i32>} : memref<1x1x128xf32, #tpu.memory_space<vmem>>, vector<1x1x128xf32>,
    return
  }
  func.func @transform_0(%arg0: i32) -> (i32, i32, i32) {
    %c0_i32 = arith.constant 0 : i32
    %c0_i32_0 = arith.constant 0 : i32
    %c0_i32_1 = arith.constant 0 : i32
    return %arg0, %c0_i32, %c0_i32_0 : i32, i32, i32
  }
  func.func @transform_1(%arg0: i32) -> (i32, i32) {
    %c0_i32 = arith.constant 0 : i32
    %c0_i32_0 = arith.constant 0 : i32
    %c0_i32_1 = arith.constant 0 : i32
    return %c0_i32, %c0_i32_0 : i32, i32
  }
  func.func @transform_2(%arg0: i32) -> (i32, i32) {
    %c0_i32 = arith.constant 0 : i32
    %c0_i32_0 = arith.constant 0 : i32
    %c0_i32_1 = arith.constant 0 : i32
    return %c0_i32, %c0_i32_0 : i32, i32
  }
  func.func @transform_3(%arg0: i32) -> (i32, i32, i32) {
    %c0_i32 = arith.constant 0 : i32
    %c0_i32_0 = arith.constant 0 : i32
    %c0_i32_1 = arith.constant 0 : i32
    return %arg0, %c0_i32, %c0_i32_0 : i32, i32, i32
  }
  func.func @transform_4(%arg0: i32) -> (i32, i32, i32) {
    %c0_i32 = arith.constant 0 : i32
    %c0_i32_0 = arith.constant 0 : i32
    %c0_i32_1 = arith.constant 0 : i32
    return %arg0, %c0_i32, %c0_i32_0 : i32, i32, i32
  }
  func.func @transform_5(%arg0: i32) -> (i32, i32, i32) {
    %c0_i32 = arith.constant 0 : i32
    %c0_i32_0 = arith.constant 0 : i32
    %c0_i32_1 = arith.constant 0 : i32
    return %arg0, %c0_i32, %c0_i32_0 : i32, i32, i32
  }
}

module attributes {stable_mosaic.version = 11 : i64} {
  func.func @_down_bn_elu_kernel(%arg0: i32, %arg1: memref<1x32x128xf32, #tpu.memory_space<vmem>>, %arg2: memref<2x128xf32, #tpu.memory_space<vmem>>, %arg3: memref<1x32x128xf32, #tpu.memory_space<vmem>>, %arg4: memref<1x88x128xbf16, #tpu.memory_space<vmem>>) attributes {dimension_semantics = [#tpu.dimension_semantics<parallel>], iteration_bounds = array<i64: 8>, scalar_prefetch = 0 : i64, scratch_operands = 0 : i64, tpu.core_type = #tpu.core_type<tc>, window_params = [{transform_indices = @transform_0, window_bounds = array<i64: 1, 32, 128>}, {pipeline_mode = #tpu.pipeline_mode<synchronous>, transform_indices = @transform_1, window_bounds = array<i64: 2, 128>}, {transform_indices = @transform_2, window_bounds = array<i64: 1, 32, 128>}, {transform_indices = @transform_3, window_bounds = array<i64: 1, 88, 128>}]} {
    %c0 = arith.constant 0 : index
    %c0_0 = arith.constant 0 : index
    %c0_1 = arith.constant 0 : index
    %0 = vector.load %arg1[%c0, %c0_0, %c0_1] : memref<1x32x128xf32, #tpu.memory_space<vmem>>, vector<1x32x128xf32>
    %1 = vector.shape_cast %0 : vector<1x32x128xf32> to vector<32x128xf32>
    %c0_2 = arith.constant 0 : index
    %c0_3 = arith.constant 0 : index
    %2 = vector.load %arg2[%c0_2, %c0_3] : memref<2x128xf32, #tpu.memory_space<vmem>>, vector<1x128xf32>
    %3 = vector.broadcast %2 : vector<1x128xf32> to vector<32x128xf32>
    %4 = arith.mulf %1, %3 : vector<32x128xf32>
    %c1 = arith.constant 1 : index
    %c0_4 = arith.constant 0 : index
    %5 = vector.load %arg2[%c1, %c0_4] : memref<2x128xf32, #tpu.memory_space<vmem>>, vector<1x128xf32>
    %6 = vector.broadcast %5 : vector<1x128xf32> to vector<32x128xf32>
    %7 = arith.addf %4, %6 : vector<32x128xf32>
    %cst = arith.constant 0.000000e+00 : f32
    %8 = vector.broadcast %cst : f32 to vector<32x128xf32>
    %9 = arith.cmpf ogt, %7, %8 : vector<32x128xf32>
    %10 = math.exp %7 : vector<32x128xf32>
    %cst_5 = arith.constant 1.000000e+00 : f32
    %11 = vector.broadcast %cst_5 : f32 to vector<32x128xf32>
    %12 = arith.subf %10, %11 : vector<32x128xf32>
    %13 = arith.select %9, %7, %12 : vector<32x128xi1>, vector<32x128xf32>
    %14 = tpu.iota {dimensions = array<i32: 0>} : vector<32x1xi32>
    %c8_i32 = arith.constant 8 : i32
    %c0_i32 = arith.constant 0 : i32
    %15 = arith.cmpi eq, %c8_i32, %c0_i32 : i32
    %c1_i32 = arith.constant 1 : i32
    %16 = arith.select %15, %c1_i32, %c8_i32 : i32
    %17 = vector.broadcast %16 : i32 to vector<32x1xi32>
    %18 = arith.remsi %14, %17 : vector<32x1xi32>
    %c0_i32_6 = arith.constant 0 : i32
    %19 = vector.broadcast %c0_i32_6 : i32 to vector<32x1xi32>
    %20 = arith.cmpi ne, %18, %19 : vector<32x1xi32>
    %c0_i32_7 = arith.constant 0 : i32
    %21 = vector.broadcast %c0_i32_7 : i32 to vector<32x1xi32>
    %22 = arith.cmpi slt, %18, %21 : vector<32x1xi32>
    %c0_i32_8 = arith.constant 0 : i32
    %23 = arith.cmpi slt, %16, %c0_i32_8 : i32
    %24 = vector.broadcast %23 : i1 to vector<32x1xi1>
    %25 = vector.broadcast %24 : vector<32x1xi1> to vector<32x1xi1>
    %26 = arith.xori %22, %25 : vector<32x1xi1>
    %27 = arith.andi %26, %20 : vector<32x1xi1>
    %28 = vector.broadcast %16 : i32 to vector<32x1xi32>
    %29 = arith.addi %18, %28 : vector<32x1xi32>
    %30 = arith.select %27, %29, %18 : vector<32x1xi1>, vector<32x1xi32>
    %c4_i32 = arith.constant 4 : i32
    %31 = vector.broadcast %c4_i32 : i32 to vector<32x1xi32>
    %32 = arith.cmpi slt, %30, %31 : vector<32x1xi32>
    %cst_9 = arith.constant 0.000000e+00 : f32
    %33 = vector.shape_cast %32 : vector<32x1xi1> to vector<32x1xi1>
    %34 = vector.broadcast %33 : vector<32x1xi1> to vector<32x128xi1>
    %35 = vector.broadcast %cst_9 : f32 to vector<32x128xf32>
    %36 = arith.select %34, %13, %35 : vector<32x128xi1>, vector<32x128xf32>
    %c0_10 = arith.constant 0 : index
    %c0_11 = arith.constant 0 : index
    %c0_12 = arith.constant 0 : index
    %37 = vector.load %arg3[%c0_10, %c0_11, %c0_12] : memref<1x32x128xf32, #tpu.memory_space<vmem>>, vector<1x32x128xf32>
    %38 = vector.shape_cast %37 : vector<1x32x128xf32> to vector<32x128xf32>
    %39 = vector.shape_cast %36 : vector<32x128xf32> to vector<1x32x128xf32>
    tpu.vector_store %arg3[%c0_10, %c0_11, %c0_12], %39 {strides = array<i32>} : memref<1x32x128xf32, #tpu.memory_space<vmem>>, vector<1x32x128xf32>,
    %cst_13 = arith.constant 0.000000e+00 : bf16
    %40 = vector.broadcast %cst_13 : bf16 to vector<88x128xbf16>
    %c0_14 = arith.constant 0 : index
    %c0_15 = arith.constant 0 : index
    %c0_16 = arith.constant 0 : index
    %41 = vector.load %arg4[%c0_14, %c0_15, %c0_16] : memref<1x88x128xbf16, #tpu.memory_space<vmem>>, vector<1x88x128xbf16>
    %42 = vector.shape_cast %41 : vector<1x88x128xbf16> to vector<88x128xbf16>
    %43 = vector.shape_cast %40 : vector<88x128xbf16> to vector<1x88x128xbf16>
    tpu.vector_store %arg4[%c0_14, %c0_15, %c0_16], %43 {strides = array<i32>} : memref<1x88x128xbf16, #tpu.memory_space<vmem>>, vector<1x88x128xbf16>,
    %44 = arith.truncf %36 : vector<32x128xf32> to vector<32x128xbf16>
    %c0_17 = arith.constant 0 : index
    %c32 = arith.constant 32 : index
    %c0_18 = arith.constant 0 : index
    %45 = vector.load %arg4[%c0_17, %c32, %c0_18] : memref<1x88x128xbf16, #tpu.memory_space<vmem>>, vector<1x32x128xbf16>
    %46 = vector.shape_cast %45 : vector<1x32x128xbf16> to vector<32x128xbf16>
    %47 = vector.shape_cast %44 : vector<32x128xbf16> to vector<1x32x128xbf16>
    tpu.vector_store %arg4[%c0_17, %c32, %c0_18], %47 {strides = array<i32>} : memref<1x88x128xbf16, #tpu.memory_space<vmem>>, vector<1x32x128xbf16>,
    return
  }
  func.func @transform_0(%arg0: i32) -> (i32, i32, i32) {
    %c0_i32 = arith.constant 0 : i32
    %c0_i32_0 = arith.constant 0 : i32
    %c0_i32_1 = arith.constant 0 : i32
    return %arg0, %c0_i32, %c0_i32_0 : i32, i32, i32
  }
  func.func @transform_1(%arg0: i32) -> (i32, i32) {
    %c0_i32 = arith.constant 0 : i32
    %c0_i32_0 = arith.constant 0 : i32
    %c0_i32_1 = arith.constant 0 : i32
    return %c0_i32, %c0_i32_0 : i32, i32
  }
  func.func @transform_2(%arg0: i32) -> (i32, i32, i32) {
    %c0_i32 = arith.constant 0 : i32
    %c0_i32_0 = arith.constant 0 : i32
    %c0_i32_1 = arith.constant 0 : i32
    return %arg0, %c0_i32, %c0_i32_0 : i32, i32, i32
  }
  func.func @transform_3(%arg0: i32) -> (i32, i32, i32) {
    %c0_i32 = arith.constant 0 : i32
    %c0_i32_0 = arith.constant 0 : i32
    %c0_i32_1 = arith.constant 0 : i32
    return %arg0, %c0_i32, %c0_i32_0 : i32, i32, i32
  }
}

module attributes {stable_mosaic.version = 11 : i64} {
  func.func @_conv5_kernel(%arg0: i32, %arg1: i32, %arg2: i32, %arg3: memref<1x88x128xbf16, #tpu.memory_space<vmem>>, %arg4: memref<5x5x640x128xbf16, #tpu.memory_space<vmem>>, %arg5: memref<1x128xf32, #tpu.memory_space<vmem>>, %arg6: memref<1x32x128xf32, #tpu.memory_space<vmem>>, %arg7: memref<1x1x128xf32, #tpu.memory_space<vmem>>, %arg8: memref<1x1x128xf32, #tpu.memory_space<vmem>>) attributes {dimension_semantics = [#tpu.dimension_semantics<parallel>, #tpu.dimension_semantics<parallel>, #tpu.dimension_semantics<arbitrary>], iteration_bounds = array<i64: 2, 4, 5>, scalar_prefetch = 0 : i64, scratch_operands = 0 : i64, tpu.core_type = #tpu.core_type<tc>, window_params = [{transform_indices = @transform_0, window_bounds = array<i64: 1, 88, 128>}, {pipeline_mode = #tpu.pipeline_mode<synchronous>, transform_indices = @transform_1, window_bounds = array<i64: 5, 5, 640, 128>}, {pipeline_mode = #tpu.pipeline_mode<synchronous>, transform_indices = @transform_2, window_bounds = array<i64: 1, 128>}, {transform_indices = @transform_3, window_bounds = array<i64: 1, 32, 128>}, {transform_indices = @transform_4, window_bounds = array<i64: 1, 1, 128>}, {transform_indices = @transform_5, window_bounds = array<i64: 1, 1, 128>}]} {
    %c0_i32 = arith.constant 0 : i32
    %0 = arith.cmpi eq, %arg2, %c0_i32 : i32
    %1 = arith.extui %0 : i1 to i32
    %c0_i32_0 = arith.constant 0 : i32
    %2 = arith.cmpi ne, %1, %c0_i32_0 : i32
    scf.if %2 {
      %cst = arith.constant 0.000000e+00 : f32
      %13 = vector.broadcast %cst : f32 to vector<32x128xf32>
      %c0 = arith.constant 0 : index
      %c0_5 = arith.constant 0 : index
      %c0_6 = arith.constant 0 : index
      %14 = vector.load %arg6[%c0, %c0_5, %c0_6] : memref<1x32x128xf32, #tpu.memory_space<vmem>>, vector<1x32x128xf32>
      %15 = vector.shape_cast %14 : vector<1x32x128xf32> to vector<32x128xf32>
      %16 = vector.shape_cast %13 : vector<32x128xf32> to vector<1x32x128xf32>
      tpu.vector_store %arg6[%c0, %c0_5, %c0_6], %16 {strides = array<i32>} : memref<1x32x128xf32, #tpu.memory_space<vmem>>, vector<1x32x128xf32>,
    } else {
    }
    %3 = arith.addi %arg1, %arg2 : i32
    %c2_i32 = arith.constant 2 : i32
    %4 = arith.subi %3, %c2_i32 : i32
    %c0_i32_1 = arith.constant 0 : i32
    %5 = arith.cmpi sge, %4, %c0_i32_1 : i32
    %c4_i32 = arith.constant 4 : i32
    %6 = arith.cmpi slt, %4, %c4_i32 : i32
    %7 = arith.andi %5, %6 : i1
    %8 = arith.extui %7 : i1 to i32
    %c0_i32_2 = arith.constant 0 : i32
    %9 = arith.cmpi ne, %8, %c0_i32_2 : i32
    scf.if %9 {
      %c0 = arith.constant 0 : index
      %c0_5 = arith.constant 0 : index
      %c0_6 = arith.constant 0 : index
      %13 = vector.load %arg3[%c0, %c0_5, %c0_6] : memref<1x88x128xbf16, #tpu.memory_space<vmem>>, vector<1x88x128xbf16>
      %14 = vector.shape_cast %13 : vector<1x88x128xbf16> to vector<88x128xbf16>
      %15 = vector.extract_strided_slice %14 {offsets = [14, 0], sizes = [64, 128], strides = [1, 1]} : vector<88x128xbf16> to vector<64x128xbf16>
      %16 = vector.extract_strided_slice %14 {offsets = [15, 0], sizes = [64, 128], strides = [1, 1]} : vector<88x128xbf16> to vector<64x128xbf16>
      %17 = vector.extract_strided_slice %14 {offsets = [16, 0], sizes = [64, 128], strides = [1, 1]} : vector<88x128xbf16> to vector<64x128xbf16>
      %18 = vector.extract_strided_slice %14 {offsets = [17, 0], sizes = [64, 128], strides = [1, 1]} : vector<88x128xbf16> to vector<64x128xbf16>
      %19 = vector.extract_strided_slice %14 {offsets = [18, 0], sizes = [64, 128], strides = [1, 1]} : vector<88x128xbf16> to vector<64x128xbf16>
      %20 = tpu.concatenate %15, %16, %17, %18, %19 in 1 : vector<64x128xbf16>, vector<64x128xbf16>, vector<64x128xbf16>, vector<64x128xbf16>, vector<64x128xbf16> -> vector<64x640xbf16>
      %21 = vector.extract_strided_slice %20 {offsets = [0, 0], sizes = [32, 640], strides = [1, 1]} : vector<64x640xbf16> to vector<32x640xbf16>
      %22 = arith.index_cast %arg2 : i32 to index
      %c0_7 = arith.constant 0 : index
      %c0_8 = arith.constant 0 : index
      %c0_9 = arith.constant 0 : index
      %23 = vector.load %arg4[%22, %c0_7, %c0_8, %c0_9] : memref<5x5x640x128xbf16, #tpu.memory_space<vmem>>, vector<1x1x640x128xbf16>
      %24 = vector.shape_cast %23 : vector<1x1x640x128xbf16> to vector<640x128xbf16>
      %cst = arith.constant dense<0.000000e+00> : vector<32x128xf32>
      %25 = tpu.matmul %21, %24, %cst {dimension_numbers = #tpu.dot_dimension_numbers<[1], [0], [0], [1], [0, 0, 1, 1], [], []>} : vector<32x640xbf16>, vector<640x128xbf16>, vector<32x128xf32> -> vector<32x128xf32>
      %26 = vector.extract_strided_slice %20 {offsets = [8, 0], sizes = [32, 640], strides = [1, 1]} : vector<64x640xbf16> to vector<32x640xbf16>
      %27 = arith.index_cast %arg2 : i32 to index
      %c1 = arith.constant 1 : index
      %c0_10 = arith.constant 0 : index
      %c0_11 = arith.constant 0 : index
      %28 = vector.load %arg4[%27, %c1, %c0_10, %c0_11] : memref<5x5x640x128xbf16, #tpu.memory_space<vmem>>, vector<1x1x640x128xbf16>
      %29 = vector.shape_cast %28 : vector<1x1x640x128xbf16> to vector<640x128xbf16>
      %cst_12 = arith.constant dense<0.000000e+00> : vector<32x128xf32>
      %30 = tpu.matmul %26, %29, %cst_12 {dimension_numbers = #tpu.dot_dimension_numbers<[1], [0], [0], [1], [0, 0, 1, 1], [], []>} : vector<32x640xbf16>, vector<640x128xbf16>, vector<32x128xf32> -> vector<32x128xf32>
      %31 = arith.addf %25, %30 : vector<32x128xf32>
      %32 = vector.extract_strided_slice %20 {offsets = [16, 0], sizes = [32, 640], strides = [1, 1]} : vector<64x640xbf16> to vector<32x640xbf16>
      %33 = arith.index_cast %arg2 : i32 to index
      %c2 = arith.constant 2 : index
      %c0_13 = arith.constant 0 : index
      %c0_14 = arith.constant 0 : index
      %34 = vector.load %arg4[%33, %c2, %c0_13, %c0_14] : memref<5x5x640x128xbf16, #tpu.memory_space<vmem>>, vector<1x1x640x128xbf16>
      %35 = vector.shape_cast %34 : vector<1x1x640x128xbf16> to vector<640x128xbf16>
      %cst_15 = arith.constant dense<0.000000e+00> : vector<32x128xf32>
      %36 = tpu.matmul %32, %35, %cst_15 {dimension_numbers = #tpu.dot_dimension_numbers<[1], [0], [0], [1], [0, 0, 1, 1], [], []>} : vector<32x640xbf16>, vector<640x128xbf16>, vector<32x128xf32> -> vector<32x128xf32>
      %37 = arith.addf %31, %36 : vector<32x128xf32>
      %38 = vector.extract_strided_slice %20 {offsets = [24, 0], sizes = [32, 640], strides = [1, 1]} : vector<64x640xbf16> to vector<32x640xbf16>
      %39 = arith.index_cast %arg2 : i32 to index
      %c3 = arith.constant 3 : index
      %c0_16 = arith.constant 0 : index
      %c0_17 = arith.constant 0 : index
      %40 = vector.load %arg4[%39, %c3, %c0_16, %c0_17] : memref<5x5x640x128xbf16, #tpu.memory_space<vmem>>, vector<1x1x640x128xbf16>
      %41 = vector.shape_cast %40 : vector<1x1x640x128xbf16> to vector<640x128xbf16>
      %cst_18 = arith.constant dense<0.000000e+00> : vector<32x128xf32>
      %42 = tpu.matmul %38, %41, %cst_18 {dimension_numbers = #tpu.dot_dimension_numbers<[1], [0], [0], [1], [0, 0, 1, 1], [], []>} : vector<32x640xbf16>, vector<640x128xbf16>, vector<32x128xf32> -> vector<32x128xf32>
      %43 = arith.addf %37, %42 : vector<32x128xf32>
      %44 = vector.extract_strided_slice %20 {offsets = [32, 0], sizes = [32, 640], strides = [1, 1]} : vector<64x640xbf16> to vector<32x640xbf16>
      %45 = arith.index_cast %arg2 : i32 to index
      %c4 = arith.constant 4 : index
      %c0_19 = arith.constant 0 : index
      %c0_20 = arith.constant 0 : index
      %46 = vector.load %arg4[%45, %c4, %c0_19, %c0_20] : memref<5x5x640x128xbf16, #tpu.memory_space<vmem>>, vector<1x1x640x128xbf16>
      %47 = vector.shape_cast %46 : vector<1x1x640x128xbf16> to vector<640x128xbf16>
      %cst_21 = arith.constant dense<0.000000e+00> : vector<32x128xf32>
      %48 = tpu.matmul %44, %47, %cst_21 {dimension_numbers = #tpu.dot_dimension_numbers<[1], [0], [0], [1], [0, 0, 1, 1], [], []>} : vector<32x640xbf16>, vector<640x128xbf16>, vector<32x128xf32> -> vector<32x128xf32>
      %49 = arith.addf %43, %48 : vector<32x128xf32>
      %c0_22 = arith.constant 0 : index
      %c0_23 = arith.constant 0 : index
      %c0_24 = arith.constant 0 : index
      %50 = vector.load %arg6[%c0_22, %c0_23, %c0_24] : memref<1x32x128xf32, #tpu.memory_space<vmem>>, vector<1x32x128xf32>
      %51 = vector.shape_cast %50 : vector<1x32x128xf32> to vector<32x128xf32>
      %52 = arith.addf %51, %49 : vector<32x128xf32>
      %c0_25 = arith.constant 0 : index
      %c0_26 = arith.constant 0 : index
      %c0_27 = arith.constant 0 : index
      %53 = vector.load %arg6[%c0_25, %c0_26, %c0_27] : memref<1x32x128xf32, #tpu.memory_space<vmem>>, vector<1x32x128xf32>
      %54 = vector.shape_cast %53 : vector<1x32x128xf32> to vector<32x128xf32>
      %55 = vector.shape_cast %52 : vector<32x128xf32> to vector<1x32x128xf32>
      tpu.vector_store %arg6[%c0_25, %c0_26, %c0_27], %55 {strides = array<i32>} : memref<1x32x128xf32, #tpu.memory_space<vmem>>, vector<1x32x128xf32>,
    } else {
    }
    %c4_i32_3 = arith.constant 4 : i32
    %10 = arith.cmpi eq, %arg2, %c4_i32_3 : i32
    %11 = arith.extui %10 : i1 to i32
    %c0_i32_4 = arith.constant 0 : i32
    %12 = arith.cmpi ne, %11, %c0_i32_4 : i32
    scf.if %12 {
      %13 = tpu.iota {dimensions = array<i32: 0>} : vector<32x1xi32>
      %c8_i32 = arith.constant 8 : i32
      %c0_i32_5 = arith.constant 0 : i32
      %14 = arith.cmpi eq, %c8_i32, %c0_i32_5 : i32
      %c1_i32 = arith.constant 1 : i32
      %15 = arith.select %14, %c1_i32, %c8_i32 : i32
      %16 = vector.broadcast %15 : i32 to vector<32x1xi32>
      %17 = arith.remsi %13, %16 : vector<32x1xi32>
      %c0_i32_6 = arith.constant 0 : i32
      %18 = vector.broadcast %c0_i32_6 : i32 to vector<32x1xi32>
      %19 = arith.cmpi ne, %17, %18 : vector<32x1xi32>
      %c0_i32_7 = arith.constant 0 : i32
      %20 = vector.broadcast %c0_i32_7 : i32 to vector<32x1xi32>
      %21 = arith.cmpi slt, %17, %20 : vector<32x1xi32>
      %c0_i32_8 = arith.constant 0 : i32
      %22 = arith.cmpi slt, %15, %c0_i32_8 : i32
      %23 = vector.broadcast %22 : i1 to vector<32x1xi1>
      %24 = vector.broadcast %23 : vector<32x1xi1> to vector<32x1xi1>
      %25 = arith.xori %21, %24 : vector<32x1xi1>
      %26 = arith.andi %25, %19 : vector<32x1xi1>
      %27 = vector.broadcast %15 : i32 to vector<32x1xi32>
      %28 = arith.addi %17, %27 : vector<32x1xi32>
      %29 = arith.select %26, %28, %17 : vector<32x1xi1>, vector<32x1xi32>
      %c4_i32_9 = arith.constant 4 : i32
      %30 = vector.broadcast %c4_i32_9 : i32 to vector<32x1xi32>
      %31 = arith.cmpi slt, %29, %30 : vector<32x1xi32>
      %c0 = arith.constant 0 : index
      %c0_10 = arith.constant 0 : index
      %c0_11 = arith.constant 0 : index
      %32 = vector.load %arg6[%c0, %c0_10, %c0_11] : memref<1x32x128xf32, #tpu.memory_space<vmem>>, vector<1x32x128xf32>
      %33 = vector.shape_cast %32 : vector<1x32x128xf32> to vector<32x128xf32>
      %c0_12 = arith.constant 0 : index
      %c0_13 = arith.constant 0 : index
      %34 = vector.load %arg5[%c0_12, %c0_13] : memref<1x128xf32, #tpu.memory_space<vmem>>, vector<1x128xf32>
      %35 = vector.broadcast %34 : vector<1x128xf32> to vector<32x128xf32>
      %36 = arith.addf %33, %35 : vector<32x128xf32>
      %cst = arith.constant 0.000000e+00 : f32
      %37 = vector.shape_cast %31 : vector<32x1xi1> to vector<32x1xi1>
      %38 = vector.broadcast %37 : vector<32x1xi1> to vector<32x128xi1>
      %39 = vector.broadcast %cst : f32 to vector<32x128xf32>
      %40 = arith.select %38, %36, %39 : vector<32x128xi1>, vector<32x128xf32>
      %c0_14 = arith.constant 0 : index
      %c0_15 = arith.constant 0 : index
      %c0_16 = arith.constant 0 : index
      %41 = vector.load %arg6[%c0_14, %c0_15, %c0_16] : memref<1x32x128xf32, #tpu.memory_space<vmem>>, vector<1x32x128xf32>
      %42 = vector.shape_cast %41 : vector<1x32x128xf32> to vector<32x128xf32>
      %43 = vector.shape_cast %40 : vector<32x128xf32> to vector<1x32x128xf32>
      tpu.vector_store %arg6[%c0_14, %c0_15, %c0_16], %43 {strides = array<i32>} : memref<1x32x128xf32, #tpu.memory_space<vmem>>, vector<1x32x128xf32>,
      %cst_17 = arith.constant dense<0.000000e+00> : vector<128xf32>
      %44 = vector.multi_reduction <add>, %40, %cst_17 [0] : vector<32x128xf32> to vector<128xf32>
      %45 = vector.shape_cast %44 : vector<128xf32> to vector<1x128xf32>
      %c0_18 = arith.constant 0 : index
      %c0_19 = arith.constant 0 : index
      %c0_20 = arith.constant 0 : index
      %46 = vector.load %arg7[%c0_18, %c0_19, %c0_20] : memref<1x1x128xf32, #tpu.memory_space<vmem>>, vector<1x1x128xf32>
      %47 = vector.shape_cast %46 : vector<1x1x128xf32> to vector<1x128xf32>
      %48 = vector.shape_cast %45 : vector<1x128xf32> to vector<1x1x128xf32>
      tpu.vector_store %arg7[%c0_18, %c0_19, %c0_20], %48 {strides = array<i32>} : memref<1x1x128xf32, #tpu.memory_space<vmem>>, vector<1x1x128xf32>,
      %49 = arith.mulf %40, %40 : vector<32x128xf32>
      %cst_21 = arith.constant dense<0.000000e+00> : vector<128xf32>
      %50 = vector.multi_reduction <add>, %49, %cst_21 [0] : vector<32x128xf32> to vector<128xf32>
      %51 = vector.shape_cast %50 : vector<128xf32> to vector<1x128xf32>
      %c0_22 = arith.constant 0 : index
      %c0_23 = arith.constant 0 : index
      %c0_24 = arith.constant 0 : index
      %52 = vector.load %arg8[%c0_22, %c0_23, %c0_24] : memref<1x1x128xf32, #tpu.memory_space<vmem>>, vector<1x1x128xf32>
      %53 = vector.shape_cast %52 : vector<1x1x128xf32> to vector<1x128xf32>
      %54 = vector.shape_cast %51 : vector<1x128xf32> to vector<1x1x128xf32>
      tpu.vector_store %arg8[%c0_22, %c0_23, %c0_24], %54 {strides = array<i32>} : memref<1x1x128xf32, #tpu.memory_space<vmem>>, vector<1x1x128xf32>,
    } else {
    }
    return
  }
  func.func @transform_0(%arg0: i32, %arg1: i32, %arg2: i32) -> (i32, i32, i32) {
    %0 = arith.addi %arg1, %arg2 : i32
    %c2_i32 = arith.constant 2 : i32
    %1 = arith.subi %0, %c2_i32 : i32
    %c0_i32 = arith.constant 0 : i32
    %c3_i32 = arith.constant 3 : i32
    %2 = arith.maxsi %c0_i32, %1 : i32
    %3 = arith.minsi %c3_i32, %2 : i32
    %c4_i32 = arith.constant 4 : i32
    %4 = arith.muli %arg0, %c4_i32 : i32
    %5 = arith.addi %4, %3 : i32
    %c0_i32_0 = arith.constant 0 : i32
    %c0_i32_1 = arith.constant 0 : i32
    %c0_i32_2 = arith.constant 0 : i32
    return %5, %c0_i32_0, %c0_i32_1 : i32, i32, i32
  }
  func.func @transform_1(%arg0: i32, %arg1: i32, %arg2: i32) -> (i32, i32, i32, i32) {
    %c0_i32 = arith.constant 0 : i32
    %c0_i32_0 = arith.constant 0 : i32
    %c0_i32_1 = arith.constant 0 : i32
    %c0_i32_2 = arith.constant 0 : i32
    %c0_i32_3 = arith.constant 0 : i32
    return %c0_i32, %c0_i32_0, %c0_i32_1, %c0_i32_2 : i32, i32, i32, i32
  }
  func.func @transform_2(%arg0: i32, %arg1: i32, %arg2: i32) -> (i32, i32) {
    %c0_i32 = arith.constant 0 : i32
    %c0_i32_0 = arith.constant 0 : i32
    %c0_i32_1 = arith.constant 0 : i32
    return %c0_i32, %c0_i32_0 : i32, i32
  }
  func.func @transform_3(%arg0: i32, %arg1: i32, %arg2: i32) -> (i32, i32, i32) {
    %c4_i32 = arith.constant 4 : i32
    %0 = arith.muli %arg0, %c4_i32 : i32
    %1 = arith.addi %0, %arg1 : i32
    %c0_i32 = arith.constant 0 : i32
    %c0_i32_0 = arith.constant 0 : i32
    %c0_i32_1 = arith.constant 0 : i32
    return %1, %c0_i32, %c0_i32_0 : i32, i32, i32
  }
  func.func @transform_4(%arg0: i32, %arg1: i32, %arg2: i32) -> (i32, i32, i32) {
    %c4_i32 = arith.constant 4 : i32
    %0 = arith.muli %arg0, %c4_i32 : i32
    %1 = arith.addi %0, %arg1 : i32
    %c0_i32 = arith.constant 0 : i32
    %c0_i32_0 = arith.constant 0 : i32
    %c0_i32_1 = arith.constant 0 : i32
    return %1, %c0_i32, %c0_i32_0 : i32, i32, i32
  }
  func.func @transform_5(%arg0: i32, %arg1: i32, %arg2: i32) -> (i32, i32, i32) {
    %c4_i32 = arith.constant 4 : i32
    %0 = arith.muli %arg0, %c4_i32 : i32
    %1 = arith.addi %0, %arg1 : i32
    %c0_i32 = arith.constant 0 : i32
    %c0_i32_0 = arith.constant 0 : i32
    %c0_i32_1 = arith.constant 0 : i32
    return %1, %c0_i32, %c0_i32_0 : i32, i32, i32
  }
}

module attributes {stable_mosaic.version = 11 : i64} {
  func.func @_mid_bn_elu_kernel(%arg0: i32, %arg1: memref<1x32x128xf32, #tpu.memory_space<vmem>>, %arg2: memref<2x128xf32, #tpu.memory_space<vmem>>, %arg3: memref<1x88x128xbf16, #tpu.memory_space<vmem>>) attributes {dimension_semantics = [#tpu.dimension_semantics<parallel>], iteration_bounds = array<i64: 8>, scalar_prefetch = 0 : i64, scratch_operands = 0 : i64, tpu.core_type = #tpu.core_type<tc>, window_params = [{transform_indices = @transform_0, window_bounds = array<i64: 1, 32, 128>}, {pipeline_mode = #tpu.pipeline_mode<synchronous>, transform_indices = @transform_1, window_bounds = array<i64: 2, 128>}, {transform_indices = @transform_2, window_bounds = array<i64: 1, 88, 128>}]} {
    %c0 = arith.constant 0 : index
    %c0_0 = arith.constant 0 : index
    %c0_1 = arith.constant 0 : index
    %0 = vector.load %arg1[%c0, %c0_0, %c0_1] : memref<1x32x128xf32, #tpu.memory_space<vmem>>, vector<1x32x128xf32>
    %1 = vector.shape_cast %0 : vector<1x32x128xf32> to vector<32x128xf32>
    %c0_2 = arith.constant 0 : index
    %c0_3 = arith.constant 0 : index
    %2 = vector.load %arg2[%c0_2, %c0_3] : memref<2x128xf32, #tpu.memory_space<vmem>>, vector<1x128xf32>
    %3 = vector.broadcast %2 : vector<1x128xf32> to vector<32x128xf32>
    %4 = arith.mulf %1, %3 : vector<32x128xf32>
    %c1 = arith.constant 1 : index
    %c0_4 = arith.constant 0 : index
    %5 = vector.load %arg2[%c1, %c0_4] : memref<2x128xf32, #tpu.memory_space<vmem>>, vector<1x128xf32>
    %6 = vector.broadcast %5 : vector<1x128xf32> to vector<32x128xf32>
    %7 = arith.addf %4, %6 : vector<32x128xf32>
    %cst = arith.constant 0.000000e+00 : f32
    %8 = vector.broadcast %cst : f32 to vector<32x128xf32>
    %9 = arith.cmpf ogt, %7, %8 : vector<32x128xf32>
    %10 = math.exp %7 : vector<32x128xf32>
    %cst_5 = arith.constant 1.000000e+00 : f32
    %11 = vector.broadcast %cst_5 : f32 to vector<32x128xf32>
    %12 = arith.subf %10, %11 : vector<32x128xf32>
    %13 = arith.select %9, %7, %12 : vector<32x128xi1>, vector<32x128xf32>
    %14 = tpu.iota {dimensions = array<i32: 0>} : vector<32x1xi32>
    %c8_i32 = arith.constant 8 : i32
    %c0_i32 = arith.constant 0 : i32
    %15 = arith.cmpi eq, %c8_i32, %c0_i32 : i32
    %c1_i32 = arith.constant 1 : i32
    %16 = arith.select %15, %c1_i32, %c8_i32 : i32
    %17 = vector.broadcast %16 : i32 to vector<32x1xi32>
    %18 = arith.remsi %14, %17 : vector<32x1xi32>
    %c0_i32_6 = arith.constant 0 : i32
    %19 = vector.broadcast %c0_i32_6 : i32 to vector<32x1xi32>
    %20 = arith.cmpi ne, %18, %19 : vector<32x1xi32>
    %c0_i32_7 = arith.constant 0 : i32
    %21 = vector.broadcast %c0_i32_7 : i32 to vector<32x1xi32>
    %22 = arith.cmpi slt, %18, %21 : vector<32x1xi32>
    %c0_i32_8 = arith.constant 0 : i32
    %23 = arith.cmpi slt, %16, %c0_i32_8 : i32
    %24 = vector.broadcast %23 : i1 to vector<32x1xi1>
    %25 = vector.broadcast %24 : vector<32x1xi1> to vector<32x1xi1>
    %26 = arith.xori %22, %25 : vector<32x1xi1>
    %27 = arith.andi %26, %20 : vector<32x1xi1>
    %28 = vector.broadcast %16 : i32 to vector<32x1xi32>
    %29 = arith.addi %18, %28 : vector<32x1xi32>
    %30 = arith.select %27, %29, %18 : vector<32x1xi1>, vector<32x1xi32>
    %c4_i32 = arith.constant 4 : i32
    %31 = vector.broadcast %c4_i32 : i32 to vector<32x1xi32>
    %32 = arith.cmpi slt, %30, %31 : vector<32x1xi32>
    %cst_9 = arith.constant 0.000000e+00 : f32
    %33 = vector.shape_cast %32 : vector<32x1xi1> to vector<32x1xi1>
    %34 = vector.broadcast %33 : vector<32x1xi1> to vector<32x128xi1>
    %35 = vector.broadcast %cst_9 : f32 to vector<32x128xf32>
    %36 = arith.select %34, %13, %35 : vector<32x128xi1>, vector<32x128xf32>
    %cst_10 = arith.constant 0.000000e+00 : bf16
    %37 = vector.broadcast %cst_10 : bf16 to vector<88x128xbf16>
    %c0_11 = arith.constant 0 : index
    %c0_12 = arith.constant 0 : index
    %c0_13 = arith.constant 0 : index
    %38 = vector.load %arg3[%c0_11, %c0_12, %c0_13] : memref<1x88x128xbf16, #tpu.memory_space<vmem>>, vector<1x88x128xbf16>
    %39 = vector.shape_cast %38 : vector<1x88x128xbf16> to vector<88x128xbf16>
    %40 = vector.shape_cast %37 : vector<88x128xbf16> to vector<1x88x128xbf16>
    tpu.vector_store %arg3[%c0_11, %c0_12, %c0_13], %40 {strides = array<i32>} : memref<1x88x128xbf16, #tpu.memory_space<vmem>>, vector<1x88x128xbf16>,
    %41 = arith.truncf %36 : vector<32x128xf32> to vector<32x128xbf16>
    %c0_14 = arith.constant 0 : index
    %c32 = arith.constant 32 : index
    %c0_15 = arith.constant 0 : index
    %42 = vector.load %arg3[%c0_14, %c32, %c0_15] : memref<1x88x128xbf16, #tpu.memory_space<vmem>>, vector<1x32x128xbf16>
    %43 = vector.shape_cast %42 : vector<1x32x128xbf16> to vector<32x128xbf16>
    %44 = vector.shape_cast %41 : vector<32x128xbf16> to vector<1x32x128xbf16>
    tpu.vector_store %arg3[%c0_14, %c32, %c0_15], %44 {strides = array<i32>} : memref<1x88x128xbf16, #tpu.memory_space<vmem>>, vector<1x32x128xbf16>,
    return
  }
  func.func @transform_0(%arg0: i32) -> (i32, i32, i32) {
    %c0_i32 = arith.constant 0 : i32
    %c0_i32_0 = arith.constant 0 : i32
    %c0_i32_1 = arith.constant 0 : i32
    return %arg0, %c0_i32, %c0_i32_0 : i32, i32, i32
  }
  func.func @transform_1(%arg0: i32) -> (i32, i32) {
    %c0_i32 = arith.constant 0 : i32
    %c0_i32_0 = arith.constant 0 : i32
    %c0_i32_1 = arith.constant 0 : i32
    return %c0_i32, %c0_i32_0 : i32, i32
  }
  func.func @transform_2(%arg0: i32) -> (i32, i32, i32) {
    %c0_i32 = arith.constant 0 : i32
    %c0_i32_0 = arith.constant 0 : i32
    %c0_i32_1 = arith.constant 0 : i32
    return %arg0, %c0_i32, %c0_i32_0 : i32, i32, i32
  }
}

module attributes {stable_mosaic.version = 11 : i64} {
  func.func @_last_bn_elu_res_kernel(%arg0: i32, %arg1: memref<1x32x128xf32, #tpu.memory_space<vmem>>, %arg2: memref<2x128xf32, #tpu.memory_space<vmem>>, %arg3: memref<1x32x128xf32, #tpu.memory_space<vmem>>, %arg4: memref<1x32x128xf32, #tpu.memory_space<vmem>>) attributes {dimension_semantics = [#tpu.dimension_semantics<parallel>], iteration_bounds = array<i64: 8>, scalar_prefetch = 0 : i64, scratch_operands = 0 : i64, tpu.core_type = #tpu.core_type<tc>, window_params = [{transform_indices = @transform_0, window_bounds = array<i64: 1, 32, 128>}, {pipeline_mode = #tpu.pipeline_mode<synchronous>, transform_indices = @transform_1, window_bounds = array<i64: 2, 128>}, {transform_indices = @transform_2, window_bounds = array<i64: 1, 32, 128>}, {transform_indices = @transform_3, window_bounds = array<i64: 1, 32, 128>}]} {
    %c0 = arith.constant 0 : index
    %c0_0 = arith.constant 0 : index
    %c0_1 = arith.constant 0 : index
    %0 = vector.load %arg1[%c0, %c0_0, %c0_1] : memref<1x32x128xf32, #tpu.memory_space<vmem>>, vector<1x32x128xf32>
    %1 = vector.shape_cast %0 : vector<1x32x128xf32> to vector<32x128xf32>
    %c0_2 = arith.constant 0 : index
    %c0_3 = arith.constant 0 : index
    %2 = vector.load %arg2[%c0_2, %c0_3] : memref<2x128xf32, #tpu.memory_space<vmem>>, vector<1x128xf32>
    %3 = vector.broadcast %2 : vector<1x128xf32> to vector<32x128xf32>
    %4 = arith.mulf %1, %3 : vector<32x128xf32>
    %c1 = arith.constant 1 : index
    %c0_4 = arith.constant 0 : index
    %5 = vector.load %arg2[%c1, %c0_4] : memref<2x128xf32, #tpu.memory_space<vmem>>, vector<1x128xf32>
    %6 = vector.broadcast %5 : vector<1x128xf32> to vector<32x128xf32>
    %7 = arith.addf %4, %6 : vector<32x128xf32>
    %cst = arith.constant 0.000000e+00 : f32
    %8 = vector.broadcast %cst : f32 to vector<32x128xf32>
    %9 = arith.cmpf ogt, %7, %8 : vector<32x128xf32>
    %10 = math.exp %7 : vector<32x128xf32>
    %cst_5 = arith.constant 1.000000e+00 : f32
    %11 = vector.broadcast %cst_5 : f32 to vector<32x128xf32>
    %12 = arith.subf %10, %11 : vector<32x128xf32>
    %13 = arith.select %9, %7, %12 : vector<32x128xi1>, vector<32x128xf32>
    %c0_6 = arith.constant 0 : index
    %c0_7 = arith.constant 0 : index
    %c0_8 = arith.constant 0 : index
    %14 = vector.load %arg3[%c0_6, %c0_7, %c0_8] : memref<1x32x128xf32, #tpu.memory_space<vmem>>, vector<1x32x128xf32>
    %15 = vector.shape_cast %14 : vector<1x32x128xf32> to vector<32x128xf32>
    %16 = arith.addf %13, %15 : vector<32x128xf32>
    %cst_9 = arith.constant 0.000000e+00 : f32
    %17 = vector.broadcast %cst_9 : f32 to vector<32x128xf32>
    %18 = arith.cmpf ogt, %16, %17 : vector<32x128xf32>
    %19 = math.exp %16 : vector<32x128xf32>
    %cst_10 = arith.constant 1.000000e+00 : f32
    %20 = vector.broadcast %cst_10 : f32 to vector<32x128xf32>
    %21 = arith.subf %19, %20 : vector<32x128xf32>
    %22 = arith.select %18, %16, %21 : vector<32x128xi1>, vector<32x128xf32>
    %c0_11 = arith.constant 0 : index
    %c0_12 = arith.constant 0 : index
    %c0_13 = arith.constant 0 : index
    %23 = vector.load %arg4[%c0_11, %c0_12, %c0_13] : memref<1x32x128xf32, #tpu.memory_space<vmem>>, vector<1x32x128xf32>
    %24 = vector.shape_cast %23 : vector<1x32x128xf32> to vector<32x128xf32>
    %25 = vector.shape_cast %22 : vector<32x128xf32> to vector<1x32x128xf32>
    tpu.vector_store %arg4[%c0_11, %c0_12, %c0_13], %25 {strides = array<i32>} : memref<1x32x128xf32, #tpu.memory_space<vmem>>, vector<1x32x128xf32>,
    return
  }
  func.func @transform_0(%arg0: i32) -> (i32, i32, i32) {
    %c0_i32 = arith.constant 0 : i32
    %c0_i32_0 = arith.constant 0 : i32
    %c0_i32_1 = arith.constant 0 : i32
    return %arg0, %c0_i32, %c0_i32_0 : i32, i32, i32
  }
  func.func @transform_1(%arg0: i32) -> (i32, i32) {
    %c0_i32 = arith.constant 0 : i32
    %c0_i32_0 = arith.constant 0 : i32
    %c0_i32_1 = arith.constant 0 : i32
    return %c0_i32, %c0_i32_0 : i32, i32
  }
  func.func @transform_2(%arg0: i32) -> (i32, i32, i32) {
    %c0_i32 = arith.constant 0 : i32
    %c0_i32_0 = arith.constant 0 : i32
    %c0_i32_1 = arith.constant 0 : i32
    return %arg0, %c0_i32, %c0_i32_0 : i32, i32, i32
  }
  func.func @transform_3(%arg0: i32) -> (i32, i32, i32) {
    %c0_i32 = arith.constant 0 : i32
    %c0_i32_0 = arith.constant 0 : i32
    %c0_i32_1 = arith.constant 0 : i32
    return %arg0, %c0_i32, %c0_i32_0 : i32, i32, i32
  }
}

</mosaic_0001>

<bundles_post_ra>
// kernel: down_transition_forward.6
= control target key start
LH: loop header
LB: loop body
LE: loop exit
PB: predicated region body
PF: predicated region fallthrough
CT: control target
= control target key end

     0   :  { %s620_s18 = smov 0   ;;  %s658_s0 = inlined_call_operand.vmem [shape: bf16[8,32,32], index: 0, kind: input, shape index: {}]   ;;  %s659_s1 = inlined_call_operand.vmem [shape: bf16[32,128], index: 1, kind: input, shape index: {}]   ;;  %s660_s2 = inlined_call_operand.vmem [shape: f32[1,128], index: 2, kind: input, shape index: {}]   ;;  %s661_s3 = inlined_call_operand.vmem [shape: f32[8,32,128], index: 3, kind: output, shape index: {0}]   ;;  %s662_s4 = inlined_call_operand.vmem [shape: f32[8,1,128], index: 4, kind: output, shape index: {1}]   ;;  %s663_s5 = inlined_call_operand.vmem [shape: f32[8,1,128], index: 5, kind: output, shape index: {2}]  }
   0x1 LB: > { %s538_s19 = sadd.s32 4294967295, %s588_s18   ;;  %p542_p0 = scmp.ge.s32.totalorder %s588_s18, 1  ;;  %s588_s18 = sphi %s620_s18, %s16_s18  }
   0x2   : > { %p192_p1 = scmp.lt.s32.totalorder %s588_s18, 9 }
   0x4   : > { %p193_p2 = pnand %p542_p0, %p192_p1 }
   0x5   : > { %v578_v0 = vld [vmem:[%s659_s1] sm:$0xff] (!%p193_p2)   ;;  %p226_p3 = scmp.lt.s32.totalorder (!%p193_p2), %s538_s19, 7  ;;  %v579_v1 = vld [vmem:[%s659_s1 + $0x8] sm:$0xff] (!%p193_p2)   ;;  %vm280_vm0 = vcmask (!%p193_p2), 261120   ;;  %v336_v4 = vlaneseq (!%p193_p2) }
   0x6   : > { %196 = sbr.rel (%p193_p2) target bundleno = 257 (0x101), region = 32  ;;  %562 = vmatprep.subr.bf16.mxu0 (!%p193_p2), %v578_v0  ;;  %v547_v11 = vld [vmem:[%s660_s2] ss:$0 sm:$0xff] (!%p193_p2) }
   0x7   : > { %563 = vmatpush3.bf16.msra.mxu0 (!%p193_p2), %v578_v0  ;;  %v337_v5 = vshrl.u32 (!%p193_p2), %v336_v4, 7 }
   0x8   : > { %564 = vmatprep.subr.bf16.mxu0 (!%p193_p2), %v579_v1 }
   0x9   : > { %v339_v6 = vadd.s32 (!%p193_p2), 16, %v337_v5  ;;  %v340_v7 = vadd.s32 (!%p193_p2), 24, %v337_v5  ;;  %v338_v8 = vadd.s32 (!%p193_p2), 8, %v337_v5  ;;  %v345_v10 = vand.u32 (!%p193_p2), 7, %v337_v5 }
   0xb   : > { %565 = vmatpush3.bf16.msra.mxu0 (!%p193_p2), %v579_v1  ;;  %v359_v9 = vand.u32 (!%p193_p2), 7, %v339_v6  ;;  %v366_v12 = vand.u32 (!%p193_p2), 7, %v340_v7  ;;  %v352_v13 = vand.u32 (!%p193_p2), 7, %v338_v8  ;;  %vm389_vm2 = vcmp.lt.s32.totalorder (!%p193_p2), %v345_v10, 4 }
   0xd   : > { %s665_s19 = smov (!%p226_p3, %s538_s19), 7  ;;  %vm391_vm1 = vcmp.lt.s32.totalorder %v359_v9, 4  ;;  %vm392_vm3 = vcmp.lt.s32.totalorder %v366_v12, 4  ;;  %vm390_vm4 = vcmp.lt.s32.totalorder %v352_v13, 4 }
   0xe   : > { %s556_s24 = sshll.u32 %s665_s19, 4  ;;  %s557_s28 = sshll.u32 %s665_s19, 5 }
   0xf   : > { %s230_s27 = scalar_lea.vmem %s658_s0, %s556_s24  ;;  %s235_s8 = scalar_lea.vmem %s661_s3, %s557_s28 }
  0x10   : > { %v580_v2 = vld [vmem:[%s230_s27] sm:$0xff]   ;;  %v581_v3 = vld [vmem:[%s230_s27 + $0x8] sm:$0xff]   ;;  %s238_s11 = scalar_lea.vmem %s662_s4, %s665_s19  ;;  %s241_s14 = scalar_lea.vmem %s663_s5, %s665_s19 }
  0x11   : > { %566 = vmatprep.mubr.msk.bf16.mxu0 %vm280_vm0, %v580_v2 }
  0x12   : > { %567 = vmatmul.mubr.msk.bf16.vlgmr.msra.gmra.mrb[0].mxu0 %vm280_vm0, %v581_v3 }
  0xe5   : > { %v568_v14 = vpop.f32.mrb[0].mxu0 }
  0xe6   : > { %v330_v15 = vadd.f32 %v568_v14, %v547_v11  ;;  %v321_v16 = vpop.f32.mrb[1].mxu0 }
  0xe7   : > { %v322_v17 = vadd.f32 %v547_v11, %v321_v16  ;;  %v569_v18 = vpop.f32.mrb[2].mxu0 }
  0xe8   : > { %v403_v19 = vsel %vm391_vm1, %v330_v15, 0.0  ;;  %v333_v20 = vadd.f32 %v569_v18, %v547_v11  ;;  %v324_v21 = vpop.f32.mrb[3].mxu0 }
  0xe9   : > { %407 = vst [vmem:[%s235_s8 + $0x10] sm:$0xff] %v403_v19  ;;  %v401_v22 = vsel %vm389_vm2, %v322_v17, 0.0  ;;  %v325_v23 = vadd.f32 %v547_v11, %v324_v21  ;;  %v421_v29 = vmul.f32 %v403_v19, %v403_v19 }
  0xea   : > { %405 = vst [vmem:[%s235_s8] sm:$0xff] %v401_v22  ;;  %v404_v24 = vsel %vm392_vm3, %v333_v20, 0.0  ;;  %v419_v26 = vmul.f32 %v401_v22, %v401_v22 }
  0xeb   : > { %408 = vst [vmem:[%s235_s8 + $0x18] sm:$0xff] %v404_v24  ;;  %v402_v25 = vsel %vm390_vm4, %v325_v23, 0.0  ;;  %v422_v32 = vmul.f32 %v404_v24, %v404_v24 }
  0xec   : > { %406 = vst [vmem:[%s235_s8 + $0x8] sm:$0xff] %v402_v25  ;;  %v409_v27 = vadd.f32 %v402_v25, %v401_v22  ;;  %v420_v28 = vmul.f32 %v402_v25, %v402_v25 }
  0xee   : > { %v410_v30 = vadd.f32 %v409_v27, %v403_v19  ;;  %v423_v31 = vadd.f32 %v420_v28, %v419_v26 }
  0xf0   : > { %v411_v33 = vadd.f32 %v410_v30, %v404_v24  ;;  %v424_v34 = vadd.f32 %v423_v31, %v421_v29 }
  0xf2   : > { %v412_v35 = vrot.slane %v411_v33, 4  ;;  %v425_v36 = vadd.f32 %v424_v34, %v422_v32 }
  0xf4   : > { %v413_v37 = vadd.f32 %v412_v35, %v411_v33  ;;  %v426_v38 = vrot.slane %v425_v36, 4 }
  0xf6   : > { %v414_v39 = vrot.slane %v413_v37, 2  ;;  %v427_v40 = vadd.f32 %v426_v38, %v425_v36 }
  0xf8   : > { %v415_v41 = vadd.f32 %v414_v39, %v413_v37  ;;  %v428_v42 = vrot.slane %v427_v40, 2 }
  0xfa   : > { %v416_v43 = vrot.slane %v415_v41, 1  ;;  %v429_v44 = vadd.f32 %v428_v42, %v427_v40 }
  0xfc   : > { %v417_v45 = vadd.f32 %v416_v43, %v415_v41  ;;  %v430_v46 = vrot.slane %v429_v44, 1 }
  0xfe   : > { %418 = vst [vmem:[%s238_s11] sm:$0x1] %v417_v45  ;;  %v431_v47 = vadd.f32 %v430_v46, %v429_v44 }
 0x100   : > { %432 = vst [vmem:[%s241_s14] sm:$0x1] %v431_v47 }
 0x101 PF: > { %s16_s18 = sadd.s32 1, %s588_s18  }
 0x102   : > { %p13_p4 = scmp.ge.s32.totalorder %s16_s18, 10  }
 0x104   :  { %15 = sbr.rel (!%p13_p4) target bundleno = 1 (0x1), region = 86 }

// kernel: down_transition_forward.7
= control target key start
LH: loop header
LB: loop body
LE: loop exit
PB: predicated region body
PF: predicated region fallthrough
CT: control target
= control target key end

     0   :  { %s506_s12 = smov 0   ;;  %s555_s0 = inlined_call_operand.vmem [shape: f32[8,32,128], index: 0, kind: input, shape index: {}]   ;;  %s556_s1 = inlined_call_operand.vmem [shape: f32[2,128], index: 1, kind: input, shape index: {}]   ;;  %s557_s2 = inlined_call_operand.vmem [shape: f32[8,32,128], index: 2, kind: output, shape index: {0}]   ;;  %s558_s3 = inlined_call_operand.vmem [shape: bf16[8,88,128], index: 3, kind: output, shape index: {1}]  }
   0x1 LB: > { %s419_s13 = sadd.s32 4294967295, %s483_s12   ;;  %p423_p0 = scmp.ge.s32.totalorder %s483_s12, 1  ;;  %s483_s12 = sphi %s506_s12, %s14_s12  }
   0x2   : > { %p140_p1 = scmp.lt.s32.totalorder %s483_s12, 9 }
   0x4   : > { %p141_p2 = pnand %p423_p0, %p140_p1 }
   0x5   : > { %p169_p3 = scmp.lt.s32.totalorder (!%p141_p2), %s419_s13, 7  ;;  %v429_v0 = vld [vmem:[%s556_s1] ss:$0 sm:$0xff] (!%p141_p2)  ;;  %v430_v1 = vld [vmem:[%s556_s1 + $0x1] ss:$0 sm:$0xff] (!%p141_p2)  ;;  %v485_v5 = vmov (!%p141_p2), 0   ;;  %v227_v12 = vlaneseq (!%p141_p2) }
   0x6   : > { %144 = sbr.rel (%p141_p2) target bundleno = 44 (0x2c), region = 28 }
   0x7   : > { %v228_v20 = vshrl.u32 (!%p141_p2), %v227_v12, 7 }
   0x9   : > { %v229_v21 = vadd.s32 (!%p141_p2), 8, %v228_v20  ;;  %v230_v22 = vadd.s32 (!%p141_p2), 16, %v228_v20  ;;  %v231_v23 = vadd.s32 (!%p141_p2), 24, %v228_v20  ;;  %v236_v24 = vand.u32 (!%p141_p2), 7, %v228_v20 }
   0xb   : > { %v243_v25 = vand.u32 (!%p141_p2), 7, %v229_v21  ;;  %v250_v26 = vand.u32 (!%p141_p2), 7, %v230_v22  ;;  %v257_v28 = vand.u32 (!%p141_p2), 7, %v231_v23  ;;  %vm280_vm1 = vcmp.lt.s32.totalorder (!%p141_p2), %v236_v24, 4 }
   0xd   : > { %s560_s13 = smov (!%p169_p3, %s419_s13), 7  ;;  %vm281_vm3 = vcmp.lt.s32.totalorder %v243_v25, 4  ;;  %vm282_vm5 = vcmp.lt.s32.totalorder %v250_v26, 4  ;;  %vm283_vm7 = vcmp.lt.s32.totalorder %v257_v28, 4 }
   0xe   : > { %s459_s14 = smul.u32 44, %s560_s13  ;;  %s441_s15 = sshll.u32 %s560_s13, 5 }
   0xf   : > { %s173_s20 = scalar_lea.vmem %s555_s0, %s441_s15  ;;  %s178_s28 = scalar_lea.vmem %s557_s2, %s441_s15 }
  0x10   : > { %s532_s25 = scalar_lea.vmem %s558_s3, %s459_s14  ;;  %v185_v2 = vld [vmem:[%s173_s20] sm:$0xff]  ;;  %v186_v3 = vld [vmem:[%s173_s20 + $0x8] sm:$0xff]  ;;  %v187_v4 = vld [vmem:[%s173_s20 + $0x10] sm:$0xff] }
  0x11   : > { %304 = vst [vmem:[%s532_s25 + $0x10] sm:$0xf] %v485_v5  ;;  %300 = vst [vmem:[%s532_s25] sm:$0xf] %v485_v5  ;;  %v194_v6 = vmul.f32 %v429_v0, %v185_v2  ;;  %v195_v7 = vmul.f32 %v429_v0, %v186_v3  ;;  %v196_v8 = vmul.f32 %v429_v0, %v187_v4  ;;  %v188_v9 = vld [vmem:[%s173_s20 + $0x18] sm:$0xff] }
  0x12   : > { %301 = vst [vmem:[%s532_s25 + $0x4] sm:$0xf] %v485_v5  ;;  %302 = vst [vmem:[%s532_s25 + $0x8] sm:$0xf] %v485_v5  ;;  %v197_v10 = vmul.f32 %v429_v0, %v188_v9 }
  0x13   : > { %303 = vst [vmem:[%s532_s25 + $0xc] sm:$0xf] %v485_v5  ;;  %305 = vst [vmem:[%s532_s25 + $0x14] sm:$0xf] %v485_v5  ;;  %v203_v11 = vadd.f32 %v430_v1, %v194_v6  ;;  %v204_v13 = vadd.f32 %v430_v1, %v195_v7  ;;  %v205_v14 = vadd.f32 %v430_v1, %v196_v8 }
  0x14   : > { %306 = vst [vmem:[%s532_s25 + $0x18] sm:$0xf] %v485_v5  ;;  %307 = vst [vmem:[%s532_s25 + $0x1c] sm:$0xf] %v485_v5  ;;  %v206_v15 = vadd.f32 %v430_v1, %v197_v10 }
  0x15   : > { %308 = vst [vmem:[%s532_s25 + $0x20] sm:$0xf] %v485_v5  ;;  %309 = vst [vmem:[%s532_s25 + $0x24] sm:$0xf] %v485_v5  ;;  %v211_v16 = vmul.f32 1.442695, %v203_v11 }
  0x16   : > { %310 = vst [vmem:[%s532_s25 + $0x28] sm:$0xf] %v485_v5  ;;  %v213_v17 = vmul.f32 1.442695, %v204_v13  ;;  %v215_v18 = vmul.f32 1.442695, %v205_v14 }
  0x17   : > { %v217_v19 = vmul.f32 1.442695, %v206_v15  ;;  %469 = vpow2.f32 %v211_v16  ;;  %vm207_vm0 = vcmp.gt.f32.partialorder %v203_v11, 0.0  ;;  %vm208_vm2 = vcmp.gt.f32.partialorder %v204_v13, 0.0 }
  0x18   : > { %471 = vpow2.f32 %v213_v17  ;;  %vm209_vm4 = vcmp.gt.f32.partialorder %v205_v14, 0.0  ;;  %vm210_vm6 = vcmp.gt.f32.partialorder %v206_v15, 0.0 }
  0x19   : > { %473 = vpow2.f32 %v215_v18 }
  0x1a   : > { %475 = vpow2.f32 %v217_v19 }
  0x21   : > { %v470_v27 = vpop.eup %469 }
  0x22   : > { %v472_v29 = vpop.eup %471  ;;  %v431_v30 = vadd.f32 -1.0, %v470_v27 }
  0x23   : > { %v474_v31 = vpop.eup %473  ;;  %v432_v32 = vadd.f32 -1.0, %v472_v29 }
  0x24   : > { %v476_v33 = vpop.eup %475  ;;  %v223_v34 = vsel %vm207_vm0, %v203_v11, %v431_v30  ;;  %v433_v35 = vadd.f32 -1.0, %v474_v31 }
  0x25   : > { %v292_v36 = vsel %vm280_vm1, %v223_v34, 0.0  ;;  %v224_v37 = vsel %vm208_vm2, %v204_v13, %v432_v32  ;;  %v434_v38 = vadd.f32 -1.0, %v476_v33 }
  0x26   : > { %296 = vst [vmem:[%s178_s28] sm:$0xff] %v292_v36  ;;  %v293_v39 = vsel %vm281_vm3, %v224_v37, 0.0  ;;  %v225_v40 = vsel %vm209_vm4, %v205_v14, %v433_v35 }
  0x27   : > { %297 = vst [vmem:[%s178_s28 + $0x8] sm:$0xff] %v293_v39  ;;  %v450_v41 = vpack.c.bf16 %v293_v39, %v292_v36  ;;  %v294_v42 = vsel %vm282_vm5, %v225_v40, 0.0  ;;  %v226_v43 = vsel %vm210_vm6, %v206_v15, %v434_v38 }
  0x28   : > { %298 = vst [vmem:[%s178_s28 + $0x10] sm:$0xff] %v294_v42  ;;  %v295_v44 = vsel %vm283_vm7, %v226_v43, 0.0 }
  0x29   : > { %457 = vst [vmem:[%s532_s25 + $0x10] sm:$0xff] %v450_v41   ;;  %299 = vst [vmem:[%s178_s28 + $0x18] sm:$0xff] %v295_v44  ;;  %v455_v45 = vpack.c.bf16 %v295_v44, %v294_v42 }
  0x2b   : > { %458 = vst [vmem:[%s532_s25 + $0x18] sm:$0xff] %v455_v45  }
  0x2c PF: > { %s14_s12 = sadd.s32 1, %s483_s12  }
  0x2d   : > { %p11_p4 = scmp.ge.s32.totalorder %s14_s12, 10  }
  0x2f   :  { %13 = sbr.rel (!%p11_p4) target bundleno = 1 (0x1), region = 70 }

// kernel: down_transition_forward.9
= control target key start
LH: loop header
LB: loop body
LE: loop exit
PB: predicated region body
PF: predicated region fallthrough
CT: control target
= control target key end

     0   :  { %s421_s9 = smov 0   ;;  %s465_s0 = inlined_call_operand.vmem [shape: f32[8,32,128], index: 0, kind: input, shape index: {}]   ;;  %s466_s1 = inlined_call_operand.vmem [shape: f32[2,128], index: 1, kind: input, shape index: {}]   ;;  %s467_s2 = inlined_call_operand.vmem [shape: bf16[8,88,128], index: 2, kind: output, shape index: {}]  }
   0x1 LB: > { %s342_s10 = sadd.s32 4294967295, %s403_s9   ;;  %p346_p0 = scmp.ge.s32.totalorder %s403_s9, 1  ;;  %s403_s9 = sphi %s421_s9, %s12_s9  }
   0x2   : > { %p112_p1 = scmp.lt.s32.totalorder %s403_s9, 9 }
   0x4   : > { %p113_p2 = pnand %p346_p0, %p112_p1 }
   0x5   : > { %p134_p3 = scmp.lt.s32.totalorder (!%p113_p2), %s342_s10, 7  ;;  %v350_v0 = vld [vmem:[%s466_s1] ss:$0 sm:$0xff] (!%p113_p2)  ;;  %v351_v1 = vld [vmem:[%s466_s1 + $0x1] ss:$0 sm:$0xff] (!%p113_p2)  ;;  %v405_v5 = vmov (!%p113_p2), 0   ;;  %v187_v13 = vlaneseq (!%p113_p2) }
   0x6   : > { %116 = sbr.rel (%p113_p2) target bundleno = 44 (0x2c), region = 28 }
   0x7   : > { %v188_v20 = vshrl.u32 (!%p113_p2), %v187_v13, 7 }
   0x9   : > { %v189_v21 = vadd.s32 (!%p113_p2), 8, %v188_v20  ;;  %v190_v22 = vadd.s32 (!%p113_p2), 16, %v188_v20  ;;  %v191_v23 = vadd.s32 (!%p113_p2), 24, %v188_v20  ;;  %v196_v24 = vand.u32 (!%p113_p2), 7, %v188_v20 }
   0xb   : > { %v203_v25 = vand.u32 (!%p113_p2), 7, %v189_v21  ;;  %v210_v26 = vand.u32 (!%p113_p2), 7, %v190_v22  ;;  %v217_v28 = vand.u32 (!%p113_p2), 7, %v191_v23  ;;  %vm454_vm2 = vcmp.lt.s32.totalorder (!%p113_p2), %v196_v24, 4 }
   0xd   : > { %s471_s10 = smov (!%p134_p3, %s342_s10), 7  ;;  %vm241_vm3 = vcmp.lt.s32.totalorder %v203_v25, 4  ;;  %vm242_vm6 = vcmp.lt.s32.totalorder %v210_v26, 4  ;;  %vm243_vm7 = vcmp.lt.s32.totalorder %v217_v28, 4 }
   0xe   : > { %s379_s11 = smul.u32 44, %s471_s10  ;;  %s362_s12 = sshll.u32 %s471_s10, 5 }
   0xf   : > { %s138_s17 = scalar_lea.vmem %s465_s0, %s362_s12 }
  0x10   : > { %s441_s22 = scalar_lea.vmem %s467_s2, %s379_s11  ;;  %v145_v2 = vld [vmem:[%s138_s17] sm:$0xff]  ;;  %v146_v3 = vld [vmem:[%s138_s17 + $0x8] sm:$0xff]  ;;  %v147_v4 = vld [vmem:[%s138_s17 + $0x10] sm:$0xff] }
  0x11   : > { %260 = vst [vmem:[%s441_s22 + $0x10] sm:$0xf] %v405_v5  ;;  %256 = vst [vmem:[%s441_s22] sm:$0xf] %v405_v5  ;;  %v154_v6 = vmul.f32 %v350_v0, %v145_v2  ;;  %v155_v7 = vmul.f32 %v350_v0, %v146_v3  ;;  %v148_v8 = vld [vmem:[%s138_s17 + $0x18] sm:$0xff]  ;;  %v156_v9 = vmul.f32 %v350_v0, %v147_v4 }
  0x12   : > { %257 = vst [vmem:[%s441_s22 + $0x4] sm:$0xf] %v405_v5  ;;  %258 = vst [vmem:[%s441_s22 + $0x8] sm:$0xf] %v405_v5  ;;  %v157_v10 = vmul.f32 %v350_v0, %v148_v8 }
  0x13   : > { %259 = vst [vmem:[%s441_s22 + $0xc] sm:$0xf] %v405_v5  ;;  %261 = vst [vmem:[%s441_s22 + $0x14] sm:$0xf] %v405_v5  ;;  %v163_v11 = vadd.f32 %v351_v1, %v154_v6  ;;  %v164_v12 = vadd.f32 %v351_v1, %v155_v7  ;;  %v165_v14 = vadd.f32 %v351_v1, %v156_v9 }
  0x14   : > { %262 = vst [vmem:[%s441_s22 + $0x18] sm:$0xf] %v405_v5  ;;  %263 = vst [vmem:[%s441_s22 + $0x1c] sm:$0xf] %v405_v5  ;;  %v166_v15 = vadd.f32 %v351_v1, %v157_v10 }
  0x15   : > { %264 = vst [vmem:[%s441_s22 + $0x20] sm:$0xf] %v405_v5  ;;  %265 = vst [vmem:[%s441_s22 + $0x24] sm:$0xf] %v405_v5  ;;  %v171_v16 = vmul.f32 1.442695, %v163_v11 }
  0x16   : > { %266 = vst [vmem:[%s441_s22 + $0x28] sm:$0xf] %v405_v5  ;;  %v173_v17 = vmul.f32 1.442695, %v164_v12  ;;  %v175_v18 = vmul.f32 1.442695, %v165_v14 }
  0x17   : > { %v177_v19 = vmul.f32 1.442695, %v166_v15  ;;  %389 = vpow2.f32 %v171_v16  ;;  %vm167_vm0 = vcmp.gt.f32.partialorder %v163_v11, 0.0  ;;  %vm168_vm1 = vcmp.gt.f32.partialorder %v164_v12, 0.0 }
  0x18   : > { %391 = vpow2.f32 %v173_v17  ;;  %vm169_vm4 = vcmp.gt.f32.partialorder %v165_v14, 0.0  ;;  %vm170_vm5 = vcmp.gt.f32.partialorder %v166_v15, 0.0 }
  0x19   : > { %393 = vpow2.f32 %v175_v18 }
  0x1a   : > { %395 = vpow2.f32 %v177_v19 }
  0x21   : > { %v390_v27 = vpop.eup %389 }
  0x22   : > { %v392_v29 = vpop.eup %391  ;;  %v352_v30 = vadd.f32 -1.0, %v390_v27 }
  0x23   : > { %v394_v32 = vpop.eup %393  ;;  %v353_v33 = vadd.f32 -1.0, %v392_v29 }
  0x24   : > { %v396_v34 = vpop.eup %395  ;;  %v183_v35 = vsel %vm167_vm0, %v163_v11, %v352_v30  ;;  %v354_v36 = vadd.f32 -1.0, %v394_v32 }
  0x25   : > { %v184_v37 = vsel %vm168_vm1, %v164_v12, %v353_v33  ;;  %v252_v38 = vsel %vm454_vm2, %v183_v35, 0.0  ;;  %v355_v39 = vadd.f32 -1.0, %v396_v34 }
  0x26   : > { %v253_v40 = vsel %vm241_vm3, %v184_v37, 0.0  ;;  %v185_v41 = vsel %vm169_vm4, %v165_v14, %v354_v36 }
  0x27   : > { %v370_v42 = vpack.c.bf16 %v253_v40, %v252_v38  ;;  %v186_v43 = vsel %vm170_vm5, %v166_v15, %v355_v39  ;;  %v254_v44 = vsel %vm242_vm6, %v185_v41, 0.0 }
  0x28   : > { %v255_v45 = vsel %vm243_vm7, %v186_v43, 0.0 }
  0x29   : > { %377 = vst [vmem:[%s441_s22 + $0x10] sm:$0xff] %v370_v42   ;;  %v375_v46 = vpack.c.bf16 %v255_v45, %v254_v44 }
  0x2b   : > { %378 = vst [vmem:[%s441_s22 + $0x18] sm:$0xff] %v375_v46  }
  0x2c PF: > { %s12_s9 = sadd.s32 1, %s403_s9  }
  0x2d   : > { %p9_p4 = scmp.ge.s32.totalorder %s12_s9, 10  }
  0x2f   :  { %11 = sbr.rel (!%p9_p4) target bundleno = 1 (0x1), region = 58 }

// kernel: down_transition_forward.11
= control target key start
LH: loop header
LB: loop body
LE: loop exit
PB: predicated region body
PF: predicated region fallthrough
CT: control target
= control target key end

     0   :  { %s410_s12 = smov 0   ;;  %s441_s0 = inlined_call_operand.vmem [shape: f32[8,32,128], index: 0, kind: input, shape index: {}]   ;;  %s442_s1 = inlined_call_operand.vmem [shape: f32[2,128], index: 1, kind: input, shape index: {}]   ;;  %s443_s2 = inlined_call_operand.vmem [shape: f32[8,32,128], index: 2, kind: input, shape index: {}]   ;;  %s444_s3 = inlined_call_operand.vmem [shape: f32[8,32,128], index: 3, kind: output, shape index: {}]  }
   0x1 LB: > { %s332_s13 = sadd.s32 4294967295, %s388_s12   ;;  %p336_p0 = scmp.ge.s32.totalorder %s388_s12, 1  ;;  %s388_s12 = sphi %s410_s12, %s13_s12  }
   0x2   : > { %p147_p1 = scmp.lt.s32.totalorder %s388_s12, 9 }
   0x4   : > { %p148_p2 = pnand %p336_p0, %p147_p1 }
   0x5   : > { %p176_p3 = scmp.lt.s32.totalorder (!%p148_p2), %s332_s13, 7  ;;  %v343_v0 = vld [vmem:[%s442_s1] ss:$0 sm:$0xff] (!%p148_p2)  ;;  %v344_v1 = vld [vmem:[%s442_s1 + $0x1] ss:$0 sm:$0xff] (!%p148_p2) }
   0x6   : > { %151 = sbr.rel (%p148_p2) target bundleno = 59 (0x3b), region = 32 }
   0xd   : > { %s446_s13 = smov (!%p176_p3, %s332_s13), 7 }
   0xe   : > { %s418_s14 = sshll.u32 %s446_s13, 5 }
   0xf   : > { %s180_s19 = scalar_lea.vmem %s441_s0, %s418_s14  ;;  %s185_s24 = scalar_lea.vmem %s443_s2, %s418_s14 }
  0x10   : > { %v191_v2 = vld [vmem:[%s180_s19] sm:$0xff]  ;;  %v192_v3 = vld [vmem:[%s180_s19 + $0x8] sm:$0xff]  ;;  %v193_v4 = vld [vmem:[%s180_s19 + $0x10] sm:$0xff]  ;;  %s190_s27 = scalar_lea.vmem %s444_s3, %s418_s14 }
  0x11   : > { %v194_v5 = vld [vmem:[%s180_s19 + $0x18] sm:$0xff]  ;;  %v200_v6 = vmul.f32 %v343_v0, %v191_v2  ;;  %v201_v7 = vmul.f32 %v343_v0, %v192_v3  ;;  %v202_v8 = vmul.f32 %v343_v0, %v193_v4  ;;  %v233_v21 = vld [vmem:[%s185_s24] sm:$0xff]  ;;  %v234_v24 = vld [vmem:[%s185_s24 + $0x8] sm:$0xff] }
  0x12   : > { %v203_v9 = vmul.f32 %v343_v0, %v194_v5  ;;  %v235_v28 = vld [vmem:[%s185_s24 + $0x10] sm:$0xff]  ;;  %v236_v32 = vld [vmem:[%s185_s24 + $0x18] sm:$0xff] }
  0x13   : > { %v209_v10 = vadd.f32 %v344_v1, %v200_v6  ;;  %v210_v11 = vadd.f32 %v344_v1, %v201_v7  ;;  %v211_v12 = vadd.f32 %v344_v1, %v202_v8 }
  0x14   : > { %v212_v13 = vadd.f32 %v344_v1, %v203_v9 }
  0x15   : > { %v217_v14 = vmul.f32 1.442695, %v209_v10  ;;  %v219_v15 = vmul.f32 1.442695, %v210_v11  ;;  %v221_v16 = vmul.f32 1.442695, %v211_v12 }
  0x16   : > { %v223_v17 = vmul.f32 1.442695, %v212_v13  ;;  %vm213_vm0 = vcmp.gt.f32.partialorder %v209_v10, 0.0  ;;  %vm214_vm1 = vcmp.gt.f32.partialorder %v210_v11, 0.0  ;;  %vm215_vm2 = vcmp.gt.f32.partialorder %v211_v12, 0.0 }
  0x17   : > { %366 = vpow2.f32 %v217_v14  ;;  %vm216_vm3 = vcmp.gt.f32.partialorder %v212_v13, 0.0 }
  0x18   : > { %368 = vpow2.f32 %v219_v15 }
  0x19   : > { %370 = vpow2.f32 %v221_v16 }
  0x1a   : > { %372 = vpow2.f32 %v223_v17 }
  0x21   : > { %v367_v18 = vpop.eup %366 }
  0x22   : > { %v369_v19 = vpop.eup %368  ;;  %v345_v20 = vadd.f32 -1.0, %v367_v18 }
  0x23   : > { %v371_v22 = vpop.eup %370  ;;  %v346_v23 = vadd.f32 -1.0, %v369_v19 }
  0x24   : > { %v373_v25 = vpop.eup %372  ;;  %v229_v26 = vsel %vm213_vm0, %v209_v10, %v345_v20  ;;  %v347_v27 = vadd.f32 -1.0, %v371_v22 }
  0x25   : > { %v237_v29 = vadd.f32 %v233_v21, %v229_v26  ;;  %v230_v30 = vsel %vm214_vm1, %v210_v11, %v346_v23  ;;  %v348_v31 = vadd.f32 -1.0, %v373_v25 }
  0x26   : > { %v238_v33 = vadd.f32 %v234_v24, %v230_v30  ;;  %v231_v34 = vsel %vm215_vm2, %v211_v12, %v347_v27 }
  0x27   : > { %v245_v35 = vmul.f32 1.442695, %v237_v29  ;;  %v239_v36 = vadd.f32 %v235_v28, %v231_v34  ;;  %v232_v37 = vsel %vm216_vm3, %v212_v13, %v348_v31  ;;  %vm241_vm4 = vcmp.gt.f32.partialorder %v237_v29, 0.0 }
  0x28   : > { %v247_v38 = vmul.f32 1.442695, %v238_v33  ;;  %v240_v39 = vadd.f32 %v236_v32, %v232_v37  ;;  %vm242_vm5 = vcmp.gt.f32.partialorder %v238_v33, 0.0 }
  0x29   : > { %374 = vpow2.f32 %v245_v35  ;;  %v249_v40 = vmul.f32 1.442695, %v239_v36  ;;  %vm243_vm6 = vcmp.gt.f32.partialorder %v239_v36, 0.0 }
  0x2a   : > { %376 = vpow2.f32 %v247_v38  ;;  %v251_v41 = vmul.f32 1.442695, %v240_v39  ;;  %vm244_vm7 = vcmp.gt.f32.partialorder %v240_v39, 0.0 }
  0x2b   : > { %378 = vpow2.f32 %v249_v40 }
  0x2c   : > { %380 = vpow2.f32 %v251_v41 }
  0x33   : > { %v375_v42 = vpop.eup %374 }
  0x34   : > { %v377_v43 = vpop.eup %376  ;;  %v349_v44 = vadd.f32 -1.0, %v375_v42 }
  0x35   : > { %v379_v45 = vpop.eup %378  ;;  %v350_v46 = vadd.f32 -1.0, %v377_v43 }
  0x36   : > { %v381_v47 = vpop.eup %380  ;;  %v257_v48 = vsel %vm241_vm4, %v237_v29, %v349_v44  ;;  %v351_v49 = vadd.f32 -1.0, %v379_v45 }
  0x37   : > { %261 = vst [vmem:[%s190_s27] sm:$0xff] %v257_v48  ;;  %v258_v50 = vsel %vm242_vm5, %v238_v33, %v350_v46  ;;  %v352_v51 = vadd.f32 -1.0, %v381_v47 }
  0x38   : > { %262 = vst [vmem:[%s190_s27 + $0x8] sm:$0xff] %v258_v50  ;;  %v259_v52 = vsel %vm243_vm6, %v239_v36, %v351_v49 }
  0x39   : > { %263 = vst [vmem:[%s190_s27 + $0x10] sm:$0xff] %v259_v52  ;;  %v260_v53 = vsel %vm244_vm7, %v240_v39, %v352_v51 }
  0x3a   : > { %264 = vst [vmem:[%s190_s27 + $0x18] sm:$0xff] %v260_v53 }
  0x3b PF: > { %s13_s12 = sadd.s32 1, %s388_s12  }
  0x3c   : > { %p10_p4 = scmp.ge.s32.totalorder %s13_s12, 10  }
  0x3e   :  { %12 = sbr.rel (!%p10_p4) target bundleno = 1 (0x1), region = 65 }

// kernel: down_transition_forward.8
= control target key start
LH: loop header
LB: loop body
LE: loop exit
PB: predicated region body
PF: predicated region fallthrough
CT: control target
= control target key end

     0   :  { %s4681_s18 = smov 0   ;;  %s4683_s19 = smov 0   ;;  %s5364_s0 = inlined_call_operand.vmem [shape: bf16[8,88,128], index: 0, kind: input, shape index: {}]   ;;  %s5365_s1 = inlined_call_operand.vmem [shape: bf16[5,5,640,128], index: 1, kind: input, shape index: {}]   ;;  %s5366_s2 = inlined_call_operand.vmem [shape: f32[1,128], index: 2, kind: input, shape index: {}]   ;;  %s5367_s3 = inlined_call_operand.vmem [shape: f32[8,32,128], index: 3, kind: output, shape index: {0}]   ;;  %s5368_s4 = inlined_call_operand.vmem [shape: f32[8,1,128], index: 4, kind: output, shape index: {1}]   ;;  %s5369_s5 = inlined_call_operand.vmem [shape: f32[8,1,128], index: 5, kind: output, shape index: {2}]  }
   0x1   :  { %s4685_s20 = smov 0   ;;  %s4687_s21 = smov 0  }
   0x2   :  { %s4689_s22 = smov 0   ;;  %s4691_s23 = smov 0  }
   0x3   :  { %s4693_s24 = smov 0  }
   0x4 LB: > { %s28_s25 = sadd.s32 1, %s4636_s21  ;;  %s31_s26 = sadd.s32 1, %s4640_s22  ;;  %s4648_s24 = sphi %s4693_s24, %s16_s24   ;;  %s4644_s23 = sphi %s4691_s23, %s5379_s23   ;;  %s4640_s22 = sphi %s4689_s22, %s5378_s22   ;;  %s4636_s21 = sphi %s4687_s21, %s5377_s21   ;;  %s4632_s20 = sphi %s4685_s20, %s5376_s20   ;;  %s4628_s19 = sphi %s4683_s19, %s5375_s19   ;;  %s4624_s18 = sphi %s4681_s18, %s5374_s18  }
   0x5   : > { %p29_p0 = scmp.ge.s32.totalorder %s28_s25, 5  ;;  %p3293_p1 = scmp.ge.s32.totalorder %s4648_s24, 1 }
   0x6   : > { %p255_p2 = scmp.lt.s32.totalorder %s4648_s24, 41  ;;  %s35_s27 = sadd.s32 1, %s4644_s23 }
   0x7   : > { %s5381_s25 = smov (%p29_p0, %s28_s25), 0  ;;  %s5383_s26 = smov (!%p29_p0, %s31_s26), %s4640_s22 }
   0x8   : > { %p256_p3 = pnand %p3293_p1, %p255_p2  ;;  %p33_p4 = scmp.ge.s32.totalorder %s5383_s26, 4 }
   0x9   : > { %s303_s28 = sadd.s32 (!%p256_p3), %s4624_s18, %s4628_s19  ;;  %s3300_s29 = sshll.u32 (!%p256_p3), %s4632_s20, 2 }
   0xa   : > { %s5385_s26 = smov (%p33_p4, %s5383_s26), 0  ;;  %s5387_s27 = smov (!%p33_p4, %s35_s27), %s4644_s23 }
   0xb   : > { %5370 = sst [smem:[#allocation2_spill]] %s5385_s26  ;;  %p37_p5 = scmp.ge.s32.totalorder %s5387_s27, 2 }
   0xc   : > { %259 = sbr.rel (%p256_p3) target bundleno = 547 (0x223), region = 32  ;;  %s3294_s30 = sadd.s32 (!%p256_p3), 4294967294, %s303_s28 }
   0xd   : > { %s5389_s27 = smov (%p37_p5, %s5387_s27), 0  ;;  %s325_s6 = sadd.s32 (!%p256_p3), %s4628_s19, %s3300_s29 }
   0xe   : > { %5371 = sst [smem:[#allocation3_spill]] %s5389_s27  ;;  %p305_p6 = scmp.gt.s32.totalorder (!%p256_p3), %s3294_s30, 0 }
   0xf   : > { %p3295_p7 = scmp.lt.s32.totalorder (!%p256_p3), %s3294_s30, 3  ;;  %p326_p8 = scmp.lt.s32.totalorder (!%p256_p3), %s325_s6, 7 }
  0x10   : > { %p3307_p10 = scmp.ne.s32.totalorder (!%p256_p3), %s4624_s18, 0 }
  0x13   : > { %s306_s7 = scalar_select %p305_p6, %s3294_s30, 0 }
  0x14   : > { %s5391_s6 = smov (!%p326_p8, %s325_s6), 7  ;;  %v4650_v0 = vmov (!%p3307_p10), 0.0  }
  0x15   : > { %s5393_s7 = smov (!%p3295_p7, %s306_s7), 3  ;;  %s3854_s8 = sshll.u32 %s5391_s6, 5 }
  0x16   : > { %s337_s11 = scalar_lea.vmem %s5368_s4, %s5391_s6  ;;  %s310_s12 = sadd.s32 %s5393_s7, %s3300_s29 }
  0x17   : > { %s4739_s15 = scalar_lea.vmem %s5367_s3, %s3854_s8  ;;  %p311_p9 = scmp.lt.s32.totalorder %s310_s12, 7 }
  0x18   : > { %s344_s19 = scalar_lea.vmem %s5369_s5, %s5391_s6  ;;  %351 = sbr.rel (%p3307_p10) target bundleno = 31 (0x1f), region = 36  ;;  %352 = vst [vmem:[%s4739_s15] sm:$0xff] (!%p3307_p10), %v4650_v0  ;;  %353 = vst [vmem:[%s4739_s15 + $0x8] sm:$0xff] (!%p3307_p10), %v4650_v0 }
  0x19   : > { %s5395_s12 = smov (!%p311_p9, %s310_s12), 7  ;;  %354 = vst [vmem:[%s4739_s15 + $0x10] sm:$0xff] (!%p3307_p10), %v4650_v0  ;;  %355 = vst [vmem:[%s4739_s15 + $0x18] sm:$0xff] (!%p3307_p10), %v4650_v0 }
  0x1a   : > { %s4326_s20 = smul.u32 44, %s5395_s12 }
  0x1c   : > { %s4748_s26 = scalar_lea.vmem %s5364_s0, %s4326_s20 }
  0x1f PF: > { %p358_p11 = scmp.ge.s32.totalorder %s3294_s30, 0  ;;  %p359_p12 = scmp.lt.s32.totalorder %s3294_s30, 4 }
  0x21   : > { %p360_p13 = pnand %p359_p12, %p358_p11 }
  0x22   : > { %s3855_s27 = smul.u32 (!%p360_p13), 1600, %s4624_s18  ;;  %v364_v1 = vld [vmem:[%s4748_s26 + $0x4] sm:$0xf] (!%p360_p13)  ;;  %v365_v2 = vld [vmem:[%s4748_s26 + $0x8] sm:$0xf] (!%p360_p13)  ;;  %vm669_vm1 = vcmask (!%p360_p13), 1040384  }
  0x23   : > { %363 = sbr.rel (%p360_p13) target bundleno = 515 (0x203), region = 40  ;;  %v366_v3 = vld [vmem:[%s4748_s26 + $0xc] sm:$0xf] (!%p360_p13)  ;;  %v367_v4 = vld [vmem:[%s4748_s26 + $0x10] sm:$0xf] (!%p360_p13)  ;;  %v4760_v5 = vcombine.low (!%p360_p13), %v364_v1, %v365_v2  ;;  %vm441_vm2 = vcmask (!%p360_p13), 1042432  }
  0x24   : > { %s4765_s30 = scalar_lea.vmem (!%p360_p13), %s5365_s1, %s3855_s27  ;;  %v368_v6 = vld [vmem:[%s4748_s26 + $0x14] sm:$0xf] (!%p360_p13)  ;;  %v4769_v7 = vld [vmem:[%s4748_s26 + $0x18] sm:$0xf] (!%p360_p13)  ;;  %v4771_v8 = vcombine.low (!%p360_p13), %v366_v3, %v367_v4  ;;  %vm397_vm0 = vsmask.f32 (!%p360_p13), 7424  ;;  %v4783_v18 = vcombine.low (!%p360_p13), %v365_v2, %v366_v3 }
  0x25   : > { %v4384_v9 = vld [vmem:[%s4765_s30 + $0x180] sm:$0xff] (!%p360_p13)   ;;  %v399_v10 = vshrl.u32 (!%p360_p13), %v4760_v5, 16  ;;  %v401_v12 = vshll.u32 (!%p360_p13), %v4760_v5, 16  ;;  %v4779_v14 = vcombine.low (!%p360_p13), %v368_v6, %v4769_v7  ;;  %v4388_v19 = vld [vmem:[%s4765_s30 + $0x188] sm:$0xff] (!%p360_p13)   ;;  %v4392_v30 = vld [vmem:[%s4765_s30 + $0x190] sm:$0xff] (!%p360_p13)   ;;  %v4800_v34 = vcombine.low (!%p360_p13), %v367_v4, %v368_v6 }
  0x26   : > { %v4385_v11 = vld [vmem:[%s4765_s30 + $0x200] sm:$0xff] (!%p360_p13)   ;;  %3856 = vmatprep.subr.bf16.mxu0 (!%p360_p13), %v4384_v9  ;;  %v406_v15 = vshll.u32 (!%p360_p13), %v4771_v8, 16  ;;  %v4389_v21 = vld [vmem:[%s4765_s30 + $0x208] sm:$0xff] (!%p360_p13)   ;;  %v410_v23 = vshrl.u32 (!%p360_p13), %v4771_v8, 16  ;;  %v454_v29 = vshrl.u32 (!%p360_p13), %v4783_v18, 16  ;;  %v4393_v32 = vld [vmem:[%s4765_s30 + $0x210] sm:$0xff] (!%p360_p13)  }
  0x27   : > { %v4386_v13 = vld [vmem:[%s4765_s30 + $0x140] sm:$0xff] (!%p360_p13)   ;;  %3884 = vmatprep.subr.bf16.mxu1 (!%p360_p13), %v4385_v11  ;;  %v403_v17 = vrot.slane (!%p360_p13), %v401_v12, 1  ;;  %v4390_v24 = vld [vmem:[%s4765_s30 + $0x148] sm:$0xff] (!%p360_p13)   ;;  %v414_v25 = vshll.u32 (!%p360_p13), %v4779_v14, 16  ;;  %v4394_v35 = vld [vmem:[%s4765_s30 + $0x150] sm:$0xff] (!%p360_p13)   ;;  %v457_v41 = vshll.u32 (!%p360_p13), %v4783_v18, 16 }
  0x28   : > { %v4387_v16 = vld [vmem:[%s4765_s30 + $0x1c0] sm:$0xff] (!%p360_p13)   ;;  %3857 = vmatpush3.bf16.msra.mxu0 (!%p360_p13), %v4386_v13  ;;  %v408_v20 = vrot.slane (!%p360_p13), %v406_v15, 1  ;;  %v4391_v26 = vld [vmem:[%s4765_s30 + $0x1c8] sm:$0xff] (!%p360_p13)   ;;  %v456_v37 = vrot.slane (!%p360_p13), %v454_v29, 5  ;;  %v4395_v38 = vld [vmem:[%s4765_s30 + $0x1d0] sm:$0xff] (!%p360_p13)   ;;  %v462_v44 = vshrl.u32 (!%p360_p13), %v4800_v34, 16 }
  0x29   : > { %3885 = vmatpush3.bf16.msra.mxu1 (!%p360_p13), %v4387_v16  ;;  %v404_v22 = vor.u32 (!%p360_p13), %v403_v17, %v399_v10  ;;  %3858 = vmatprep.subr.bf16.mxu0 (!%p360_p13), %v4388_v19  ;;  %v4796_v31 = vrot.slane (!%p360_p13), %v414_v25, 1  ;;  %v4396_v40 = vld [vmem:[%s4765_s30 + $0x198] sm:$0xff] (!%p360_p13)   ;;  %v459_v46 = vrot.slane (!%p360_p13), %v457_v41, 6  ;;  %v4400_v48 = vld [vmem:[%s4765_s30 + $0x1a0] sm:$0xff] (!%p360_p13)   ;;  %v465_v49 = vshll.u32 (!%p360_p13), %v4800_v34, 16  ;;  %v4404_v57 = vld [vmem:[%s4765_s30 + $0x1a8] sm:$0xff] (!%p360_p13)  }
  0x2a   : > { %3886 = vmatprep.subr.bf16.mxu1 %v4389_v21  ;;  %v412_v28 = vor.u32 %v410_v23, %v408_v20  ;;  %v4397_v42 = vld [vmem:[%s4765_s30 + $0x218] sm:$0xff]   ;;  %v4401_v50 = vld [vmem:[%s4765_s30 + $0x220] sm:$0xff]   ;;  %v464_v54 = vrot.slane %v462_v44, 5  ;;  %v670_v56 = vrot.slane %v4760_v5, 7  ;;  %v4405_v59 = vld [vmem:[%s4765_s30 + $0x228] sm:$0xff]   ;;  %v4834_v62 = vrot.slane %v4783_v18, 5 }
  0x2b   : > { %v4792_v27 = vsel %vm397_vm0, %v404_v22, %v408_v20  ;;  %v4398_v45 = vld [vmem:[%s4765_s30 + $0x158] sm:$0xff]   ;;  %v4821_v51 = vor.u32 %v459_v46, %v456_v37  ;;  %v4402_v52 = vld [vmem:[%s4765_s30 + $0x160] sm:$0xff]   ;;  %v467_v58 = vrot.slane %v465_v49, 6  ;;  %v4406_v61 = vld [vmem:[%s4765_s30 + $0x168] sm:$0xff]   ;;  %v671_v1 = vrot.slane %v4771_v8, 7 }
  0x2c   : > { %3859 = vmatpush3.bf16.msra.mxu0 %v4390_v24  ;;  %v673_v33 = vrot.slane %v4792_v27, 7  ;;  %v4805_v36 = vsel %vm397_vm0, %v412_v28, %v4796_v31  ;;  %v4399_v47 = vld [vmem:[%s4765_s30 + $0x1d8] sm:$0xff]   ;;  %v4403_v55 = vld [vmem:[%s4765_s30 + $0x1e0] sm:$0xff]   ;;  %v4407_v63 = vld [vmem:[%s4765_s30 + $0x1e8] sm:$0xff]   ;;  %v443_v3 = vrot.slane %v4800_v34, 5  ;;  %v676_v9 = vrot.slane %v4834_v62, 7 }
  0x2d   : > { %3887 = vmatpush3.bf16.msra.mxu1 %v4391_v26  ;;  %3860 = vmatprep.subr.bf16.mxu0 %v4392_v30  ;;  %v674_v39 = vrot.slane %v4805_v36, 7  ;;  %v4825_v53 = vld [vmem:[%s4748_s26 + $0x1c] sm:$0xf]  ;;  %v679_v60 = vrot.slane %v4821_v51, 7  ;;  %v4408_v2 = vld [vmem:[%s4765_s30 + $0x1b0] sm:$0xff]   ;;  %v468_v16 = vor.u32 %v467_v58, %v464_v54  ;;  %v672_v23 = vsel %vm669_vm1, %v670_v56, %v671_v1  ;;  %v4422_v26 = vld [vmem:[%s4765_s30 + $0x240] sm:$0xff]  }
  0x2e   : > { %3888 = vmatprep.subr.bf16.mxu1 %v4393_v32  ;;  %v4839_v0 = vcombine.low %v4769_v7, %v4825_v53  ;;  %v4409_v4 = vld [vmem:[%s4765_s30 + $0x230] sm:$0xff]   ;;  %v4412_v11 = vld [vmem:[%s4765_s30 + $0x1b8] sm:$0xff]   ;;  %v4852_v12 = vsel %vm441_vm2, %v4834_v62, %v443_v3  ;;  %vm452_vm3 = vsmask.f32 2304  ;;  %v4423_v30 = vld [vmem:[%s4765_s30 + $0x40] sm:$0xff]   ;;  %v1097_v49 = vrot.slane %v4805_v36, 3 }
  0x2f   : > { %v675_v43 = vsel %vm669_vm1, %v673_v33, %v674_v39  ;;  %v4410_v6 = vld [vmem:[%s4765_s30 + $0x170] sm:$0xff]   ;;  %v4413_v15 = vld [vmem:[%s4765_s30 + $0x238] sm:$0xff]   ;;  %v677_v22 = vrot.slane %v4852_v12, 7  ;;  %v4866_v25 = vsel %vm452_vm3, %v4821_v51, %v468_v16  ;;  %v4425_v41 = vld [vmem:[%s4765_s30 + $0x248] sm:$0xff]   ;;  %vm1092_vm4 = vcmask 1044480  }
  0x30   : > { %3861 = vmatpush3.bf16.msra.mxu0 %v4394_v35  ;;  %977 = vmatprep.mubr.bf16.mxu0 %v675_v43  ;;  %v4411_v10 = vld [vmem:[%s4765_s30 + $0x1f0] sm:$0xff]   ;;  %v471_v7 = vshrl.u32 %v4839_v0, 16  ;;  %v474_v13 = vshll.u32 %v4839_v0, 16  ;;  %v4414_v19 = vld [vmem:[%s4765_s30 + $0x178] sm:$0xff]   ;;  %v445_v28 = vrot.slane %v4839_v0, 5  ;;  %v680_v29 = vrot.slane %v4866_v25, 7 }
  0x31   : > { %3889 = vmatpush3.bf16.msra.mxu1 %v4395_v38  ;;  %3862 = vmatprep.subr.bf16.mxu0 %v4396_v40  ;;  %v4415_v21 = vld [vmem:[%s4765_s30 + $0x1f8] sm:$0xff]   ;;  %v678_v33 = vsel %vm669_vm1, %v676_v9, %v677_v22  ;;  %v4424_v35 = vld [vmem:[%s4765_s30] sm:$0xff]   ;;  %v4427_v44 = vld [vmem:[%s4765_s30 + $0x8] sm:$0xff]   ;;  %v418_v54 = vshrl.u32 %v4779_v14, 16  ;;  %vm493_vm5 = vcmask 1041408  }
  0x32   : > { %3890 = vmatprep.subr.bf16.mxu1 %v4397_v42  ;;  %v473_v17 = vrot.slane %v471_v7, 5  ;;  %v476_v20 = vrot.slane %v474_v13, 6  ;;  %v4882_v38 = vsel %vm441_vm2, %v443_v3, %v445_v28  ;;  %v681_v40 = vsel %vm669_vm1, %v679_v60, %v680_v29  ;;  %v4426_v42 = vld [vmem:[%s4765_s30 + $0x48] sm:$0xff]   ;;  %v4428_v46 = vld [vmem:[%s4765_s30 + $0x250] sm:$0xff]   ;;  %v4434_v58 = vld [vmem:[%s4765_s30 + $0x260] sm:$0xff]  }
  0x33   : > { %1026 = vmatprep.mubr.bf16.mxu1 %v681_v40  ;;  %v1094_v60 = vrot.slane %v4771_v8, 3  ;;  %v1108_v3 = vrot.slane %v4779_v14, 3  ;;  %v4436_v9 = vld [vmem:[%s4765_s30 + $0x20] sm:$0xff]   ;;  %v4456_v36 = vld [vmem:[%s4765_s30 + $0x2d0] sm:$0xff]  }
  0x34   : > { %3863 = vmatpush3.bf16.msra.mxu0 %v4398_v45  ;;  %v4862_v24 = vor.u32 %v476_v20, %v473_v17  ;;  %v689_v45 = vrot.slane %v4882_v38, 7  ;;  %v4440_v20 = vld [vmem:[%s4765_s30 + $0x28] sm:$0xff]  }
  0x35   : > { %3891 = vmatpush3.bf16.msra.mxu1 %v4399_v47  ;;  %3864 = vmatprep.subr.bf16.mxu0 %v4400_v48  ;;  %v1096_v47 = vrot.slane %v4792_v27, 3  ;;  %v4429_v48 = vld [vmem:[%s4765_s30 + $0x50] sm:$0xff]   ;;  %v4432_v27 = vld [vmem:[%s4765_s30 + $0x58] sm:$0xff]  }
  0x36   : > { %3892 = vmatprep.subr.bf16.mxu1 %v4401_v50  ;;  %v4874_v32 = vsel %vm452_vm3, %v468_v16, %v4862_v24  ;;  %v4431_v50 = vld [vmem:[%s4765_s30 + $0x258] sm:$0xff]  }
  0x37   : > { %v691_v37 = vrot.slane %v4874_v32, 7  ;;  %v1098_v56 = vsel %vm1092_vm4, %v1096_v47, %v1097_v49  ;;  %v4449_v47 = vld [vmem:[%s4765_s30 + $0x80] sm:$0xff]  }
  0x38   : > { %3865 = vmatpush3.bf16.msra.mxu0 %v4402_v52  ;;  %v4430_v52 = vld [vmem:[%s4765_s30 + $0x10] sm:$0xff]  }
  0x39   : > { %3893 = vmatpush3.bf16.msra.mxu1 %v4403_v55  ;;  %3866 = vmatprep.subr.bf16.mxu0 %v4404_v57  ;;  %v4890_v43 = vsel %vm669_vm1, %v680_v29, %v691_v37  ;;  %v4905_v55 = vsel %vm669_vm1, %v677_v22, %v689_v45  ;;  %v1093_v57 = vrot.slane %v4760_v5, 3  ;;  %v4435_v5 = vld [vmem:[%s4765_s30 + $0x60] sm:$0xff]   ;;  %v4442_v22 = vld [vmem:[%s4765_s30 + $0x70] sm:$0xff]  }
  0x3a   : > { %3894 = vmatprep.subr.bf16.mxu1 %v4405_v59  ;;  %v4915_v59 = vrot.slane %v4783_v18, 6  ;;  %v4437_v18 = vld [vmem:[%s4765_s30 + $0x268] sm:$0xff]   ;;  %v4443_v29 = vld [vmem:[%s4765_s30 + $0x30] sm:$0xff]  }
  0x3c   : > { %3867 = vmatpush3.bf16.msra.mxu0 %v4406_v61  ;;  %v4433_v61 = vld [vmem:[%s4765_s30 + $0x18] sm:$0xff]   ;;  %v682_v16 = vrot.slane %v4915_v59, 7 }
  0x3d   : > { %3895 = vmatpush3.bf16.msra.mxu1 %v4407_v63  ;;  %3868 = vmatprep.subr.bf16.mxu0 %v4408_v2  ;;  %v495_v63 = vrot.slane %v4800_v34, 6  ;;  %v4922_v2 = vsel %vm1092_vm4, %v1093_v57, %v1094_v60  ;;  %v4936_v34 = vsel %vm1092_vm4, %v1094_v60, %v1108_v3  ;;  %v4453_v57 = vld [vmem:[%s4765_s30 + $0x88] sm:$0xff]  }
  0x3e   : > { %3896 = vmatprep.subr.bf16.mxu1 %v4409_v4  ;;  %v4927_v4 = vld [vmem:[%s4748_s26 + $0x20] sm:$0xf]  ;;  %v4454_v60 = vld [vmem:[%s4765_s30 + $0x288] sm:$0xff]  }
  0x3f   : > { %v4942_v7 = vsel %vm493_vm5, %v4915_v59, %v495_v63 }
  0x40   : > { %3869 = vmatpush3.bf16.msra.mxu0 %v4410_v6  ;;  %v4931_v6 = vcombine.low %v4825_v53, %v4927_v4  ;;  %v420_v53 = vor.u32 %v418_v54, %v4796_v31  ;;  %v1103_v54 = vrot.slane %v4866_v25, 3  ;;  %v4486_v25 = vld [vmem:[%s4765_s30 + $0x350] sm:$0xff]  }
  0x41   : > { %3897 = vmatpush3.bf16.msra.mxu1 %v4411_v10  ;;  %3870 = vmatprep.subr.bf16.mxu0 %v4412_v11  ;;  %v685_v10 = vrot.slane %v4779_v14, 7  ;;  %v4438_v11 = vld [vmem:[%s4765_s30 + $0x68] sm:$0xff]  }
  0x42   : > { %3898 = vmatprep.subr.bf16.mxu1 %v4413_v15  ;;  %v422_v13 = vshll.u32 %v4931_v6, 16  ;;  %v4441_v15 = vld [vmem:[%s4765_s30 + $0x270] sm:$0xff]  }
  0x44   : > { %3871 = vmatpush3.bf16.msra.mxu0 %v4414_v19  ;;  %v4949_v17 = vrot.slane %v422_v13, 1  ;;  %v683_v19 = vrot.slane %v4942_v7, 7  ;;  %v4465_v13 = vld [vmem:[%s4765_s30 + $0xa0] sm:$0xff]  }
  0x45   : > { %3899 = vmatpush3.bf16.msra.mxu1 %v4415_v21  ;;  %4186 = vmatprep.subr.bf16.mxu0 %v4422_v26  ;;  %v497_v21 = vrot.slane %v4839_v0, 6  ;;  %v4531_v0 = vld [vmem:[%s4765_s30 + $0x440] sm:$0xff]  }
  0x46   : > { %3922 = vmatprep.subr.bf16.mxu1 %v4423_v30  ;;  %v4956_v31 = vsel %vm397_vm0, %v420_v53, %v4949_v17  ;;  %v4464_v53 = vld [vmem:[%s4765_s30 + $0x2e0] sm:$0xff]  }
  0x47   : > { %978 = vmatmul.mubr.bf16.vlgmr.msra.gmra.mrb[0].mxu0 %v672_v23  ;;  %v687_v23 = vrot.slane %v4956_v31, 7  ;;  %v4978_v8 = vsel %vm493_vm5, %v495_v63, %v497_v21  ;;  %v4455_v63 = vld [vmem:[%s4765_s30 + $0xd0] sm:$0xff]  }
  0x48   : > { %4187 = vmatpush3.bf16.msra.mxu0 %v4422_v26  ;;  %1027 = vmatmul.mubr.bf16.vlgmr.msra.gmra.mrb[0].mxu1 %v678_v33  ;;  %v4963_v26 = vsel %vm669_vm1, %v671_v1, %v685_v10  ;;  %v4444_v33 = vld [vmem:[%s4765_s30 + $0x278] sm:$0xff]   ;;  %v693_v40 = vrot.slane %v4978_v8, 7 }
  0x49   : > { %4188 = vmatprep.subr.bf16.mxu0 %v4425_v41  ;;  %3923 = vmatpush3.bf16.msra.mxu1 %v4424_v35  ;;  %v4971_v30 = vsel %vm669_vm1, %v674_v39, %v687_v23  ;;  %v684_v35 = vsel %vm669_vm1, %v682_v16, %v683_v19  ;;  %v4445_v1 = vld [vmem:[%s4765_s30 + $0x78] sm:$0xff]   ;;  %v4467_v16 = vld [vmem:[%s4765_s30 + $0xe8] sm:$0xff]  }
  0x4a   : > { %1034 = vmatprep.mubr.bf16.mxu1 %v4890_v43  ;;  %3924 = vmatprep.subr.bf16.mxu1 %v4426_v42  ;;  %v4446_v39 = vld [vmem:[%s4765_s30 + $0x38] sm:$0xff]   ;;  %v1102_v42 = vrot.slane %v4821_v51, 3  ;;  %v4451_v51 = vld [vmem:[%s4765_s30 + $0xc8] sm:$0xff]  }
  0x4b   : > { %985 = vmatprep.mubr.bf16.mxu0 %v4971_v30 }
  0x4c   : > { %4189 = vmatpush3.bf16.msra.mxu0 %v4425_v41  ;;  %v4447_v41 = vld [vmem:[%s4765_s30 + $0xc0] sm:$0xff]  }
  0x4d   : > { %4190 = vmatprep.subr.bf16.mxu0 %v4428_v46  ;;  %3925 = vmatpush3.bf16.msra.mxu1 %v4427_v44  ;;  %v4448_v44 = vld [vmem:[%s4765_s30 + $0x2c0] sm:$0xff]  }
  0x4e   : > { %3926 = vmatprep.subr.bf16.mxu1 %v4429_v48  ;;  %v2087_v48 = vrot.slane %v4931_v6, 7 }
  0x4f   : > { %986 = vmatmul.mubr.bf16.gmra.mrb[4].mxu0 %v4963_v26 }
  0x50   : > { %4191 = vmatpush3.bf16.msra.mxu0 %v4428_v46  ;;  %1035 = vmatmul.mubr.bf16.gmra.mrb[4].mxu1 %v4905_v55  ;;  %v1110_v46 = vrot.slane %v4956_v31, 3  ;;  %v4540_v31 = vld [vmem:[%s4765_s30 + $0x510] sm:$0xff]  }
  0x51   : > { %4192 = vmatprep.subr.bf16.mxu0 %v4431_v50  ;;  %3927 = vmatpush3.bf16.msra.mxu1 %v4430_v52  ;;  %v4450_v52 = vld [vmem:[%s4765_s30 + $0x280] sm:$0xff]  }
  0x52   : > { %1400 = vmatprep.mubr.bf16.mxu1 %v1098_v56  ;;  %3928 = vmatprep.subr.bf16.mxu1 %v4432_v27  ;;  %v5000_v27 = vsel %vm669_vm1, %v685_v10, %v2087_v48  ;;  %v4452_v56 = vld [vmem:[%s4765_s30 + $0x2c8] sm:$0xff]   ;;  %v4462_v10 = vld [vmem:[%s4765_s30 + $0x298] sm:$0xff]   ;;  %v1100_v48 = vrot.slane %v4852_v12, 3 }
  0x53   : > { %4202 = vmatprep.mubr.bf16.mxu0 %v684_v35  ;;  %v4473_v35 = vld [vmem:[%s4765_s30 + $0xb0] sm:$0xff]  }
  0x54   : > { %4193 = vmatpush3.bf16.msra.mxu0 %v4431_v50  ;;  %v4994_v50 = vsel %vm669_vm1, %v683_v19, %v693_v40  ;;  %v4468_v19 = vld [vmem:[%s4765_s30 + $0x2e8] sm:$0xff]  }
  0x55   : > { %4194 = vmatprep.subr.bf16.mxu0 %v4434_v58  ;;  %3929 = vmatpush3.bf16.msra.mxu1 %v4433_v61  ;;  %v1104_v61 = vsel %vm1092_vm4, %v1102_v42, %v1103_v54  ;;  %v4477_v42 = vld [vmem:[%s4765_s30 + $0xb8] sm:$0xff]  }
  0x56   : > { %3930 = vmatprep.subr.bf16.mxu1 %v4435_v5  ;;  %v4458_v5 = vld [vmem:[%s4765_s30 + $0x290] sm:$0xff]  }
  0x58   : > { %4195 = vmatpush3.bf16.msra.mxu0 %v4434_v58  ;;  %v1111_v58 = vsel %vm1092_vm4, %v1097_v49, %v1110_v46  ;;  %v4457_v49 = vld [vmem:[%s4765_s30 + $0x90] sm:$0xff]  }
  0x59   : > { %4196 = vmatprep.subr.bf16.mxu0 %v4437_v18  ;;  %3931 = vmatpush3.bf16.msra.mxu1 %v4436_v9  ;;  %v4461_v9 = vld [vmem:[%s4765_s30 + $0x98] sm:$0xff]  }
  0x5a   : > { %3932 = vmatprep.subr.bf16.mxu1 %v4438_v11  ;;  %v4463_v11 = vld [vmem:[%s4765_s30 + $0xe0] sm:$0xff]  }
  0x5c   : > { %4197 = vmatpush3.bf16.msra.mxu0 %v4437_v18  ;;  %v4460_v18 = vld [vmem:[%s4765_s30 + $0x2d8] sm:$0xff]  }
  0x5d   : > { %4198 = vmatprep.subr.bf16.mxu0 %v4441_v15  ;;  %3933 = vmatpush3.bf16.msra.mxu1 %v4440_v20  ;;  %v4469_v20 = vld [vmem:[%s4765_s30 + $0xa8] sm:$0xff]  }
  0x5e   : > { %3934 = vmatprep.subr.bf16.mxu1 %v4442_v22  ;;  %v4470_v22 = vld [vmem:[%s4765_s30 + $0x2a8] sm:$0xff]  }
  0x60   : > { %4199 = vmatpush3.bf16.msra.mxu0 %v4441_v15  ;;  %v4466_v15 = vld [vmem:[%s4765_s30 + $0x2a0] sm:$0xff]  }
  0x61   : > { %3935 = vmatpush3.bf16.msra.mxu1 %v4443_v29  ;;  %4200 = vmatprep.subr.bf16.mxu0 %v4444_v33  ;;  %v4471_v29 = vld [vmem:[%s4765_s30 + $0xf0] sm:$0xff]  }
  0x62   : > { %3936 = vmatprep.subr.bf16.mxu1 %v4445_v1  ;;  %v4474_v1 = vld [vmem:[%s4765_s30 + $0x2b0] sm:$0xff]  }
  0x64   : > { %4201 = vmatpush3.bf16.msra.mxu0 %v4444_v33  ;;  %v4472_v33 = vld [vmem:[%s4765_s30 + $0x2f0] sm:$0xff]  }
  0x65   : > { %3937 = vmatpush3.bf16.msra.mxu1 %v4446_v39  ;;  %3950 = vmatprep.subr.bf16.mxu0 %v4447_v41  ;;  %v4475_v39 = vld [vmem:[%s4765_s30 + $0xf8] sm:$0xff]  }
  0x66   : > { %3988 = vmatprep.subr.bf16.mxu1 %v4448_v44  ;;  %v4476_v41 = vld [vmem:[%s4765_s30 + $0x2f8] sm:$0xff]   ;;  %v1099_v44 = vrot.slane %v4834_v62, 3  ;;  %v4482_v62 = vld [vmem:[%s4765_s30 + $0x108] sm:$0xff]  }
  0x67   : > { %4203 = vmatmul.mubr.bf16.vlgmr.msra.gmra.mrb[8].mxu0 %v4994_v50 }
  0x68   : > { %1401 = vmatmul.mubr.bf16.vlgmr.msra.gmra.mrb[8].mxu1 %v4922_v2  ;;  %3951 = vmatpush3.bf16.msra.mxu0 %v4449_v47  ;;  %v4459_v2 = vld [vmem:[%s4765_s30 + $0xd8] sm:$0xff]  }
  0x69   : > { %3989 = vmatpush3.bf16.msra.mxu1 %v4450_v52  ;;  %3952 = vmatprep.subr.bf16.mxu0 %v4451_v51  ;;  %v4478_v47 = vld [vmem:[%s4765_s30 + $0x2b8] sm:$0xff]   ;;  %v4479_v52 = vld [vmem:[%s4765_s30 + $0x100] sm:$0xff]  }
  0x6a   : > { %3990 = vmatprep.subr.bf16.mxu1 %v4452_v56  ;;  %1408 = vmatprep.mubr.bf16.mxu1 %v1111_v58  ;;  %v4480_v51 = vld [vmem:[%s4765_s30 + $0x340] sm:$0xff]   ;;  %v1114_v56 = vrot.slane %v4874_v32, 3 }
  0x6b   : > { %1449 = vmatprep.mubr.bf16.mxu0 %v1104_v61  ;;  %v1112_v61 = vrot.slane %v4882_v38, 3  ;;  %v4572_v38 = vld [vmem:[%s4765_s30 + $0x598] sm:$0xff]  }
  0x6c   : > { %3953 = vmatpush3.bf16.msra.mxu0 %v4453_v57  ;;  %v1101_v57 = vsel %vm1092_vm4, %v1099_v44, %v1100_v48  ;;  %v1115_v12 = vsel %vm1092_vm4, %v1103_v54, %v1114_v56  ;;  %v426_v54 = vshrl.u32 %v4931_v6, 16 }
  0x6d   : > { %3991 = vmatpush3.bf16.msra.mxu1 %v4454_v60  ;;  %3954 = vmatprep.subr.bf16.mxu0 %v4455_v63  ;;  %v4483_v60 = vld [vmem:[%s4765_s30 + $0x348] sm:$0xff]  }
  0x6e   : > { %3992 = vmatprep.subr.bf16.mxu1 %v4456_v36  ;;  %v4484_v63 = vld [vmem:[%s4765_s30 + $0x308] sm:$0xff]   ;;  %v1105_v36 = vrot.slane %v4915_v59, 3  ;;  %v372_v59 = vld [vmem:[%s4748_s26 + $0x24] sm:$0xf] }
  0x70   : > { %1409 = vmatmul.mubr.bf16.gmra.mrb[12].mxu1 %v4936_v34  ;;  %3955 = vmatpush3.bf16.msra.mxu0 %v4457_v49  ;;  %v4485_v49 = vld [vmem:[%s4765_s30 + $0x110] sm:$0xff]  }
  0x71   : > { %3993 = vmatpush3.bf16.msra.mxu1 %v4458_v5  ;;  %3956 = vmatprep.subr.bf16.mxu0 %v4459_v2  ;;  %v1106_v5 = vrot.slane %v4942_v7, 3  ;;  %v4487_v2 = vld [vmem:[%s4765_s30 + $0x310] sm:$0xff]  }
  0x72   : > { %3994 = vmatprep.subr.bf16.mxu1 %v4460_v18  ;;  %1885 = vmatprep.mubr.bf16.mxu1 %v1111_v58  ;;  %v4481_v58 = vld [vmem:[%s4765_s30 + $0x300] sm:$0xff]   ;;  %v4488_v18 = vld [vmem:[%s4765_s30 + $0x118] sm:$0xff]  }
  0x74   : > { %3957 = vmatpush3.bf16.msra.mxu0 %v4461_v9  ;;  %v5070_v9 = vcombine.low %v372_v59, %v372_v59 }
  0x75   : > { %3995 = vmatpush3.bf16.msra.mxu1 %v4462_v10  ;;  %3958 = vmatprep.subr.bf16.mxu0 %v4463_v11  ;;  %v1107_v10 = vsel %vm1092_vm4, %v1105_v36, %v1106_v5  ;;  %v4489_v11 = vld [vmem:[%s4765_s30 + $0x358] sm:$0xff]   ;;  %v4505_v36 = vld [vmem:[%s4765_s30 + $0x380] sm:$0xff]  }
  0x76   : > { %3996 = vmatprep.subr.bf16.mxu1 %v4464_v53  ;;  %v428_v53 = vor.u32 %v426_v54, %v4949_v17  ;;  %v4493_v17 = vld [vmem:[%s4765_s30 + $0x320] sm:$0xff]  }
  0x78   : > { %3959 = vmatpush3.bf16.msra.mxu0 %v4465_v13  ;;  %v430_v13 = vshll.u32 %v5070_v9, 16 }
  0x79   : > { %3997 = vmatpush3.bf16.msra.mxu1 %v4466_v15  ;;  %3960 = vmatprep.subr.bf16.mxu0 %v4467_v16  ;;  %v5080_v15 = vcombine.low %v4927_v4, %v372_v59  ;;  %v4490_v16 = vld [vmem:[%s4765_s30 + $0x318] sm:$0xff]   ;;  %v4506_v59 = vld [vmem:[%s4765_s30 + $0x400] sm:$0xff]  }
  0x7a   : > { %3998 = vmatprep.subr.bf16.mxu1 %v4468_v19  ;;  %v1598_v19 = vrot.slane %v4931_v6, 3  ;;  %v5273_v6 = vld [vmem:[%s4748_s26 + $0x28] ss:$0 sps:$4 sm:$0xff]  }
  0x7b   : > { %v480_v4 = vshrl.u32 %v5080_v15, 16 }
  0x7c   : > { %3961 = vmatpush3.bf16.msra.mxu0 %v4469_v20  ;;  %v4491_v20 = vld [vmem:[%s4765_s30 + $0x120] sm:$0xff]  }
  0x7d   : > { %3999 = vmatpush3.bf16.msra.mxu1 %v4470_v22  ;;  %3962 = vmatprep.subr.bf16.mxu0 %v4471_v29  ;;  %v432_v22 = vrot.slane %v430_v13, 1  ;;  %v4492_v29 = vld [vmem:[%s4765_s30 + $0x360] sm:$0xff]   ;;  %v4508_v13 = vld [vmem:[%s4765_s30 + $0x388] sm:$0xff]  }
  0x7e   : > { %4000 = vmatprep.subr.bf16.mxu1 %v4472_v33 }
  0x7f   : > { %v5088_v33 = vsel %vm397_vm0, %v428_v53, %v432_v22  ;;  %v4507_v53 = vld [vmem:[%s4765_s30 + $0x3c0] sm:$0xff]  }
  0x80   : > { %3963 = vmatpush3.bf16.msra.mxu0 %v4473_v35  ;;  %v1600_v35 = vrot.slane %v5088_v33, 3 }
  0x81   : > { %4001 = vmatpush3.bf16.msra.mxu1 %v4474_v1  ;;  %3964 = vmatprep.subr.bf16.mxu0 %v4475_v39  ;;  %v483_v1 = vshll.u32 %v5080_v15, 16  ;;  %v4494_v39 = vld [vmem:[%s4765_s30 + $0x128] sm:$0xff]  }
  0x82   : > { %4002 = vmatprep.subr.bf16.mxu1 %v4476_v41  ;;  %v5099_v41 = vsel %vm1092_vm4, %v1108_v3, %v1598_v19  ;;  %v5105_v44 = vsel %vm1092_vm4, %v1110_v46, %v1600_v35  ;;  %v4499_v3 = vld [vmem:[%s4765_s30 + $0x130] sm:$0xff]   ;;  %v447_v46 = vrot.slane %v5080_v15, 5 }
  0x83   : > { %v485_v14 = vrot.slane %v483_v1, 6  ;;  %v4517_v1 = vld [vmem:[%s4765_s30 + $0x3a0] sm:$0xff]  }
  0x84   : > { %3965 = vmatpush3.bf16.msra.mxu0 %v4477_v42  ;;  %v4495_v42 = vld [vmem:[%s4765_s30 + $0x368] sm:$0xff]  }
  0x85   : > { %4003 = vmatpush3.bf16.msra.mxu1 %v4478_v47  ;;  %4206 = vmatprep.subr.bf16.mxu0 %v4479_v52  ;;  %v4496_v47 = vld [vmem:[%s4765_s30 + $0x328] sm:$0xff]  }
  0x86   : > { %4016 = vmatprep.subr.bf16.mxu1 %v4480_v51  ;;  %v4501_v51 = vld [vmem:[%s4765_s30 + $0x330] sm:$0xff]  }
  0x87   : > { %1450 = vmatmul.mubr.bf16.vlgmr.msra.gmra.mrb[12].mxu0 %v1101_v57 }
  0x88   : > { %4207 = vmatpush3.bf16.msra.mxu0 %v4479_v52  ;;  %1886 = vmatmul.mubr.bf16.vlgmr.msra.gmra.mrb[16].mxu1 %v4936_v34  ;;  %v5065_v34 = vsel %vm1092_vm4, %v1100_v48, %v1112_v61  ;;  %v482_v48 = vrot.slane %v480_v4, 5  ;;  %v4500_v52 = vld [vmem:[%s4765_s30 + $0x370] sm:$0xff]   ;;  %v4515_v4 = vld [vmem:[%s4765_s30 + $0x418] sm:$0xff]  }
  0x89   : > { %4017 = vmatpush3.bf16.msra.mxu1 %v4481_v58  ;;  %4208 = vmatprep.subr.bf16.mxu0 %v4482_v62  ;;  %v4502_v58 = vld [vmem:[%s4765_s30 + $0x138] sm:$0xff]  }
  0x8a   : > { %4018 = vmatprep.subr.bf16.mxu1 %v4483_v60  ;;  %1457 = vmatprep.mubr.bf16.mxu0 %v1115_v12  ;;  %v5114_v57 = vor.u32 %v485_v14, %v482_v48  ;;  %v5121_v60 = vsel %vm441_vm2, %v445_v28, %v447_v46  ;;  %v4522_v48 = vld [vmem:[%s4765_s30 + $0x3e8] sm:$0xff]   ;;  %v4523_v14 = vld [vmem:[%s4765_s30 + $0x3b0] sm:$0xff]  }
  0x8b   : > { %1893 = vmatprep.mubr.bf16.mxu1 %v5105_v44  ;;  %v1602_v54 = vrot.slane %v5121_v60, 3 }
  0x8c   : > { %4209 = vmatpush3.bf16.msra.mxu0 %v4482_v62  ;;  %v4503_v62 = vld [vmem:[%s4765_s30 + $0x378] sm:$0xff]  }
  0x8d   : > { %4019 = vmatpush3.bf16.msra.mxu1 %v4484_v63  ;;  %4210 = vmatprep.subr.bf16.mxu0 %v4485_v49  ;;  %v4504_v63 = vld [vmem:[%s4765_s30 + $0x338] sm:$0xff]  }
  0x8e   : > { %4020 = vmatprep.subr.bf16.mxu1 %v4486_v25  ;;  %v5130_v25 = vsel %vm452_vm3, %v4862_v24, %v5114_v57 }
  0x8f   : > { %1458 = vmatmul.mubr.bf16.gmra.mrb[16].mxu0 %v5065_v34 }
  0x90   : > { %4211 = vmatpush3.bf16.msra.mxu0 %v4485_v49  ;;  %4222 = vmatprep.mubr.bf16.mxu0 %v1107_v10  ;;  %v1116_v49 = vrot.slane %v4978_v8, 3  ;;  %v4589_v8 = vld [vmem:[%s4765_s30 + $0x618] sm:$0xff]  }
  0x91   : > { %4021 = vmatpush3.bf16.msra.mxu1 %v4487_v2  ;;  %4212 = vmatprep.subr.bf16.mxu0 %v4488_v18  ;;  %v2580_v2 = vrot.slane %v447_v46, 3  ;;  %v4526_v46 = vld [vmem:[%s4765_s30 + $0x3b8] sm:$0xff]  }
  0x92   : > { %4022 = vmatprep.subr.bf16.mxu1 %v4489_v11  ;;  %1894 = vmatmul.mubr.bf16.gmra.mrb[20].mxu1 %v5099_v41  ;;  %v1117_v24 = vsel %vm1092_vm4, %v1106_v5, %v1116_v49  ;;  %v4510_v5 = vld [vmem:[%s4765_s30 + $0x3c8] sm:$0xff]  }
  0x93   : > { %1934 = vmatprep.mubr.bf16.mxu1 %v1115_v12  ;;  %v434_v12 = vshrl.u32 %v5070_v9, 16  ;;  %v5136_v11 = vsel %vm1092_vm4, %v1602_v54, %v2580_v2  ;;  %v4533_v2 = vld [vmem:[%s4765_s30 + $0x488] sm:$0xff]  }
  0x94   : > { %4213 = vmatpush3.bf16.msra.mxu0 %v4488_v18  ;;  %v1604_v18 = vrot.slane %v5130_v25, 3 }
  0x95   : > { %4023 = vmatpush3.bf16.msra.mxu1 %v4490_v16  ;;  %4214 = vmatprep.subr.bf16.mxu0 %v4491_v20  ;;  %v436_v28 = vor.u32 %v434_v12, %v432_v22  ;;  %v4511_v22 = vld [vmem:[%s4765_s30 + $0x390] sm:$0xff]   ;;  %v4529_v12 = vld [vmem:[%s4765_s30 + $0x480] sm:$0xff]  }
  0x96   : > { %4024 = vmatprep.subr.bf16.mxu1 %v4492_v29  ;;  %v5154_v7 = vsel %vm1092_vm4, %v1114_v56, %v1604_v18  ;;  %v4512_v29 = vld [vmem:[%s4765_s30 + $0x410] sm:$0xff]  }
  0x97   : > { %v2578_v10 = vrot.slane %v436_v28, 3  ;;  %v4513_v56 = vld [vmem:[%s4765_s30 + $0x3d0] sm:$0xff]   ;;  %v4532_v28 = vld [vmem:[%s4765_s30 + $0x500] sm:$0xff]  }
  0x98   : > { %4215 = vmatpush3.bf16.msra.mxu0 %v4491_v20  ;;  %v4509_v20 = vld [vmem:[%s4765_s30 + $0x408] sm:$0xff]  }
  0x99   : > { %4025 = vmatpush3.bf16.msra.mxu1 %v4493_v17  ;;  %4216 = vmatprep.subr.bf16.mxu0 %v4494_v39  ;;  %v5146_v16 = vsel %vm1092_vm4, %v1600_v35, %v2578_v10  ;;  %v4514_v17 = vld [vmem:[%s4765_s30 + $0x398] sm:$0xff]  }
  0x9a   : > { %4026 = vmatprep.subr.bf16.mxu1 %v4495_v42  ;;  %v4516_v35 = vld [vmem:[%s4765_s30 + $0x3d8] sm:$0xff]   ;;  %v4520_v42 = vld [vmem:[%s4765_s30 + $0x3a8] sm:$0xff]  }
  0x9c   : > { %4217 = vmatpush3.bf16.msra.mxu0 %v4494_v39  ;;  %v4518_v39 = vld [vmem:[%s4765_s30 + $0x420] sm:$0xff]  }
  0x9d   : > { %4027 = vmatpush3.bf16.msra.mxu1 %v4496_v47  ;;  %4218 = vmatprep.subr.bf16.mxu0 %v4499_v3  ;;  %v4521_v47 = vld [vmem:[%s4765_s30 + $0x428] sm:$0xff]  }
  0x9e   : > { %4028 = vmatprep.subr.bf16.mxu1 %v4500_v52  ;;  %v4525_v52 = vld [vmem:[%s4765_s30 + $0x3f0] sm:$0xff]  }
  0xa0   : > { %4219 = vmatpush3.bf16.msra.mxu0 %v4499_v3  ;;  %v499_v3 = vrot.slane %v5080_v15, 6 }
  0xa1   : > { %4029 = vmatpush3.bf16.msra.mxu1 %v4501_v51  ;;  %4220 = vmatprep.subr.bf16.mxu0 %v4502_v58 }
  0xa2   : > { %4030 = vmatprep.subr.bf16.mxu1 %v4503_v62  ;;  %v5188_v51 = vsel %vm493_vm5, %v497_v21, %v499_v3  ;;  %v4528_v62 = vld [vmem:[%s4765_s30 + $0x3f8] sm:$0xff]  }
  0xa4   : > { %4221 = vmatpush3.bf16.msra.mxu0 %v4502_v58  ;;  %v4527_v58 = vld [vmem:[%s4765_s30 + $0x438] sm:$0xff]  }
  0xa5   : > { %4031 = vmatpush3.bf16.msra.mxu1 %v4504_v63  ;;  %4226 = vmatprep.subr.bf16.mxu0 %v4505_v36  ;;  %v1606_v63 = vrot.slane %v5188_v51, 3 }
  0xa6   : > { %4054 = vmatprep.subr.bf16.mxu1 %v4506_v59  ;;  %v4534_v59 = vld [vmem:[%s4765_s30 + $0x548] sm:$0xff]  }
  0xa7   : > { %4223 = vmatmul.mubr.bf16.vlgmr.msra.gmra.mrb[8].mxu0 %v1117_v24  ;;  %v5202_v21 = vsel %vm1092_vm4, %v1116_v49, %v1606_v63  ;;  %v4536_v49 = vld [vmem:[%s4765_s30 + $0x508] sm:$0xff]  }
  0xa8   : > { %1935 = vmatmul.mubr.bf16.vlgmr.msra.gmra.mrb[24].mxu1 %v5065_v34  ;;  %4227 = vmatpush3.bf16.msra.mxu0 %v4505_v36  ;;  %v5165_v34 = vsel %vm1092_vm4, %v1112_v61, %v1602_v54  ;;  %v4519_v61 = vld [vmem:[%s4765_s30 + $0x3e0] sm:$0xff]   ;;  %v2089_v54 = vrot.slane %v5088_v33, 7  ;;  %v4535_v33 = vld [vmem:[%s4765_s30 + $0x448] sm:$0xff]  }
  0xa9   : > { %4055 = vmatpush3.bf16.msra.mxu1 %v4507_v53  ;;  %4228 = vmatprep.subr.bf16.mxu0 %v4508_v13  ;;  %v4530_v36 = vld [vmem:[%s4765_s30 + $0x540] sm:$0xff]   ;;  %v4538_v53 = vld [vmem:[%s4765_s30 + $0x550] sm:$0xff]  }
  0xaa   : > { %4056 = vmatprep.subr.bf16.mxu1 %v4509_v20  ;;  %1942 = vmatprep.mubr.bf16.mxu1 %v5154_v7  ;;  %v2090_v10 = vsel %vm669_vm1, %v687_v23, %v2089_v54  ;;  %v4541_v23 = vld [vmem:[%s4765_s30 + $0x498] sm:$0xff]   ;;  %v2091_v54 = vrot.slane %v5121_v60, 7 }
  0xab   : > { %4242 = vmatprep.mubr.bf16.mxu0 %v1117_v24  ;;  %v4537_v24 = vld [vmem:[%s4765_s30 + $0x490] sm:$0xff]   ;;  %v4543_v20 = vld [vmem:[%s4765_s30 + $0x458] sm:$0xff]  }
  0xac   : > { %4229 = vmatpush3.bf16.msra.mxu0 %v4508_v13  ;;  %v4539_v13 = vld [vmem:[%s4765_s30 + $0x450] sm:$0xff]   ;;  %v2092_v32 = vsel %vm669_vm1, %v689_v45, %v2091_v54  ;;  %v4571_v60 = vld [vmem:[%s4765_s30 + $0x5d8] sm:$0xff]   ;;  %v4573_v45 = vld [vmem:[%s4765_s30 + $0x4e0] sm:$0xff]  }
  0xad   : > { %4057 = vmatpush3.bf16.msra.mxu1 %v4510_v5  ;;  %4230 = vmatprep.subr.bf16.mxu0 %v4511_v22  ;;  %v4544_v5 = vld [vmem:[%s4765_s30 + $0x518] sm:$0xff]  }
  0xae   : > { %4058 = vmatprep.subr.bf16.mxu1 %v4512_v29  ;;  %v4547_v29 = vld [vmem:[%s4765_s30 + $0x460] sm:$0xff]  }
  0xb0   : > { %1943 = vmatmul.mubr.bf16.gmra.mrb[28].mxu1 %v5165_v34  ;;  %4231 = vmatpush3.bf16.msra.mxu0 %v4511_v22  ;;  %v4546_v22 = vld [vmem:[%s4765_s30 + $0x560] sm:$0xff]  }
  0xb1   : > { %4059 = vmatpush3.bf16.msra.mxu1 %v4513_v56  ;;  %4232 = vmatprep.subr.bf16.mxu0 %v4514_v17  ;;  %v4548_v56 = vld [vmem:[%s4765_s30 + $0x520] sm:$0xff]  }
  0xb2   : > { %4060 = vmatprep.subr.bf16.mxu1 %v4515_v4  ;;  %2374 = vmatprep.mubr.bf16.mxu1 %v4971_v30  ;;  %v4524_v30 = vld [vmem:[%s4765_s30 + $0x430] sm:$0xff]   ;;  %v4551_v4 = vld [vmem:[%s4765_s30 + $0x468] sm:$0xff]  }
  0xb4   : > { %4233 = vmatpush3.bf16.msra.mxu0 %v4514_v17  ;;  %v4549_v17 = vld [vmem:[%s4765_s30 + $0x4a8] sm:$0xff]  }
  0xb5   : > { %4061 = vmatpush3.bf16.msra.mxu1 %v4516_v35  ;;  %4234 = vmatprep.subr.bf16.mxu0 %v4517_v1  ;;  %v4552_v35 = vld [vmem:[%s4765_s30 + $0x528] sm:$0xff]  }
  0xb6   : > { %4062 = vmatprep.subr.bf16.mxu1 %v4518_v39  ;;  %v4555_v39 = vld [vmem:[%s4765_s30 + $0x470] sm:$0xff]  }
  0xb8   : > { %4235 = vmatpush3.bf16.msra.mxu0 %v4517_v1  ;;  %v4554_v1 = vld [vmem:[%s4765_s30 + $0x570] sm:$0xff]  }
  0xb9   : > { %4063 = vmatpush3.bf16.msra.mxu1 %v4519_v61  ;;  %4236 = vmatprep.subr.bf16.mxu0 %v4520_v42  ;;  %v4556_v61 = vld [vmem:[%s4765_s30 + $0x530] sm:$0xff]  }
  0xba   : > { %4064 = vmatprep.subr.bf16.mxu1 %v4521_v47  ;;  %v4558_v47 = vld [vmem:[%s4765_s30 + $0x578] sm:$0xff]  }
  0xbc   : > { %4237 = vmatpush3.bf16.msra.mxu0 %v4520_v42  ;;  %v4557_v42 = vld [vmem:[%s4765_s30 + $0x4b8] sm:$0xff]  }
  0xbd   : > { %4065 = vmatpush3.bf16.msra.mxu1 %v4522_v48  ;;  %4238 = vmatprep.subr.bf16.mxu0 %v4523_v14  ;;  %v4559_v48 = vld [vmem:[%s4765_s30 + $0x478] sm:$0xff]  }
  0xbe   : > { %4066 = vmatprep.subr.bf16.mxu1 %v4524_v30  ;;  %v4561_v30 = vld [vmem:[%s4765_s30 + $0x4c0] sm:$0xff]  }
  0xc0   : > { %4239 = vmatpush3.bf16.msra.mxu0 %v4523_v14  ;;  %v4560_v14 = vld [vmem:[%s4765_s30 + $0x538] sm:$0xff]  }
  0xc1   : > { %4067 = vmatpush3.bf16.msra.mxu1 %v4525_v52  ;;  %4240 = vmatprep.subr.bf16.mxu0 %v4526_v46  ;;  %v4562_v52 = vld [vmem:[%s4765_s30 + $0x5c0] sm:$0xff]  }
  0xc2   : > { %4068 = vmatprep.subr.bf16.mxu1 %v4527_v58  ;;  %v4563_v58 = vld [vmem:[%s4765_s30 + $0x580] sm:$0xff]  }
  0xc4   : > { %4241 = vmatpush3.bf16.msra.mxu0 %v4526_v46  ;;  %v2093_v46 = vrot.slane %v5130_v25, 7  ;;  %v4591_v25 = vld [vmem:[%s4765_s30 + $0x628] sm:$0xff]  }
  0xc5   : > { %4069 = vmatpush3.bf16.msra.mxu1 %v4528_v62  ;;  %4082 = vmatprep.subr.bf16.mxu0 %v4529_v12  ;;  %v4564_v62 = vld [vmem:[%s4765_s30 + $0x4c8] sm:$0xff]  }
  0xc6   : > { %4120 = vmatprep.subr.bf16.mxu1 %v4530_v36  ;;  %v4565_v12 = vld [vmem:[%s4765_s30 + $0x5c8] sm:$0xff]   ;;  %v2094_v36 = vsel %vm669_vm1, %v691_v37, %v2093_v46  ;;  %v4569_v37 = vld [vmem:[%s4765_s30 + $0x590] sm:$0xff]  }
  0xc7   : > { %4243 = vmatmul.mubr.bf16.vlgmr.msra.gmra.mrb[8].mxu0 %v5202_v21 }
  0xc8   : > { %2375 = vmatmul.mubr.bf16.vlgmr.msra.gmra.mrb[32].mxu1 %v4963_v26  ;;  %4083 = vmatpush3.bf16.msra.mxu0 %v4531_v0  ;;  %v4542_v26 = vld [vmem:[%s4765_s30 + $0x558] sm:$0xff]   ;;  %v4566_v0 = vld [vmem:[%s4765_s30 + $0x588] sm:$0xff]  }
  0xc9   : > { %4121 = vmatpush3.bf16.msra.mxu1 %v4532_v28  ;;  %4084 = vmatprep.subr.bf16.mxu0 %v4533_v2  ;;  %v4567_v28 = vld [vmem:[%s4765_s30 + $0x4d0] sm:$0xff]   ;;  %v2576_v2 = vrot.slane %v5070_v9, 3 }
  0xca   : > { %4122 = vmatprep.subr.bf16.mxu1 %v4534_v59  ;;  %2382 = vmatprep.mubr.bf16.mxu1 %v2090_v10  ;;  %v4576_v59 = vld [vmem:[%s4765_s30 + $0x4e8] sm:$0xff]   ;;  %v489_v10 = vshll.u32 %v5273_v6, 16 }
  0xcb   : > { %2423 = vmatprep.mubr.bf16.mxu0 %v4890_v43  ;;  %v4545_v43 = vld [vmem:[%s4765_s30 + $0x4a0] sm:$0xff]   ;;  %v2577_v9 = vsel %vm1092_vm4, %v1598_v19, %v2576_v2 }
  0xcc   : > { %4085 = vmatpush3.bf16.msra.mxu0 %v4535_v33  ;;  %v4575_v19 = vld [vmem:[%s4765_s30 + $0x5a0] sm:$0xff]   ;;  %v4577_v33 = vld [vmem:[%s4765_s30 + $0x5e8] sm:$0xff]  }
  0xcd   : > { %4123 = vmatpush3.bf16.msra.mxu1 %v4536_v49  ;;  %4086 = vmatprep.subr.bf16.mxu0 %v4537_v24  ;;  %v4580_v49 = vld [vmem:[%s4765_s30 + $0x5f0] sm:$0xff]   ;;  %v491_v24 = vrot.slane %v489_v10, 6 }
  0xce   : > { %4124 = vmatprep.subr.bf16.mxu1 %v4538_v53  ;;  %v4581_v53 = vld [vmem:[%s4765_s30 + $0x5b0] sm:$0xff]  }
  0xd0   : > { %4087 = vmatpush3.bf16.msra.mxu0 %v4539_v13  ;;  %2383 = vmatmul.mubr.bf16.gmra.mrb[36].mxu1 %v5000_v27  ;;  %v4550_v27 = vld [vmem:[%s4765_s30 + $0x568] sm:$0xff]   ;;  %v4582_v13 = vld [vmem:[%s4765_s30 + $0x4f8] sm:$0xff]  }
  0xd1   : > { %4125 = vmatpush3.bf16.msra.mxu1 %v4540_v31  ;;  %4088 = vmatprep.subr.bf16.mxu0 %v4541_v23  ;;  %v4583_v31 = vld [vmem:[%s4765_s30 + $0x5f8] sm:$0xff]   ;;  %v492_v23 = vsel %vm452_vm3, %v5114_v57, %v491_v24  ;;  %v4586_v57 = vld [vmem:[%s4765_s30 + $0x608] sm:$0xff]  }
  0xd2   : > { %4126 = vmatprep.subr.bf16.mxu1 %v4542_v26  ;;  %2863 = vmatprep.mubr.bf16.mxu1 %v5105_v44  ;;  %v4553_v44 = vld [vmem:[%s4765_s30 + $0x4b0] sm:$0xff]   ;;  %v2095_v26 = vrot.slane %v5188_v51, 7 }
  0xd4   : > { %4089 = vmatpush3.bf16.msra.mxu0 %v4543_v20  ;;  %v4584_v20 = vld [vmem:[%s4765_s30 + $0x5b8] sm:$0xff]  }
  0xd5   : > { %4127 = vmatpush3.bf16.msra.mxu1 %v4544_v5  ;;  %4090 = vmatprep.subr.bf16.mxu0 %v4545_v43  ;;  %v4585_v5 = vld [vmem:[%s4765_s30 + $0x600] sm:$0xff]   ;;  %v2582_v43 = vrot.slane %v492_v23, 3 }
  0xd6   : > { %4128 = vmatprep.subr.bf16.mxu1 %v4546_v22  ;;  %v2096_v22 = vsel %vm669_vm1, %v693_v40, %v2095_v26  ;;  %v4590_v40 = vld [vmem:[%s4765_s30 + $0x620] sm:$0xff]  }
  0xd8   : > { %4091 = vmatpush3.bf16.msra.mxu0 %v4547_v29  ;;  %v2583_v29 = vsel %vm1092_vm4, %v1604_v18, %v2582_v43 }
  0xd9   : > { %4129 = vmatpush3.bf16.msra.mxu1 %v4548_v56  ;;  %4092 = vmatprep.subr.bf16.mxu0 %v4549_v17  ;;  %v4588_v56 = vld [vmem:[%s4765_s30 + $0x610] sm:$0xff]  }
  0xda   : > { %4130 = vmatprep.subr.bf16.mxu1 %v4550_v27  ;;  %v4592_v17 = vld [vmem:[%s4765_s30 + $0x630] sm:$0xff]   ;;  %v501_v27 = vrot.slane %v5273_v6, 6 }
  0xdc   : > { %4093 = vmatpush3.bf16.msra.mxu0 %v4551_v4 }
  0xdd   : > { %4131 = vmatpush3.bf16.msra.mxu1 %v4552_v35  ;;  %4094 = vmatprep.subr.bf16.mxu0 %v4553_v44 }
  0xde   : > { %4132 = vmatprep.subr.bf16.mxu1 %v4554_v1 }
  0xe0   : > { %4095 = vmatpush3.bf16.msra.mxu0 %v4555_v39 }
  0xe1   : > { %4133 = vmatpush3.bf16.msra.mxu1 %v4556_v61  ;;  %4096 = vmatprep.subr.bf16.mxu0 %v4557_v42  ;;  %v4593_v42 = vld [vmem:[%s4765_s30 + $0x638] sm:$0xff]  }
  0xe2   : > { %4134 = vmatprep.subr.bf16.mxu1 %v4558_v47  ;;  %v502_v47 = vsel %vm493_vm5, %v499_v3, %v501_v27 }
  0xe4   : > { %4097 = vmatpush3.bf16.msra.mxu0 %v4559_v48 }
  0xe5   : > { %4135 = vmatpush3.bf16.msra.mxu1 %v4560_v14  ;;  %4246 = vmatprep.subr.bf16.mxu0 %v4561_v30 }
  0xe6   : > { %4148 = vmatprep.subr.bf16.mxu1 %v4562_v52  ;;  %v2584_v52 = vrot.slane %v502_v47, 3 }
  0xe7   : > { %2424 = vmatmul.mubr.bf16.vlgmr.msra.gmra.mrb[20].mxu0 %v4905_v55  ;;  %v4568_v55 = vld [vmem:[%s4765_s30 + $0x5d0] sm:$0xff]  }
  0xe8   : > { %4247 = vmatpush3.bf16.msra.mxu0 %v4561_v30  ;;  %2864 = vmatmul.mubr.bf16.vlgmr.msra.gmra.mrb[40].mxu1 %v5099_v41  ;;  %v4570_v41 = vld [vmem:[%s4765_s30 + $0x4d8] sm:$0xff]  }
  0xe9   : > { %4149 = vmatpush3.bf16.msra.mxu1 %v4563_v58  ;;  %4248 = vmatprep.subr.bf16.mxu0 %v4564_v62 }
  0xea   : > { %4150 = vmatprep.subr.bf16.mxu1 %v4565_v12  ;;  %2431 = vmatprep.mubr.bf16.mxu0 %v2094_v36 }
  0xeb   : > { %2871 = vmatprep.mubr.bf16.mxu1 %v5146_v16  ;;  %v4574_v16 = vld [vmem:[%s4765_s30 + $0x5e0] sm:$0xff]  }
  0xec   : > { %4249 = vmatpush3.bf16.msra.mxu0 %v4564_v62  ;;  %v2585_v62 = vsel %vm1092_vm4, %v1606_v63, %v2584_v52 }
  0xed   : > { %4151 = vmatpush3.bf16.msra.mxu1 %v4566_v0  ;;  %4250 = vmatprep.subr.bf16.mxu0 %v4567_v28 }
  0xee   : > { %4152 = vmatprep.subr.bf16.mxu1 %v4568_v55 }
  0xef   : > { %2432 = vmatmul.mubr.bf16.gmra.mrb[24].mxu0 %v2092_v32 }
  0xf0   : > { %4251 = vmatpush3.bf16.msra.mxu0 %v4567_v28  ;;  %2872 = vmatmul.mubr.bf16.gmra.mrb[44].mxu1 %v2577_v9 }
  0xf1   : > { %4153 = vmatpush3.bf16.msra.mxu1 %v4569_v37  ;;  %4252 = vmatprep.subr.bf16.mxu0 %v4570_v41 }
  0xf2   : > { %4154 = vmatprep.subr.bf16.mxu1 %v4571_v60  ;;  %2912 = vmatprep.mubr.bf16.mxu1 %v5154_v7  ;;  %v4578_v7 = vld [vmem:[%s4765_s30 + $0x5a8] sm:$0xff]  }
  0xf3   : > { %4262 = vmatprep.mubr.bf16.mxu0 %v4994_v50  ;;  %v4579_v50 = vld [vmem:[%s4765_s30 + $0x4f0] sm:$0xff]  }
  0xf4   : > { %4253 = vmatpush3.bf16.msra.mxu0 %v4570_v41 }
  0xf5   : > { %4155 = vmatpush3.bf16.msra.mxu1 %v4572_v38  ;;  %4254 = vmatprep.subr.bf16.mxu0 %v4573_v45 }
  0xf6   : > { %4156 = vmatprep.subr.bf16.mxu1 %v4574_v16 }
  0xf8   : > { %4255 = vmatpush3.bf16.msra.mxu0 %v4573_v45 }
  0xf9   : > { %4157 = vmatpush3.bf16.msra.mxu1 %v4575_v19  ;;  %4256 = vmatprep.subr.bf16.mxu0 %v4576_v59 }
  0xfa   : > { %4158 = vmatprep.subr.bf16.mxu1 %v4577_v33 }
  0xfc   : > { %4257 = vmatpush3.bf16.msra.mxu0 %v4576_v59 }
  0xfd   : > { %4159 = vmatpush3.bf16.msra.mxu1 %v4578_v7  ;;  %4258 = vmatprep.subr.bf16.mxu0 %v4579_v50 }
  0xfe   : > { %4160 = vmatprep.subr.bf16.mxu1 %v4580_v49 }
 0x100   : > { %4259 = vmatpush3.bf16.msra.mxu0 %v4579_v50 }
 0x101   : > { %4161 = vmatpush3.bf16.msra.mxu1 %v4581_v53  ;;  %4260 = vmatprep.subr.bf16.mxu0 %v4582_v13 }
 0x102   : > { %4162 = vmatprep.subr.bf16.mxu1 %v4583_v31 }
 0x104   : > { %4261 = vmatpush3.bf16.msra.mxu0 %v4582_v13 }
 0x105   : > { %4163 = vmatpush3.bf16.msra.mxu1 %v4584_v20  ;;  %4266 = vmatprep.subr.bf16.mxu0 %v4585_v5 }
 0x107   : > { %4263 = vmatmul.mubr.bf16.vlgmr.msra.gmra.mrb[8].mxu0 %v2096_v22 }
 0x108   : > { %2913 = vmatmul.mubr.bf16.vlgmr.msra.gmra.mrb[48].mxu1 %v5165_v34  ;;  %4267 = vmatpush3.bf16.msra.mxu0 %v4585_v5 }
 0x109   : > { %4268 = vmatprep.subr.bf16.mxu0 %v4586_v57  ;;  %2920 = vmatprep.mubr.bf16.mxu1 %v2583_v29 }
 0x10a   : > { %4282 = vmatprep.mubr.bf16.mxu0 %v5202_v21 }
 0x10c   : > { %4269 = vmatpush3.bf16.msra.mxu0 %v4586_v57 }
 0x10d   : > { %4270 = vmatprep.subr.bf16.mxu0 %v4588_v56 }
 0x110   : > { %2921 = vmatmul.mubr.bf16.gmra.mrb[52].mxu1 %v5136_v11  ;;  %4271 = vmatpush3.bf16.msra.mxu0 %v4588_v56 }
 0x111   : > { %4272 = vmatprep.subr.bf16.mxu0 %v4589_v8 }
 0x114   : > { %4273 = vmatpush3.bf16.msra.mxu0 %v4589_v8 }
 0x115   : > { %4274 = vmatprep.subr.bf16.mxu0 %v4590_v40 }
 0x118   : > { %4275 = vmatpush3.bf16.msra.mxu0 %v4590_v40 }
 0x119   : > { %4276 = vmatprep.subr.bf16.mxu0 %v4591_v25 }
 0x11a   : > { %v3872_v18 = vpop.f32.mrb[0].mxu0 }
 0x11b   : > { %v3873_v34 = vpop.f32.mrb[1].mxu0  ;;  %v3900_v35 = vpop.f32.mrb[0].mxu1 }
 0x11c   : > { %v3874_v21 = vadd.f32 %v3873_v34, %v3872_v18  ;;  %v3875_v4 = vpop.f32.mrb[2].mxu0  ;;  %v3901_v1 = vpop.f32.mrb[1].mxu1  ;;  %4277 = vmatpush3.bf16.msra.mxu0 %v4591_v25 }
 0x11d   : > { %v3876_v44 = vpop.f32.mrb[3].mxu0  ;;  %v3902_v39 = vadd.f32 %v3901_v1, %v3900_v35  ;;  %v3903_v61 = vpop.f32.mrb[2].mxu1  ;;  %4278 = vmatprep.subr.bf16.mxu0 %v4592_v17 }
 0x11e   : > { %v3877_v11 = vadd.f32 %v3876_v44, %v3875_v4  ;;  %v3904_v48 = vpop.f32.mrb[3].mxu1 }
 0x11f   : > { %v1029_v14 = vadd.f32 %v3902_v39, %v3874_v21  ;;  %v3905_v30 = vadd.f32 %v3904_v48, %v3903_v61 }
 0x120   : > { %4279 = vmatpush3.bf16.msra.mxu0 %v4592_v17 }
 0x121   : > { %v1032_v46 = vadd.f32 %v3905_v30, %v3877_v11  ;;  %4280 = vmatprep.subr.bf16.mxu0 %v4593_v42 }
 0x122   : > { %v3878_v3 = vpop.f32.mrb[4].mxu0 }
 0x123   : > { %v3906_v58 = vpop.f32.mrb[4].mxu1  ;;  %v3879_v28 = vpop.f32.mrb[5].mxu0 }
 0x124   : > { %4281 = vmatpush3.bf16.msra.mxu0 %v4593_v42  ;;  %v3907_v12 = vpop.f32.mrb[5].mxu1  ;;  %v3880_v2 = vadd.f32 %v3879_v28, %v3878_v3  ;;  %v3881_v55 = vpop.f32.mrb[6].mxu0 }
 0x125   : > { %v3908_v36 = vadd.f32 %v3907_v12, %v3906_v58  ;;  %v3909_v0 = vpop.f32.mrb[6].mxu1  ;;  %v3882_v32 = vpop.f32.mrb[7].mxu0 }
 0x126   : > { %v3910_v54 = vpop.f32.mrb[7].mxu1  ;;  %v3883_v41 = vadd.f32 %v3882_v32, %v3881_v55 }
 0x127   : > { %4283 = vmatmul.mubr.bf16.vlgmr.msra.gmra.mrb[8].mxu0 %v2585_v62  ;;  %v3911_v15 = vadd.f32 %v3910_v54, %v3909_v0  ;;  %v1037_v37 = vadd.f32 %v3908_v36, %v3880_v2 }
 0x129   : > { %v1040_v9 = vadd.f32 %v3911_v15, %v3883_v41 }
 0x13b   : > { %v3938_v60 = vpop.f32.mrb[8].mxu1 }
 0x13c   : > { %v3939_v38 = vpop.f32.mrb[9].mxu1 }
 0x13d   : > { %v3940_v45 = vadd.f32 %v3939_v38, %v3938_v60  ;;  %v3941_v51 = vpop.f32.mrb[10].mxu1 }
 0x13e   : > { %v3942_v16 = vpop.f32.mrb[11].mxu1 }
 0x13f   : > { %v4292_v63 = vadd.f32 %v3940_v45, %v1029_v14  ;;  %v3943_v6 = vadd.f32 %v3942_v16, %v3941_v51 }
 0x141   : > { %v4304_v19 = vadd.f32 %v3943_v6, %v1032_v46 }
 0x143   : > { %v3944_v59 = vpop.f32.mrb[12].mxu1 }
 0x144   : > { %v3945_v33 = vpop.f32.mrb[13].mxu1 }
 0x145   : > { %v3946_v10 = vadd.f32 %v3945_v33, %v3944_v59  ;;  %v3947_v7 = vpop.f32.mrb[14].mxu1 }
 0x146   : > { %v3948_v50 = vpop.f32.mrb[15].mxu1 }
 0x147   : > { %v4286_v49 = vadd.f32 %v3946_v10, %v1037_v37  ;;  %v3949_v24 = vadd.f32 %v3948_v50, %v3947_v7 }
 0x149   : > { %v4298_v53 = vadd.f32 %v3949_v24, %v1040_v9 }
 0x15a   : > { %v3966_v13 = vpop.f32.mrb[12].mxu0 }
 0x15b   : > { %v3967_v31 = vpop.f32.mrb[13].mxu0  ;;  %v4004_v23 = vpop.f32.mrb[16].mxu1 }
 0x15c   : > { %v3968_v26 = vadd.f32 %v3967_v31, %v3966_v13  ;;  %v3969_v20 = vpop.f32.mrb[14].mxu0  ;;  %v4005_v5 = vpop.f32.mrb[17].mxu1 }
 0x15d   : > { %v3970_v43 = vpop.f32.mrb[15].mxu0  ;;  %v4006_v22 = vadd.f32 %v4005_v5, %v4004_v23  ;;  %v4007_v57 = vpop.f32.mrb[18].mxu1 }
 0x15e   : > { %v4293_v29 = vadd.f32 %v4292_v63, %v3968_v26  ;;  %v3971_v56 = vadd.f32 %v3970_v43, %v3969_v20  ;;  %v4008_v8 = vpop.f32.mrb[19].mxu1 }
 0x15f   : > { %v4009_v40 = vadd.f32 %v4008_v8, %v4007_v57 }
 0x160   : > { %v4305_v25 = vadd.f32 %v4304_v19, %v3971_v56 }
 0x162   : > { %v3972_v18 = vpop.f32.mrb[16].mxu0 }
 0x163   : > { %v3973_v34 = vpop.f32.mrb[17].mxu0 }
 0x164   : > { %v3974_v17 = vadd.f32 %v3973_v34, %v3972_v18  ;;  %v3975_v27 = vpop.f32.mrb[18].mxu0 }
 0x165   : > { %v3976_v21 = vpop.f32.mrb[19].mxu0  ;;  %v4010_v1 = vpop.f32.mrb[20].mxu1 }
 0x166   : > { %v4287_v4 = vadd.f32 %v4286_v49, %v3974_v17  ;;  %v3977_v35 = vadd.f32 %v3976_v21, %v3975_v27  ;;  %v4011_v11 = vpop.f32.mrb[21].mxu1 }
 0x167   : > { %v4012_v39 = vadd.f32 %v4011_v11, %v4010_v1  ;;  %v4013_v61 = vpop.f32.mrb[22].mxu1 }
 0x168   : > { %v4299_v44 = vadd.f32 %v4298_v53, %v3977_v35  ;;  %v4014_v42 = vpop.f32.mrb[23].mxu1 }
 0x169   : > { %v4015_v47 = vadd.f32 %v4014_v42, %v4013_v61 }
 0x17b   : > { %v4032_v48 = vpop.f32.mrb[24].mxu1 }
 0x17c   : > { %v4033_v14 = vpop.f32.mrb[25].mxu1 }
 0x17d   : > { %v4034_v30 = vadd.f32 %v4033_v14, %v4032_v48  ;;  %v4035_v52 = vpop.f32.mrb[26].mxu1 }
 0x17e   : > { %v4036_v46 = vpop.f32.mrb[27].mxu1 }
 0x17f   : > { %v1937_v58 = vadd.f32 %v4034_v30, %v4006_v22  ;;  %v4037_v62 = vadd.f32 %v4036_v46, %v4035_v52 }
 0x181   : > { %v4294_v12 = vadd.f32 %v4293_v29, %v1937_v58  ;;  %v1940_v36 = vadd.f32 %v4037_v62, %v4009_v40 }
 0x183   : > { %v4306_v0 = vadd.f32 %v4305_v25, %v1940_v36  ;;  %v4038_v54 = vpop.f32.mrb[28].mxu1 }
 0x184   : > { %v4039_v15 = vpop.f32.mrb[29].mxu1 }
 0x185   : > { %v4040_v3 = vadd.f32 %v4039_v15, %v4038_v54  ;;  %v4041_v28 = vpop.f32.mrb[30].mxu1 }
 0x186   : > { %v4042_v2 = vpop.f32.mrb[31].mxu1 }
 0x187   : > { %v1945_v55 = vadd.f32 %v4040_v3, %v4012_v39  ;;  %v4043_v32 = vadd.f32 %v4042_v2, %v4041_v28 }
 0x189   : > { %v4288_v37 = vadd.f32 %v4287_v4, %v1945_v55  ;;  %v1948_v41 = vadd.f32 %v4043_v32, %v4015_v47 }
 0x18b   : > { %v4300_v9 = vadd.f32 %v4299_v44, %v1948_v41 }
 0x19b   : > { %v4070_v60 = vpop.f32.mrb[32].mxu1 }
 0x19c   : > { %v4071_v38 = vpop.f32.mrb[33].mxu1 }
 0x19d   : > { %v4072_v45 = vadd.f32 %v4071_v38, %v4070_v60  ;;  %v4073_v51 = vpop.f32.mrb[34].mxu1  ;;  %v2984_v38 = vld [vmem:[%s4739_s15 + $0x10] sm:$0xff] }
 0x19e   : > { %v4074_v16 = vpop.f32.mrb[35].mxu1 }
 0x19f   : > { %v4075_v63 = vadd.f32 %v4074_v16, %v4073_v51  ;;  %v2982_v16 = vld [vmem:[%s4739_s15] sm:$0xff] }
 0x1a3   : > { %v4076_v6 = vpop.f32.mrb[36].mxu1 }
 0x1a4   : > { %v4077_v19 = vpop.f32.mrb[37].mxu1 }
 0x1a5   : > { %v4078_v59 = vadd.f32 %v4077_v19, %v4076_v6  ;;  %v4079_v33 = vpop.f32.mrb[38].mxu1  ;;  %v2985_v19 = vld [vmem:[%s4739_s15 + $0x18] sm:$0xff] }
 0x1a6   : > { %v4080_v10 = vpop.f32.mrb[39].mxu1 }
 0x1a7   : > { %v4081_v7 = vadd.f32 %v4080_v10, %v4079_v33 }
 0x1ba   : > { %v4098_v50 = vpop.f32.mrb[20].mxu0 }
 0x1bb   : > { %v4099_v49 = vpop.f32.mrb[21].mxu0  ;;  %v4136_v24 = vpop.f32.mrb[40].mxu1 }
 0x1bc   : > { %v4100_v53 = vadd.f32 %v4099_v49, %v4098_v50  ;;  %v4101_v13 = vpop.f32.mrb[22].mxu0  ;;  %v4137_v31 = vpop.f32.mrb[41].mxu1 }
 0x1bd   : > { %v4102_v23 = vpop.f32.mrb[23].mxu0  ;;  %v4138_v26 = vadd.f32 %v4137_v31, %v4136_v24  ;;  %v4139_v20 = vpop.f32.mrb[42].mxu1 }
 0x1be   : > { %v2426_v5 = vadd.f32 %v4100_v53, %v4072_v45  ;;  %v4103_v43 = vadd.f32 %v4102_v23, %v4101_v13  ;;  %v4140_v22 = vpop.f32.mrb[43].mxu1 }
 0x1bf   : > { %v4141_v57 = vadd.f32 %v4140_v22, %v4139_v20 }
 0x1c0   : > { %v2429_v29 = vadd.f32 %v4103_v43, %v4075_v63  ;;  %v4295_v56 = vadd.f32 %v4294_v12, %v2426_v5 }
 0x1c2   : > { %v4104_v8 = vpop.f32.mrb[24].mxu0  ;;  %v4307_v40 = vadd.f32 %v4306_v0, %v2429_v29 }
 0x1c3   : > { %v4105_v25 = vpop.f32.mrb[25].mxu0  ;;  %v4142_v18 = vpop.f32.mrb[44].mxu1 }
 0x1c4   : > { %v4106_v34 = vadd.f32 %v4105_v25, %v4104_v8  ;;  %v4107_v17 = vpop.f32.mrb[26].mxu0  ;;  %v4143_v27 = vpop.f32.mrb[45].mxu1 }
 0x1c5   : > { %v4108_v21 = vpop.f32.mrb[27].mxu0  ;;  %v4144_v4 = vadd.f32 %v4143_v27, %v4142_v18  ;;  %v4145_v35 = vpop.f32.mrb[46].mxu1 }
 0x1c6   : > { %v2434_v44 = vadd.f32 %v4106_v34, %v4078_v59  ;;  %v4109_v1 = vadd.f32 %v4108_v21, %v4107_v17  ;;  %v4146_v11 = vpop.f32.mrb[47].mxu1 }
 0x1c7   : > { %v4147_v39 = vadd.f32 %v4146_v11, %v4145_v35 }
 0x1c8   : > { %v2437_v61 = vadd.f32 %v4109_v1, %v4081_v7  ;;  %v4289_v42 = vadd.f32 %v4288_v37, %v2434_v44  ;;  %v2983_v7 = vld [vmem:[%s4739_s15 + $0x8] sm:$0xff] }
 0x1ca   : > { %v4301_v47 = vadd.f32 %v4300_v9, %v2437_v61 }
 0x1db   : > { %v4164_v48 = vpop.f32.mrb[48].mxu1 }
 0x1dc   : > { %v4165_v14 = vpop.f32.mrb[49].mxu1 }
 0x1dd   : > { %v4166_v30 = vadd.f32 %v4165_v14, %v4164_v48  ;;  %v4167_v52 = vpop.f32.mrb[50].mxu1 }
 0x1de   : > { %v4168_v46 = vpop.f32.mrb[51].mxu1 }
 0x1df   : > { %v2915_v58 = vadd.f32 %v4166_v30, %v4138_v26  ;;  %v4169_v62 = vadd.f32 %v4168_v46, %v4167_v52 }
 0x1e1   : > { %v2918_v12 = vadd.f32 %v4169_v62, %v4141_v57  ;;  %v4296_v36 = vadd.f32 %v4295_v56, %v2915_v58 }
 0x1e3   : > { %v4170_v0 = vpop.f32.mrb[52].mxu1  ;;  %v4308_v54 = vadd.f32 %v4307_v40, %v2918_v12 }
 0x1e4   : > { %v4171_v15 = vpop.f32.mrb[53].mxu1 }
 0x1e5   : > { %v4172_v3 = vadd.f32 %v4171_v15, %v4170_v0  ;;  %v4173_v28 = vpop.f32.mrb[54].mxu1 }
 0x1e6   : > { %v4174_v2 = vpop.f32.mrb[55].mxu1 }
 0x1e7   : > { %v2923_v55 = vadd.f32 %v4172_v3, %v4144_v4  ;;  %v4175_v32 = vadd.f32 %v4174_v2, %v4173_v28 }
 0x1e9   : > { %v2926_v37 = vadd.f32 %v4175_v32, %v4147_v39  ;;  %v4290_v41 = vadd.f32 %v4289_v42, %v2923_v55 }
 0x1eb   : > { %v4302_v9 = vadd.f32 %v4301_v47, %v2926_v37 }
 0x1fa   : > { %v4284_v60 = vpop.f32.mrb[8].mxu0 }
 0x1fb   : > { %v4291_v45 = vadd.f32 %v4290_v41, %v4284_v60  ;;  %v2963_v51 = vpop.f32.mrb[9].mxu0 }
 0x1fc   : > { %v4297_v63 = vadd.f32 %v4296_v36, %v2963_v51  ;;  %v4285_v6 = vpop.f32.mrb[10].mxu0 }
 0x1fd   : > { %v2988_v59 = vadd.f32 %v4291_v45, %v2984_v38  ;;  %v4303_v33 = vadd.f32 %v4302_v9, %v4285_v6  ;;  %v2966_v10 = vpop.f32.mrb[11].mxu0 }
 0x1fe   : > { %v2986_v50 = vadd.f32 %v4297_v63, %v2982_v16  ;;  %v4309_v49 = vadd.f32 %v4308_v54, %v2966_v10 }
 0x1ff   : > { %2992 = vst [vmem:[%s4739_s15 + $0x10] sm:$0xff] %v2988_v59  ;;  %v2989_v24 = vadd.f32 %v4303_v33, %v2985_v19 }
 0x200   : > { %2990 = vst [vmem:[%s4739_s15] sm:$0xff] %v2986_v50  ;;  %v2987_v53 = vadd.f32 %v4309_v49, %v2983_v7 }
 0x201   : > { %2993 = vst [vmem:[%s4739_s15 + $0x18] sm:$0xff] %v2989_v24 }
 0x202   : > { %2991 = vst [vmem:[%s4739_s15 + $0x8] sm:$0xff] %v2987_v53 }
 0x203 PF: > { %p3844_p0 = scmp.ne.s32.totalorder %s4624_s18, 4 }
 0x204   : > { %v2998_v13 = vlaneseq (!%p3844_p0)  ;;  %v3845_v23 = vld [vmem:[%s5366_s2] ss:$0 sm:$0xff] (!%p3844_p0) }
 0x205   : > { %2997 = sbr.rel (%p3844_p0) target bundleno = 547 (0x223), region = 44 }
 0x206   : > { %v2999_v26 = vshrl.u32 (!%p3844_p0), %v2998_v13, 7  ;;  %v3057_v5 = vld [vmem:[%s4739_s15 + $0x10] sm:$0xff] (!%p3844_p0) }
 0x207   : > { %v3055_v31 = vld [vmem:[%s4739_s15] sm:$0xff] (!%p3844_p0)  ;;  %v3068_v25 = vadd.f32 (!%p3844_p0), %v3845_v23, %v3057_v5 }
 0x208   : > { %v3058_v43 = vld [vmem:[%s4739_s15 + $0x18] sm:$0xff] (!%p3844_p0)  ;;  %v3066_v22 = vadd.f32 (!%p3844_p0), %v3845_v23, %v3055_v31  ;;  %v3007_v57 = vand.u32 (!%p3844_p0), 7, %v2999_v26  ;;  %v3000_v29 = vadd.s32 (!%p3844_p0), 8, %v2999_v26  ;;  %v3001_v56 = vadd.s32 (!%p3844_p0), 16, %v2999_v26 }
 0x209   : > { %v3056_v20 = vld [vmem:[%s4739_s15 + $0x8] sm:$0xff] (!%p3844_p0)  ;;  %v3002_v8 = vadd.s32 (!%p3844_p0), 24, %v2999_v26  ;;  %v3069_v18 = vadd.f32 (!%p3844_p0), %v3845_v23, %v3058_v43 }
 0x20a   : > { %v3067_v40 = vadd.f32 (!%p3844_p0), %v3845_v23, %v3056_v20  ;;  %vm3051_vm6 = vcmp.lt.s32.totalorder (!%p3844_p0), %v3007_v57, 4  ;;  %v3014_v34 = vand.u32 (!%p3844_p0), 7, %v3000_v29  ;;  %v3021_v17 = vand.u32 (!%p3844_p0), 7, %v3001_v56 }
 0x20b   : > { %v3028_v27 = vand.u32 (!%p3844_p0), 7, %v3002_v8  ;;  %v3078_v21 = vsel (!%p3844_p0), %vm3051_vm6, %v3066_v22, 0.0 }
 0x20c   : > { %3082 = vst [vmem:[%s4739_s15] sm:$0xff] %v3078_v21  ;;  %v3096_v4 = vmul.f32 %v3078_v21, %v3078_v21  ;;  %vm3052_vm7 = vcmp.lt.s32.totalorder %v3014_v34, 4  ;;  %vm3053_vm8 = vcmp.lt.s32.totalorder %v3021_v17, 4 }
 0x20d   : > { %vm3054_vm9 = vcmp.lt.s32.totalorder %v3028_v27, 4  ;;  %v3079_v35 = vsel %vm3052_vm7, %v3067_v40, 0.0  ;;  %v3080_v44 = vsel %vm3053_vm8, %v3068_v25, 0.0 }
 0x20e   : > { %v3081_v1 = vsel %vm3054_vm9, %v3069_v18, 0.0  ;;  %3083 = vst [vmem:[%s4739_s15 + $0x8] sm:$0xff] %v3079_v35  ;;  %v3086_v11 = vadd.f32 %v3079_v35, %v3078_v21  ;;  %v3097_v39 = vmul.f32 %v3079_v35, %v3079_v35  ;;  %3084 = vst [vmem:[%s4739_s15 + $0x10] sm:$0xff] %v3080_v44  ;;  %v3098_v61 = vmul.f32 %v3080_v44, %v3080_v44 }
 0x20f   : > { %3085 = vst [vmem:[%s4739_s15 + $0x18] sm:$0xff] %v3081_v1  ;;  %v3099_v48 = vmul.f32 %v3081_v1, %v3081_v1 }
 0x210   : > { %v3100_v42 = vadd.f32 %v3097_v39, %v3096_v4  ;;  %v3087_v47 = vadd.f32 %v3086_v11, %v3080_v44 }
 0x212   : > { %v3101_v14 = vadd.f32 %v3100_v42, %v3098_v61  ;;  %v3088_v30 = vadd.f32 %v3087_v47, %v3081_v1 }
 0x214   : > { %v3089_v52 = vrot.slane %v3088_v30, 4  ;;  %v3102_v46 = vadd.f32 %v3101_v14, %v3099_v48 }
 0x216   : > { %v3090_v58 = vadd.f32 %v3089_v52, %v3088_v30  ;;  %v3103_v62 = vrot.slane %v3102_v46, 4 }
 0x218   : > { %v3091_v12 = vrot.slane %v3090_v58, 2  ;;  %v3104_v36 = vadd.f32 %v3103_v62, %v3102_v46 }
 0x21a   : > { %v3092_v0 = vadd.f32 %v3091_v12, %v3090_v58  ;;  %v3105_v54 = vrot.slane %v3104_v36, 2 }
 0x21c   : > { %v3093_v15 = vrot.slane %v3092_v0, 1  ;;  %v3106_v3 = vadd.f32 %v3105_v54, %v3104_v36 }
 0x21e   : > { %v3094_v28 = vadd.f32 %v3093_v15, %v3092_v0  ;;  %v3107_v2 = vrot.slane %v3106_v3, 1 }
 0x220   : > { %3095 = vst [vmem:[%s337_s11] sm:$0x1] %v3094_v28  ;;  %v3108_v55 = vadd.f32 %v3107_v2, %v3106_v3 }
 0x222   : > { %3109 = vst [vmem:[%s344_s19] sm:$0x1] %v3108_v55 }
 0x223 PF: > { %s16_s24 = sadd.s32 1, %s4648_s24   ;;  %s5372_s13 = sld [smem:[#allocation2_spill]] }
 0x224   : > { %p13_p1 = scmp.ge.s32.totalorder %s16_s24, 42   ;;  %s5373_s14 = sld [smem:[#allocation3_spill]] }
 0x225   : > { %s5374_s18 = smov %s4636_s21  ;;  %s5375_s19 = smov %s4640_s22 }
 0x226   : > { %s5376_s20 = smov %s4644_s23  ;;  %s5377_s21 = smov %s5381_s25 }
 0x227   :  { %15 = sbr.rel (!%p13_p1) target bundleno = 4 (0x4), region = 103 }
 0x229   : > { %s5378_s22 = smov %s5372_s13 }
 0x22a   : > { %s5379_s23 = smov %s5373_s14 }

</bundles_post_ra>
